<compile_context>
chip_gen: v5e
topology: v5e:2x2
jax: 0.10.0
libtpu: 0.0.40
codegen_flags: <defaults>
</compile_context>

<pallas_src>
import functools

import jax
import jax.numpy as jnp
from jax.experimental import pallas as pl
from jax.experimental.pallas import tpu as pltpu


def _round_up(x, m):
    return ((x + m - 1) // m) * m


# ----------------------------------------------------------------------------
# Fused Pallas kernel: all stacked conv layers + relu + mask + 1x1 pred.
# ----------------------------------------------------------------------------
def _predictor_kernel(*refs, k, wfull, l_outs, m_chunk):
    num_layers = len(l_outs)
    ntaps = k * k
    npairs = (ntaps + 1) // 2

    x0_ref = refs[0]                              # layer-0 im2col'd input (L0, K0)
    layer_refs = []
    idx = 1
    for _ in range(num_layers):
        layer_refs.append((refs[idx], refs[idx + 1], refs[idx + 2]))
        idx += 3
    wp_ref, bp_ref = refs[idx], refs[idx + 1]
    out_ref = refs[idx + 2]
    scratch_refs = refs[idx + 3:]

    # Hoisted grid-invariant loads (re-emitted per chunk otherwise; JAX does
    # not CSE them across the Python-unrolled loops).
    wp_row = wp_ref[...]                          # (1, cpad) f32
    bp_val = bp_ref[...]                          # (1, 1)    f32

    src = x0_ref
    for l in range(num_layers):
        w_ref, b_ref, m_ref = layer_refs[l]
        L_out = l_outs[l]
        cout = w_ref.shape[-1]
        last_layer = l == num_layers - 1
        bias = b_ref[...]                         # hoisted out of the chunk loop

        for m0 in range(0, L_out, m_chunk):       # static row chunking
            msz = min(m_chunk, L_out - m0)
            if l == 0:
                # Layer 0: host im2col'd -> single K=128 matmul per chunk.
                acc = jnp.dot(src[pl.ds(m0, msz), :], w_ref[...],
                              preferred_element_type=jnp.float32)
            else:
                # Layers >= 1: pair taps along K.  Two 128-lane patches are
                # concatenated at a lane boundary (pure layout) -> K=256 matmul.
                acc = jnp.zeros((msz, cout), jnp.float32)
                for p in range(npairs):
                    ta, tb = 2 * p, 2 * p + 1
                    off_a = (ta // k) * wfull + (ta % k)
                    patch_a = src[pl.ds(m0 + off_a, msz), :]
                    if tb < ntaps:
                        off_b = (tb // k) * wfull + (tb % k)
                        patch_b = src[pl.ds(m0 + off_b, msz), :]
                    else:
                        # odd leftover tap: second-half weights are zero, so
                        # the second patch's values are irrelevant.
                        patch_b = patch_a
                    lhs = jnp.concatenate([patch_a, patch_b], axis=1)
                    acc = acc + jnp.dot(lhs, w_ref[p],
                                        preferred_element_type=jnp.float32)
            # f32 epilogue (v5e has no bf16 VPU/EUP; hides under MXU anyway).
            y = jnp.maximum(acc + bias, 0.0) * m_ref[pl.ds(m0, msz), :]
            if last_layer:
                # fused 1x1 pred as a lane reduction (avoids an N=1 MXU op and
                # an HBM round trip of the (M, hidden) activation).
                pcol = jnp.sum(y * wp_row, axis=1, keepdims=True) + bp_val
                out_ref[pl.ds(m0, msz), :] = pcol.astype(out_ref.dtype)
            else:
                scratch_refs[l][pl.ds(m0, msz), :] = y.astype(scratch_refs[l].dtype)
        if not last_layer:
            src = scratch_refs[l]


# ----------------------------------------------------------------------------
# Forward pass (single fused pallas_call over a batch grid)
# ----------------------------------------------------------------------------
def predictor_forward(x_nchw, conv_params, pred_params, mask_weights, k,
                      first_padding, m_chunk=128):
    B, Cin, H, W = x_nchw.shape
    num_layers = len(conv_params)
    hidden = conv_params[0][0].shape[-1]
    cpad = _round_up(hidden, 128)                 # lane-dense channel width
    ntaps = k * k
    npairs = (ntaps + 1) // 2

    Hp, Wp = H + 2 * first_padding, W + 2 * first_padding
    wfull = Wp                                    # constant flat width
    Ho, Wo = [Hp - k + 1], [Wp - k + 1]
    for _ in range(1, num_layers):
        Ho.append(Ho[-1] - k + 1)
        Wo.append(Wo[-1] - k + 1)
    Hf, Wf = Ho[-1], Wo[-1]

    l_pred = Hf * wfull                           # valid rows fed to the 1x1 pred
    slack = (k - 1) * (wfull + 1)                 # extra rows each conv reads
    # Sublane-friendly row counts: round every layer's working set up to 16.
    l_outs = [0] * num_layers
    l_outs[-1] = _round_up(l_pred, 16)
    for l in range(num_layers - 2, -1, -1):
        l_outs[l] = _round_up(l_outs[l + 1] + slack, 16)
    l_in_rows = l_outs[0] + slack                 # rows of the padded flat input

    # Exact bound checks (VMEM OOB is unchecked at runtime).
    for l in range(1, num_layers):
        assert l_outs[l - 1] >= l_outs[l] + slack, (l, l_outs, slack)
    assert l_in_rows >= Hp * Wp, (l_in_rows, Hp * Wp)

    K0 = _round_up(ntaps * Cin, 128)              # layer-0 im2col contraction dim

    # --- host-side prep ------------------------------------------------------
    # NCHW -> NHWC, spatial zero-pad, flatten rows, then im2col of layer 0 ONLY
    # (collapses its 9 K=Cin taps into one K=128 matmul inside the kernel).
    xh = jnp.transpose(x_nchw, (0, 2, 3, 1))
    xp = jnp.pad(xh, ((0, 0), (first_padding, first_padding),
                      (first_padding, first_padding), (0, 0)))
    x_flat = xp.reshape(B, Hp * Wp, Cin)
    x_flat = jnp.pad(x_flat, ((0, 0), (0, l_in_rows - Hp * Wp), (0, 0)))
    taps0 = []
    for di in range(k):
        for dj in range(k):
            off = di * wfull + dj
            taps0.append(jax.lax.slice_in_dim(x_flat, off, off + l_outs[0], axis=1))
    x0 = jnp.concatenate(taps0, axis=-1)                       # (B, L0, k*k*Cin)
    x0 = jnp.pad(x0, ((0, 0), (0, 0), (0, K0 - ntaps * Cin))).astype(jnp.bfloat16)

    inputs = [x0]
    in_specs = [pl.BlockSpec((None, l_outs[0], K0), lambda b: (b, 0, 0))]

    for l, (w, bias) in enumerate(conv_params):
        kh, kw, cin, cout = w.shape
        if l == 0:
            # single (K0, cpad) matrix matching the host im2col tap/channel order
            w_p = jnp.zeros((ntaps * cin, cpad), jnp.float32)
            w_p = w_p.at[:, :cout].set(w.reshape(ntaps * cin, cout))
            w_p = jnp.pad(w_p, ((0, K0 - ntaps * cin), (0, 0))).astype(jnp.bfloat16)
            w_spec = pl.BlockSpec((K0, cpad), lambda b: (0, 0))
        else:
            # pair taps along the contraction dim: (npairs, 2*cpad, cpad);
            # the odd leftover tap's second half is zero.
            wt = jnp.zeros((ntaps, cpad, cpad), jnp.float32)
            wt = wt.at[:, :cin, :cout].set(w.reshape(ntaps, cin, cout))
            w_p = jnp.zeros((npairs, 2 * cpad, cpad), jnp.float32)
            w_p = w_p.at[:, :cpad, :].set(wt[0::2])
            w_p = w_p.at[:ntaps // 2, cpad:, :].set(wt[1::2])
            w_p = w_p.astype(jnp.bfloat16)
            w_spec = pl.BlockSpec((npairs, 2 * cpad, cpad), lambda b: (0, 0, 0))
        b_p = jnp.zeros((1, cpad), jnp.float32).at[0, :cout].set(bias)
        # extended mask weight: zero outside the valid (Ho, Wo) region and on
        # the rounded tail rows.
        mw = jnp.pad(mask_weights[l].astype(jnp.float32),
                     ((0, 0), (0, wfull - Wo[l]))).reshape(-1)
        m_e = jnp.zeros((l_outs[l], 1), jnp.float32)
        m_e = m_e.at[:Ho[l] * wfull, 0].set(mw)

        inputs += [w_p, b_p, m_e]
        in_specs += [w_spec,
                     pl.BlockSpec((1, cpad), lambda b: (0, 0)),
                     pl.BlockSpec((l_outs[l], 1), lambda b: (0, 0))]

    wp, bp = pred_params
    wp_p = jnp.zeros((1, cpad), jnp.float32).at[0, :hidden].set(wp.reshape(-1))
    bp_p = bp.reshape(1, 1).astype(jnp.float32)
    inputs += [wp_p, bp_p]
    in_specs += [pl.BlockSpec((1, cpad), lambda b: (0, 0)),
                 pl.BlockSpec((1, 1), lambda b: (0, 0))]

    kernel = functools.partial(_predictor_kernel, k=k, wfull=wfull,
                               l_outs=tuple(l_outs), m_chunk=m_chunk)

    out_flat = pl.pallas_call(
        kernel,
        out_shape=jax.ShapeDtypeStruct((B, l_outs[-1], 1), jnp.float32),
        grid=(B,),
        in_specs=in_specs,
        out_specs=pl.BlockSpec((None, l_outs[-1], 1), lambda b: (b, 0, 0)),
        scratch_shapes=[pltpu.VMEM((l_outs[l], cpad), jnp.bfloat16)
                        for l in range(num_layers - 1)],
        compiler_params=pltpu.CompilerParams(
            dimension_semantics=("parallel",),          # 2 TCs on v7x
            vmem_limit_bytes=32 * 1024 * 1024),
    )(*inputs)

    # unflatten / drop garbage columns & rounded tail rows (tiny, once, on host)
    y = out_flat[:, :l_pred, 0].reshape(B, Hf, wfull)[:, :, :Wf]
    return jnp.squeeze(y)                          # mimics torch .squeeze_()


# ----------------------------------------------------------------------------
# Init-time mask2weight (same semantics as the torch.conv2d sum-pool version)
# ----------------------------------------------------------------------------
def mask2weight(mask2d, k, padding=0):
    m = mask2d.astype(jnp.float32)
    mp = jnp.pad(m, padding)
    Ho = mp.shape[0] - k + 1
    Wo = mp.shape[1] - k + 1
    acc = jnp.zeros((Ho, Wo), jnp.float32)
    for i in range(k):
        for j in range(k):
            acc = acc + mp[i:i + Ho, j:j + Wo]
    safe = jnp.where(acc > 0, acc, 1.0)
    return jnp.where(acc > 0, 1.0 / safe, acc)


def build_mask_weights(mask2d, k, num_stack_layers, first_padding):
    ws = [mask2weight(mask2d, k, padding=first_padding)]
    for _ in range(num_stack_layers - 1):
        ws.append(mask2weight(ws[-1] > 0, k, padding=0))
    return ws


# ----------------------------------------------------------------------------
# Parameters (deterministic synthetic init; HWIO layout (kh, kw, Cin, Cout))
# ----------------------------------------------------------------------------
def init_params(key, input_size, hidden_size, k, num_stack_layers):
    conv_params = []
    cin = input_size
    keys = jax.random.split(key, num_stack_layers + 1)
    for i in range(num_stack_layers):
        wk, bk = jax.random.split(keys[i])
        fan_in = cin * k * k
        w = jax.random.normal(wk, (k, k, cin, hidden_size), jnp.float32) / jnp.sqrt(fan_in)
        b = 0.01 * jax.random.normal(bk, (hidden_size,), jnp.float32)
        conv_params.append((w, b))
        cin = hidden_size
    wk, bk = jax.random.split(keys[-1])
    wp = jax.random.normal(wk, (1, 1, hidden_size, 1), jnp.float32) / jnp.sqrt(hidden_size)
    bp = 0.01 * jax.random.normal(bk, (1,), jnp.float32)
    return conv_params, (wp, bp)


# ----------------------------------------------------------------------------
# Pure-JAX reference (lax.conv, f32) for correctness check
# ----------------------------------------------------------------------------
def reference_forward(x_nchw, conv_params, pred_params, mask_weights, k, first_padding):
    x = x_nchw
    for i, (w, b) in enumerate(conv_params):
        pad = first_padding if i == 0 else 0
        y = jax.lax.conv_general_dilated(
            x, w, window_strides=(1, 1), padding=[(pad, pad), (pad, pad)],
            dimension_numbers=("NCHW", "HWIO", "NCHW"))
        y = jnp.maximum(y + b.reshape(1, -1, 1, 1), 0.0)
        x = y * mask_weights[i][None, None, :, :]
    wp, bp = pred_params
    y = jax.lax.conv_general_dilated(
        x, wp, window_strides=(1, 1), padding=[(0, 0), (0, 0)],
        dimension_numbers=("NCHW", "HWIO", "NCHW"))
    return jnp.squeeze(y + bp.reshape(1, -1, 1, 1))


# ----------------------------------------------------------------------------
if __name__ == "__main__":
    input_size, hidden_size, k, num_stack_layers = 4, 32, 3, 2
    N, batch = 16, 2
    first_padding = (k - 1) * num_stack_layers // 2

    # valid-moment mask (upper triangular: end >= start)
    mask2d = jnp.triu(jnp.ones((N, N), jnp.float32)) > 0
    mask_weights = build_mask_weights(mask2d, k, num_stack_layers, first_padding)

    key = jax.random.PRNGKey(0)
    pkey, xkey = jax.random.split(key)
    conv_params, pred_params = init_params(pkey, input_size, hidden_size, k,
                                           num_stack_layers)
    x = jax.random.normal(xkey, (batch, input_size, N, N), jnp.float32)

    out = predictor_forward(x, conv_params, pred_params, mask_weights, k,
                            first_padding)
    out = jax.block_until_ready(out)

    ref = reference_forward(x, conv_params, pred_params, mask_weights, k,
                            first_padding)
    assert out.shape == (batch, N, N), out.shape
    assert jnp.allclose(out, ref, atol=3e-3, rtol=3e-2), \
        float(jnp.max(jnp.abs(out - ref)))

    print("KERNEL_OK")
</pallas_src>

<mosaic_0001>
module attributes {stable_mosaic.version = 11 : i64} {
  func.func @_predictor_kernel(%arg0: i32, %arg1: memref<1x368x128xbf16, #tpu.memory_space<vmem>>, %arg2: memref<128x128xbf16, #tpu.memory_space<vmem>>, %arg3: memref<1x128xf32, #tpu.memory_space<vmem>>, %arg4: memref<368x1xf32, #tpu.memory_space<vmem>>, %arg5: memref<5x256x128xbf16, #tpu.memory_space<vmem>>, %arg6: memref<1x128xf32, #tpu.memory_space<vmem>>, %arg7: memref<320x1xf32, #tpu.memory_space<vmem>>, %arg8: memref<1x128xf32, #tpu.memory_space<vmem>>, %arg9: memref<1x1xf32, #tpu.memory_space<vmem>>, %arg10: memref<1x320x1xf32, #tpu.memory_space<vmem>>, %arg11: memref<368x128xbf16, #tpu.memory_space<vmem>>) attributes {dimension_semantics = [#tpu.dimension_semantics<parallel>], iteration_bounds = array<i64: 2>, scalar_prefetch = 0 : i64, scratch_operands = 1 : i64, tpu.core_type = #tpu.core_type<tc>, window_params = [{transform_indices = @transform_0, window_bounds = array<i64: 1, 368, 128>}, {pipeline_mode = #tpu.pipeline_mode<synchronous>, transform_indices = @transform_1, window_bounds = array<i64: 128, 128>}, {pipeline_mode = #tpu.pipeline_mode<synchronous>, transform_indices = @transform_2, window_bounds = array<i64: 1, 128>}, {pipeline_mode = #tpu.pipeline_mode<synchronous>, transform_indices = @transform_3, window_bounds = array<i64: 368, 1>}, {pipeline_mode = #tpu.pipeline_mode<synchronous>, transform_indices = @transform_4, window_bounds = array<i64: 5, 256, 128>}, {pipeline_mode = #tpu.pipeline_mode<synchronous>, transform_indices = @transform_5, window_bounds = array<i64: 1, 128>}, {pipeline_mode = #tpu.pipeline_mode<synchronous>, transform_indices = @transform_6, window_bounds = array<i64: 320, 1>}, {pipeline_mode = #tpu.pipeline_mode<synchronous>, transform_indices = @transform_7, window_bounds = array<i64: 1, 128>}, {pipeline_mode = #tpu.pipeline_mode<synchronous>, transform_indices = @transform_8, window_bounds = array<i64: 1, 1>}, {transform_indices = @transform_9, window_bounds = array<i64: 1, 320, 1>}]} {
    %c0 = arith.constant 0 : index
    %c0_0 = arith.constant 0 : index
    %0 = vector.load %arg8[%c0, %c0_0] : memref<1x128xf32, #tpu.memory_space<vmem>>, vector<1x128xf32>
    %c0_1 = arith.constant 0 : index
    %c0_2 = arith.constant 0 : index
    %1 = vector.load %arg9[%c0_1, %c0_2] : memref<1x1xf32, #tpu.memory_space<vmem>>, vector<1x1xf32>
    %c0_3 = arith.constant 0 : index
    %c0_4 = arith.constant 0 : index
    %2 = vector.load %arg3[%c0_3, %c0_4] : memref<1x128xf32, #tpu.memory_space<vmem>>, vector<1x128xf32>
    %c0_5 = arith.constant 0 : index
    %c0_6 = arith.constant 0 : index
    %c0_7 = arith.constant 0 : index
    %3 = vector.load %arg1[%c0_5, %c0_6, %c0_7] : memref<1x368x128xbf16, #tpu.memory_space<vmem>>, vector<1x128x128xbf16>
    %4 = vector.shape_cast %3 : vector<1x128x128xbf16> to vector<128x128xbf16>
    %c0_8 = arith.constant 0 : index
    %c0_9 = arith.constant 0 : index
    %5 = vector.load %arg2[%c0_8, %c0_9] : memref<128x128xbf16, #tpu.memory_space<vmem>>, vector<128x128xbf16>
    %cst = arith.constant dense<0.000000e+00> : vector<128x128xf32>
    %6 = tpu.matmul %4, %5, %cst {dimension_numbers = #tpu.dot_dimension_numbers<[1], [0], [0], [1], [0, 0, 1, 1], [], []>} : vector<128x128xbf16>, vector<128x128xbf16>, vector<128x128xf32> -> vector<128x128xf32>
    %7 = vector.broadcast %2 : vector<1x128xf32> to vector<128x128xf32>
    %8 = arith.addf %6, %7 : vector<128x128xf32>
    %cst_10 = arith.constant 0.000000e+00 : f32
    %9 = vector.broadcast %cst_10 : f32 to vector<128x128xf32>
    %10 = arith.maximumf %8, %9 : vector<128x128xf32>
    %c0_11 = arith.constant 0 : index
    %c0_12 = arith.constant 0 : index
    %11 = vector.load %arg4[%c0_11, %c0_12] : memref<368x1xf32, #tpu.memory_space<vmem>>, vector<128x1xf32>
    %12 = vector.broadcast %11 : vector<128x1xf32> to vector<128x128xf32>
    %13 = arith.mulf %10, %12 : vector<128x128xf32>
    %14 = arith.truncf %13 : vector<128x128xf32> to vector<128x128xbf16>
    %c0_13 = arith.constant 0 : index
    %c0_14 = arith.constant 0 : index
    %15 = vector.load %arg11[%c0_13, %c0_14] : memref<368x128xbf16, #tpu.memory_space<vmem>>, vector<128x128xbf16>
    tpu.vector_store %arg11[%c0_13, %c0_14], %14 {strides = array<i32>} : memref<368x128xbf16, #tpu.memory_space<vmem>>, vector<128x128xbf16>,
    %c0_15 = arith.constant 0 : index
    %c128 = arith.constant 128 : index
    %c0_16 = arith.constant 0 : index
    %16 = vector.load %arg1[%c0_15, %c128, %c0_16] : memref<1x368x128xbf16, #tpu.memory_space<vmem>>, vector<1x128x128xbf16>
    %17 = vector.shape_cast %16 : vector<1x128x128xbf16> to vector<128x128xbf16>
    %c0_17 = arith.constant 0 : index
    %c0_18 = arith.constant 0 : index
    %18 = vector.load %arg2[%c0_17, %c0_18] : memref<128x128xbf16, #tpu.memory_space<vmem>>, vector<128x128xbf16>
    %cst_19 = arith.constant dense<0.000000e+00> : vector<128x128xf32>
    %19 = tpu.matmul %17, %18, %cst_19 {dimension_numbers = #tpu.dot_dimension_numbers<[1], [0], [0], [1], [0, 0, 1, 1], [], []>} : vector<128x128xbf16>, vector<128x128xbf16>, vector<128x128xf32> -> vector<128x128xf32>
    %20 = vector.broadcast %2 : vector<1x128xf32> to vector<128x128xf32>
    %21 = arith.addf %19, %20 : vector<128x128xf32>
    %cst_20 = arith.constant 0.000000e+00 : f32
    %22 = vector.broadcast %cst_20 : f32 to vector<128x128xf32>
    %23 = arith.maximumf %21, %22 : vector<128x128xf32>
    %c128_21 = arith.constant 128 : index
    %c0_22 = arith.constant 0 : index
    %24 = vector.load %arg4[%c128_21, %c0_22] : memref<368x1xf32, #tpu.memory_space<vmem>>, vector<128x1xf32>
    %25 = vector.broadcast %24 : vector<128x1xf32> to vector<128x128xf32>
    %26 = arith.mulf %23, %25 : vector<128x128xf32>
    %27 = arith.truncf %26 : vector<128x128xf32> to vector<128x128xbf16>
    %c128_23 = arith.constant 128 : index
    %c0_24 = arith.constant 0 : index
    %28 = vector.load %arg11[%c128_23, %c0_24] : memref<368x128xbf16, #tpu.memory_space<vmem>>, vector<128x128xbf16>
    tpu.vector_store %arg11[%c128_23, %c0_24], %27 {strides = array<i32>} : memref<368x128xbf16, #tpu.memory_space<vmem>>, vector<128x128xbf16>,
    %c0_25 = arith.constant 0 : index
    %c256 = arith.constant 256 : index
    %c0_26 = arith.constant 0 : index
    %29 = vector.load %arg1[%c0_25, %c256, %c0_26] : memref<1x368x128xbf16, #tpu.memory_space<vmem>>, vector<1x112x128xbf16>
    %30 = vector.shape_cast %29 : vector<1x112x128xbf16> to vector<112x128xbf16>
    %c0_27 = arith.constant 0 : index
    %c0_28 = arith.constant 0 : index
    %31 = vector.load %arg2[%c0_27, %c0_28] : memref<128x128xbf16, #tpu.memory_space<vmem>>, vector<128x128xbf16>
    %cst_29 = arith.constant dense<0.000000e+00> : vector<112x128xf32>
    %32 = tpu.matmul %30, %31, %cst_29 {dimension_numbers = #tpu.dot_dimension_numbers<[1], [0], [0], [1], [0, 0, 1, 1], [], []>} : vector<112x128xbf16>, vector<128x128xbf16>, vector<112x128xf32> -> vector<112x128xf32>
    %33 = vector.broadcast %2 : vector<1x128xf32> to vector<112x128xf32>
    %34 = arith.addf %32, %33 : vector<112x128xf32>
    %cst_30 = arith.constant 0.000000e+00 : f32
    %35 = vector.broadcast %cst_30 : f32 to vector<112x128xf32>
    %36 = arith.maximumf %34, %35 : vector<112x128xf32>
    %c256_31 = arith.constant 256 : index
    %c0_32 = arith.constant 0 : index
    %37 = vector.load %arg4[%c256_31, %c0_32] : memref<368x1xf32, #tpu.memory_space<vmem>>, vector<112x1xf32>
    %38 = vector.broadcast %37 : vector<112x1xf32> to vector<112x128xf32>
    %39 = arith.mulf %36, %38 : vector<112x128xf32>
    %40 = arith.truncf %39 : vector<112x128xf32> to vector<112x128xbf16>
    %c256_33 = arith.constant 256 : index
    %c0_34 = arith.constant 0 : index
    %41 = vector.load %arg11[%c256_33, %c0_34] : memref<368x128xbf16, #tpu.memory_space<vmem>>, vector<112x128xbf16>
    tpu.vector_store %arg11[%c256_33, %c0_34], %40 {strides = array<i32>} : memref<368x128xbf16, #tpu.memory_space<vmem>>, vector<112x128xbf16>,
    %c0_35 = arith.constant 0 : index
    %c0_36 = arith.constant 0 : index
    %42 = vector.load %arg6[%c0_35, %c0_36] : memref<1x128xf32, #tpu.memory_space<vmem>>, vector<1x128xf32>
    %cst_37 = arith.constant 0.000000e+00 : f32
    %43 = vector.broadcast %cst_37 : f32 to vector<128x128xf32>
    %c0_38 = arith.constant 0 : index
    %c0_39 = arith.constant 0 : index
    %44 = vector.load %arg11[%c0_38, %c0_39] : memref<368x128xbf16, #tpu.memory_space<vmem>>, vector<128x128xbf16>
    %c1 = arith.constant 1 : index
    %c0_40 = arith.constant 0 : index
    %45 = vector.load %arg11[%c1, %c0_40] : memref<368x128xbf16, #tpu.memory_space<vmem>>, vector<128x128xbf16>
    %46 = tpu.concatenate %44, %45 in 1 : vector<128x128xbf16>, vector<128x128xbf16> -> vector<128x256xbf16>
    %c0_41 = arith.constant 0 : index
    %c0_42 = arith.constant 0 : index
    %c0_43 = arith.constant 0 : index
    %47 = vector.load %arg5[%c0_41, %c0_42, %c0_43] : memref<5x256x128xbf16, #tpu.memory_space<vmem>>, vector<1x256x128xbf16>
    %48 = vector.shape_cast %47 : vector<1x256x128xbf16> to vector<256x128xbf16>
    %cst_44 = arith.constant dense<0.000000e+00> : vector<128x128xf32>
    %49 = tpu.matmul %46, %48, %cst_44 {dimension_numbers = #tpu.dot_dimension_numbers<[1], [0], [0], [1], [0, 0, 1, 1], [], []>} : vector<128x256xbf16>, vector<256x128xbf16>, vector<128x128xf32> -> vector<128x128xf32>
    %50 = arith.addf %43, %49 : vector<128x128xf32>
    %c2 = arith.constant 2 : index
    %c0_45 = arith.constant 0 : index
    %51 = vector.load %arg11[%c2, %c0_45] : memref<368x128xbf16, #tpu.memory_space<vmem>>, vector<128x128xbf16>
    %c20 = arith.constant 20 : index
    %c0_46 = arith.constant 0 : index
    %52 = vector.load %arg11[%c20, %c0_46] : memref<368x128xbf16, #tpu.memory_space<vmem>>, vector<128x128xbf16>
    %53 = tpu.concatenate %51, %52 in 1 : vector<128x128xbf16>, vector<128x128xbf16> -> vector<128x256xbf16>
    %c1_47 = arith.constant 1 : index
    %c0_48 = arith.constant 0 : index
    %c0_49 = arith.constant 0 : index
    %54 = vector.load %arg5[%c1_47, %c0_48, %c0_49] : memref<5x256x128xbf16, #tpu.memory_space<vmem>>, vector<1x256x128xbf16>
    %55 = vector.shape_cast %54 : vector<1x256x128xbf16> to vector<256x128xbf16>
    %cst_50 = arith.constant dense<0.000000e+00> : vector<128x128xf32>
    %56 = tpu.matmul %53, %55, %cst_50 {dimension_numbers = #tpu.dot_dimension_numbers<[1], [0], [0], [1], [0, 0, 1, 1], [], []>} : vector<128x256xbf16>, vector<256x128xbf16>, vector<128x128xf32> -> vector<128x128xf32>
    %57 = arith.addf %50, %56 : vector<128x128xf32>
    %c21 = arith.constant 21 : index
    %c0_51 = arith.constant 0 : index
    %58 = vector.load %arg11[%c21, %c0_51] : memref<368x128xbf16, #tpu.memory_space<vmem>>, vector<128x128xbf16>
    %c22 = arith.constant 22 : index
    %c0_52 = arith.constant 0 : index
    %59 = vector.load %arg11[%c22, %c0_52] : memref<368x128xbf16, #tpu.memory_space<vmem>>, vector<128x128xbf16>
    %60 = tpu.concatenate %58, %59 in 1 : vector<128x128xbf16>, vector<128x128xbf16> -> vector<128x256xbf16>
    %c2_53 = arith.constant 2 : index
    %c0_54 = arith.constant 0 : index
    %c0_55 = arith.constant 0 : index
    %61 = vector.load %arg5[%c2_53, %c0_54, %c0_55] : memref<5x256x128xbf16, #tpu.memory_space<vmem>>, vector<1x256x128xbf16>
    %62 = vector.shape_cast %61 : vector<1x256x128xbf16> to vector<256x128xbf16>
    %cst_56 = arith.constant dense<0.000000e+00> : vector<128x128xf32>
    %63 = tpu.matmul %60, %62, %cst_56 {dimension_numbers = #tpu.dot_dimension_numbers<[1], [0], [0], [1], [0, 0, 1, 1], [], []>} : vector<128x256xbf16>, vector<256x128xbf16>, vector<128x128xf32> -> vector<128x128xf32>
    %64 = arith.addf %57, %63 : vector<128x128xf32>
    %c40 = arith.constant 40 : index
    %c0_57 = arith.constant 0 : index
    %65 = vector.load %arg11[%c40, %c0_57] : memref<368x128xbf16, #tpu.memory_space<vmem>>, vector<128x128xbf16>
    %c41 = arith.constant 41 : index
    %c0_58 = arith.constant 0 : index
    %66 = vector.load %arg11[%c41, %c0_58] : memref<368x128xbf16, #tpu.memory_space<vmem>>, vector<128x128xbf16>
    %67 = tpu.concatenate %65, %66 in 1 : vector<128x128xbf16>, vector<128x128xbf16> -> vector<128x256xbf16>
    %c3 = arith.constant 3 : index
    %c0_59 = arith.constant 0 : index
    %c0_60 = arith.constant 0 : index
    %68 = vector.load %arg5[%c3, %c0_59, %c0_60] : memref<5x256x128xbf16, #tpu.memory_space<vmem>>, vector<1x256x128xbf16>
    %69 = vector.shape_cast %68 : vector<1x256x128xbf16> to vector<256x128xbf16>
    %cst_61 = arith.constant dense<0.000000e+00> : vector<128x128xf32>
    %70 = tpu.matmul %67, %69, %cst_61 {dimension_numbers = #tpu.dot_dimension_numbers<[1], [0], [0], [1], [0, 0, 1, 1], [], []>} : vector<128x256xbf16>, vector<256x128xbf16>, vector<128x128xf32> -> vector<128x128xf32>
    %71 = arith.addf %64, %70 : vector<128x128xf32>
    %c42 = arith.constant 42 : index
    %c0_62 = arith.constant 0 : index
    %72 = vector.load %arg11[%c42, %c0_62] : memref<368x128xbf16, #tpu.memory_space<vmem>>, vector<128x128xbf16>
    %73 = tpu.concatenate %72, %72 in 1 : vector<128x128xbf16>, vector<128x128xbf16> -> vector<128x256xbf16>
    %c4 = arith.constant 4 : index
    %c0_63 = arith.constant 0 : index
    %c0_64 = arith.constant 0 : index
    %74 = vector.load %arg5[%c4, %c0_63, %c0_64] : memref<5x256x128xbf16, #tpu.memory_space<vmem>>, vector<1x256x128xbf16>
    %75 = vector.shape_cast %74 : vector<1x256x128xbf16> to vector<256x128xbf16>
    %cst_65 = arith.constant dense<0.000000e+00> : vector<128x128xf32>
    %76 = tpu.matmul %73, %75, %cst_65 {dimension_numbers = #tpu.dot_dimension_numbers<[1], [0], [0], [1], [0, 0, 1, 1], [], []>} : vector<128x256xbf16>, vector<256x128xbf16>, vector<128x128xf32> -> vector<128x128xf32>
    %77 = arith.addf %71, %76 : vector<128x128xf32>
    %78 = vector.broadcast %42 : vector<1x128xf32> to vector<128x128xf32>
    %79 = arith.addf %77, %78 : vector<128x128xf32>
    %cst_66 = arith.constant 0.000000e+00 : f32
    %80 = vector.broadcast %cst_66 : f32 to vector<128x128xf32>
    %81 = arith.maximumf %79, %80 : vector<128x128xf32>
    %c0_67 = arith.constant 0 : index
    %c0_68 = arith.constant 0 : index
    %82 = vector.load %arg7[%c0_67, %c0_68] : memref<320x1xf32, #tpu.memory_space<vmem>>, vector<128x1xf32>
    %83 = vector.broadcast %82 : vector<128x1xf32> to vector<128x128xf32>
    %84 = arith.mulf %81, %83 : vector<128x128xf32>
    %85 = vector.broadcast %0 : vector<1x128xf32> to vector<128x128xf32>
    %86 = arith.mulf %84, %85 : vector<128x128xf32>
    %cst_69 = arith.constant dense<0.000000e+00> : vector<128xf32>
    %87 = vector.multi_reduction <add>, %86, %cst_69 [1] : vector<128x128xf32> to vector<128xf32>
    %88 = vector.shape_cast %87 : vector<128xf32> to vector<128x1xf32>
    %89 = vector.broadcast %1 : vector<1x1xf32> to vector<128x1xf32>
    %90 = arith.addf %88, %89 : vector<128x1xf32>
    %c0_70 = arith.constant 0 : index
    %c0_71 = arith.constant 0 : index
    %c0_72 = arith.constant 0 : index
    %91 = vector.load %arg10[%c0_70, %c0_71, %c0_72] : memref<1x320x1xf32, #tpu.memory_space<vmem>>, vector<1x128x1xf32>
    %92 = vector.shape_cast %91 : vector<1x128x1xf32> to vector<128x1xf32>
    %93 = vector.shape_cast %90 : vector<128x1xf32> to vector<1x128x1xf32>
    tpu.vector_store %arg10[%c0_70, %c0_71, %c0_72], %93 {strides = array<i32>} : memref<1x320x1xf32, #tpu.memory_space<vmem>>, vector<1x128x1xf32>,
    %cst_73 = arith.constant 0.000000e+00 : f32
    %94 = vector.broadcast %cst_73 : f32 to vector<128x128xf32>
    %c128_74 = arith.constant 128 : index
    %c0_75 = arith.constant 0 : index
    %95 = vector.load %arg11[%c128_74, %c0_75] : memref<368x128xbf16, #tpu.memory_space<vmem>>, vector<128x128xbf16>
    %c129 = arith.constant 129 : index
    %c0_76 = arith.constant 0 : index
    %96 = vector.load %arg11[%c129, %c0_76] : memref<368x128xbf16, #tpu.memory_space<vmem>>, vector<128x128xbf16>
    %97 = tpu.concatenate %95, %96 in 1 : vector<128x128xbf16>, vector<128x128xbf16> -> vector<128x256xbf16>
    %c0_77 = arith.constant 0 : index
    %c0_78 = arith.constant 0 : index
    %c0_79 = arith.constant 0 : index
    %98 = vector.load %arg5[%c0_77, %c0_78, %c0_79] : memref<5x256x128xbf16, #tpu.memory_space<vmem>>, vector<1x256x128xbf16>
    %99 = vector.shape_cast %98 : vector<1x256x128xbf16> to vector<256x128xbf16>
    %cst_80 = arith.constant dense<0.000000e+00> : vector<128x128xf32>
    %100 = tpu.matmul %97, %99, %cst_80 {dimension_numbers = #tpu.dot_dimension_numbers<[1], [0], [0], [1], [0, 0, 1, 1], [], []>} : vector<128x256xbf16>, vector<256x128xbf16>, vector<128x128xf32> -> vector<128x128xf32>
    %101 = arith.addf %94, %100 : vector<128x128xf32>
    %c130 = arith.constant 130 : index
    %c0_81 = arith.constant 0 : index
    %102 = vector.load %arg11[%c130, %c0_81] : memref<368x128xbf16, #tpu.memory_space<vmem>>, vector<128x128xbf16>
    %c148 = arith.constant 148 : index
    %c0_82 = arith.constant 0 : index
    %103 = vector.load %arg11[%c148, %c0_82] : memref<368x128xbf16, #tpu.memory_space<vmem>>, vector<128x128xbf16>
    %104 = tpu.concatenate %102, %103 in 1 : vector<128x128xbf16>, vector<128x128xbf16> -> vector<128x256xbf16>
    %c1_83 = arith.constant 1 : index
    %c0_84 = arith.constant 0 : index
    %c0_85 = arith.constant 0 : index
    %105 = vector.load %arg5[%c1_83, %c0_84, %c0_85] : memref<5x256x128xbf16, #tpu.memory_space<vmem>>, vector<1x256x128xbf16>
    %106 = vector.shape_cast %105 : vector<1x256x128xbf16> to vector<256x128xbf16>
    %cst_86 = arith.constant dense<0.000000e+00> : vector<128x128xf32>
    %107 = tpu.matmul %104, %106, %cst_86 {dimension_numbers = #tpu.dot_dimension_numbers<[1], [0], [0], [1], [0, 0, 1, 1], [], []>} : vector<128x256xbf16>, vector<256x128xbf16>, vector<128x128xf32> -> vector<128x128xf32>
    %108 = arith.addf %101, %107 : vector<128x128xf32>
    %c149 = arith.constant 149 : index
    %c0_87 = arith.constant 0 : index
    %109 = vector.load %arg11[%c149, %c0_87] : memref<368x128xbf16, #tpu.memory_space<vmem>>, vector<128x128xbf16>
    %c150 = arith.constant 150 : index
    %c0_88 = arith.constant 0 : index
    %110 = vector.load %arg11[%c150, %c0_88] : memref<368x128xbf16, #tpu.memory_space<vmem>>, vector<128x128xbf16>
    %111 = tpu.concatenate %109, %110 in 1 : vector<128x128xbf16>, vector<128x128xbf16> -> vector<128x256xbf16>
    %c2_89 = arith.constant 2 : index
    %c0_90 = arith.constant 0 : index
    %c0_91 = arith.constant 0 : index
    %112 = vector.load %arg5[%c2_89, %c0_90, %c0_91] : memref<5x256x128xbf16, #tpu.memory_space<vmem>>, vector<1x256x128xbf16>
    %113 = vector.shape_cast %112 : vector<1x256x128xbf16> to vector<256x128xbf16>
    %cst_92 = arith.constant dense<0.000000e+00> : vector<128x128xf32>
    %114 = tpu.matmul %111, %113, %cst_92 {dimension_numbers = #tpu.dot_dimension_numbers<[1], [0], [0], [1], [0, 0, 1, 1], [], []>} : vector<128x256xbf16>, vector<256x128xbf16>, vector<128x128xf32> -> vector<128x128xf32>
    %115 = arith.addf %108, %114 : vector<128x128xf32>
    %c168 = arith.constant 168 : index
    %c0_93 = arith.constant 0 : index
    %116 = vector.load %arg11[%c168, %c0_93] : memref<368x128xbf16, #tpu.memory_space<vmem>>, vector<128x128xbf16>
    %c169 = arith.constant 169 : index
    %c0_94 = arith.constant 0 : index
    %117 = vector.load %arg11[%c169, %c0_94] : memref<368x128xbf16, #tpu.memory_space<vmem>>, vector<128x128xbf16>
    %118 = tpu.concatenate %116, %117 in 1 : vector<128x128xbf16>, vector<128x128xbf16> -> vector<128x256xbf16>
    %c3_95 = arith.constant 3 : index
    %c0_96 = arith.constant 0 : index
    %c0_97 = arith.constant 0 : index
    %119 = vector.load %arg5[%c3_95, %c0_96, %c0_97] : memref<5x256x128xbf16, #tpu.memory_space<vmem>>, vector<1x256x128xbf16>
    %120 = vector.shape_cast %119 : vector<1x256x128xbf16> to vector<256x128xbf16>
    %cst_98 = arith.constant dense<0.000000e+00> : vector<128x128xf32>
    %121 = tpu.matmul %118, %120, %cst_98 {dimension_numbers = #tpu.dot_dimension_numbers<[1], [0], [0], [1], [0, 0, 1, 1], [], []>} : vector<128x256xbf16>, vector<256x128xbf16>, vector<128x128xf32> -> vector<128x128xf32>
    %122 = arith.addf %115, %121 : vector<128x128xf32>
    %c170 = arith.constant 170 : index
    %c0_99 = arith.constant 0 : index
    %123 = vector.load %arg11[%c170, %c0_99] : memref<368x128xbf16, #tpu.memory_space<vmem>>, vector<128x128xbf16>
    %124 = tpu.concatenate %123, %123 in 1 : vector<128x128xbf16>, vector<128x128xbf16> -> vector<128x256xbf16>
    %c4_100 = arith.constant 4 : index
    %c0_101 = arith.constant 0 : index
    %c0_102 = arith.constant 0 : index
    %125 = vector.load %arg5[%c4_100, %c0_101, %c0_102] : memref<5x256x128xbf16, #tpu.memory_space<vmem>>, vector<1x256x128xbf16>
    %126 = vector.shape_cast %125 : vector<1x256x128xbf16> to vector<256x128xbf16>
    %cst_103 = arith.constant dense<0.000000e+00> : vector<128x128xf32>
    %127 = tpu.matmul %124, %126, %cst_103 {dimension_numbers = #tpu.dot_dimension_numbers<[1], [0], [0], [1], [0, 0, 1, 1], [], []>} : vector<128x256xbf16>, vector<256x128xbf16>, vector<128x128xf32> -> vector<128x128xf32>
    %128 = arith.addf %122, %127 : vector<128x128xf32>
    %129 = vector.broadcast %42 : vector<1x128xf32> to vector<128x128xf32>
    %130 = arith.addf %128, %129 : vector<128x128xf32>
    %cst_104 = arith.constant 0.000000e+00 : f32
    %131 = vector.broadcast %cst_104 : f32 to vector<128x128xf32>
    %132 = arith.maximumf %130, %131 : vector<128x128xf32>
    %c128_105 = arith.constant 128 : index
    %c0_106 = arith.constant 0 : index
    %133 = vector.load %arg7[%c128_105, %c0_106] : memref<320x1xf32, #tpu.memory_space<vmem>>, vector<128x1xf32>
    %134 = vector.broadcast %133 : vector<128x1xf32> to vector<128x128xf32>
    %135 = arith.mulf %132, %134 : vector<128x128xf32>
    %136 = vector.broadcast %0 : vector<1x128xf32> to vector<128x128xf32>
    %137 = arith.mulf %135, %136 : vector<128x128xf32>
    %cst_107 = arith.constant dense<0.000000e+00> : vector<128xf32>
    %138 = vector.multi_reduction <add>, %137, %cst_107 [1] : vector<128x128xf32> to vector<128xf32>
    %139 = vector.shape_cast %138 : vector<128xf32> to vector<128x1xf32>
    %140 = vector.broadcast %1 : vector<1x1xf32> to vector<128x1xf32>
    %141 = arith.addf %139, %140 : vector<128x1xf32>
    %c0_108 = arith.constant 0 : index
    %c128_109 = arith.constant 128 : index
    %c0_110 = arith.constant 0 : index
    %142 = vector.load %arg10[%c0_108, %c128_109, %c0_110] : memref<1x320x1xf32, #tpu.memory_space<vmem>>, vector<1x128x1xf32>
    %143 = vector.shape_cast %142 : vector<1x128x1xf32> to vector<128x1xf32>
    %144 = vector.shape_cast %141 : vector<128x1xf32> to vector<1x128x1xf32>
    tpu.vector_store %arg10[%c0_108, %c128_109, %c0_110], %144 {strides = array<i32>} : memref<1x320x1xf32, #tpu.memory_space<vmem>>, vector<1x128x1xf32>,
    %cst_111 = arith.constant 0.000000e+00 : f32
    %145 = vector.broadcast %cst_111 : f32 to vector<64x128xf32>
    %c256_112 = arith.constant 256 : index
    %c0_113 = arith.constant 0 : index
    %146 = vector.load %arg11[%c256_112, %c0_113] : memref<368x128xbf16, #tpu.memory_space<vmem>>, vector<64x128xbf16>
    %c257 = arith.constant 257 : index
    %c0_114 = arith.constant 0 : index
    %147 = vector.load %arg11[%c257, %c0_114] : memref<368x128xbf16, #tpu.memory_space<vmem>>, vector<64x128xbf16>
    %148 = tpu.concatenate %146, %147 in 1 : vector<64x128xbf16>, vector<64x128xbf16> -> vector<64x256xbf16>
    %c0_115 = arith.constant 0 : index
    %c0_116 = arith.constant 0 : index
    %c0_117 = arith.constant 0 : index
    %149 = vector.load %arg5[%c0_115, %c0_116, %c0_117] : memref<5x256x128xbf16, #tpu.memory_space<vmem>>, vector<1x256x128xbf16>
    %150 = vector.shape_cast %149 : vector<1x256x128xbf16> to vector<256x128xbf16>
    %cst_118 = arith.constant dense<0.000000e+00> : vector<64x128xf32>
    %151 = tpu.matmul %148, %150, %cst_118 {dimension_numbers = #tpu.dot_dimension_numbers<[1], [0], [0], [1], [0, 0, 1, 1], [], []>} : vector<64x256xbf16>, vector<256x128xbf16>, vector<64x128xf32> -> vector<64x128xf32>
    %152 = arith.addf %145, %151 : vector<64x128xf32>
    %c258 = arith.constant 258 : index
    %c0_119 = arith.constant 0 : index
    %153 = vector.load %arg11[%c258, %c0_119] : memref<368x128xbf16, #tpu.memory_space<vmem>>, vector<64x128xbf16>
    %c276 = arith.constant 276 : index
    %c0_120 = arith.constant 0 : index
    %154 = vector.load %arg11[%c276, %c0_120] : memref<368x128xbf16, #tpu.memory_space<vmem>>, vector<64x128xbf16>
    %155 = tpu.concatenate %153, %154 in 1 : vector<64x128xbf16>, vector<64x128xbf16> -> vector<64x256xbf16>
    %c1_121 = arith.constant 1 : index
    %c0_122 = arith.constant 0 : index
    %c0_123 = arith.constant 0 : index
    %156 = vector.load %arg5[%c1_121, %c0_122, %c0_123] : memref<5x256x128xbf16, #tpu.memory_space<vmem>>, vector<1x256x128xbf16>
    %157 = vector.shape_cast %156 : vector<1x256x128xbf16> to vector<256x128xbf16>
    %cst_124 = arith.constant dense<0.000000e+00> : vector<64x128xf32>
    %158 = tpu.matmul %155, %157, %cst_124 {dimension_numbers = #tpu.dot_dimension_numbers<[1], [0], [0], [1], [0, 0, 1, 1], [], []>} : vector<64x256xbf16>, vector<256x128xbf16>, vector<64x128xf32> -> vector<64x128xf32>
    %159 = arith.addf %152, %158 : vector<64x128xf32>
    %c277 = arith.constant 277 : index
    %c0_125 = arith.constant 0 : index
    %160 = vector.load %arg11[%c277, %c0_125] : memref<368x128xbf16, #tpu.memory_space<vmem>>, vector<64x128xbf16>
    %c278 = arith.constant 278 : index
    %c0_126 = arith.constant 0 : index
    %161 = vector.load %arg11[%c278, %c0_126] : memref<368x128xbf16, #tpu.memory_space<vmem>>, vector<64x128xbf16>
    %162 = tpu.concatenate %160, %161 in 1 : vector<64x128xbf16>, vector<64x128xbf16> -> vector<64x256xbf16>
    %c2_127 = arith.constant 2 : index
    %c0_128 = arith.constant 0 : index
    %c0_129 = arith.constant 0 : index
    %163 = vector.load %arg5[%c2_127, %c0_128, %c0_129] : memref<5x256x128xbf16, #tpu.memory_space<vmem>>, vector<1x256x128xbf16>
    %164 = vector.shape_cast %163 : vector<1x256x128xbf16> to vector<256x128xbf16>
    %cst_130 = arith.constant dense<0.000000e+00> : vector<64x128xf32>
    %165 = tpu.matmul %162, %164, %cst_130 {dimension_numbers = #tpu.dot_dimension_numbers<[1], [0], [0], [1], [0, 0, 1, 1], [], []>} : vector<64x256xbf16>, vector<256x128xbf16>, vector<64x128xf32> -> vector<64x128xf32>
    %166 = arith.addf %159, %165 : vector<64x128xf32>
    %c296 = arith.constant 296 : index
    %c0_131 = arith.constant 0 : index
    %167 = vector.load %arg11[%c296, %c0_131] : memref<368x128xbf16, #tpu.memory_space<vmem>>, vector<64x128xbf16>
    %c297 = arith.constant 297 : index
    %c0_132 = arith.constant 0 : index
    %168 = vector.load %arg11[%c297, %c0_132] : memref<368x128xbf16, #tpu.memory_space<vmem>>, vector<64x128xbf16>
    %169 = tpu.concatenate %167, %168 in 1 : vector<64x128xbf16>, vector<64x128xbf16> -> vector<64x256xbf16>
    %c3_133 = arith.constant 3 : index
    %c0_134 = arith.constant 0 : index
    %c0_135 = arith.constant 0 : index
    %170 = vector.load %arg5[%c3_133, %c0_134, %c0_135] : memref<5x256x128xbf16, #tpu.memory_space<vmem>>, vector<1x256x128xbf16>
    %171 = vector.shape_cast %170 : vector<1x256x128xbf16> to vector<256x128xbf16>
    %cst_136 = arith.constant dense<0.000000e+00> : vector<64x128xf32>
    %172 = tpu.matmul %169, %171, %cst_136 {dimension_numbers = #tpu.dot_dimension_numbers<[1], [0], [0], [1], [0, 0, 1, 1], [], []>} : vector<64x256xbf16>, vector<256x128xbf16>, vector<64x128xf32> -> vector<64x128xf32>
    %173 = arith.addf %166, %172 : vector<64x128xf32>
    %c298 = arith.constant 298 : index
    %c0_137 = arith.constant 0 : index
    %174 = vector.load %arg11[%c298, %c0_137] : memref<368x128xbf16, #tpu.memory_space<vmem>>, vector<64x128xbf16>
    %175 = tpu.concatenate %174, %174 in 1 : vector<64x128xbf16>, vector<64x128xbf16> -> vector<64x256xbf16>
    %c4_138 = arith.constant 4 : index
    %c0_139 = arith.constant 0 : index
    %c0_140 = arith.constant 0 : index
    %176 = vector.load %arg5[%c4_138, %c0_139, %c0_140] : memref<5x256x128xbf16, #tpu.memory_space<vmem>>, vector<1x256x128xbf16>
    %177 = vector.shape_cast %176 : vector<1x256x128xbf16> to vector<256x128xbf16>
    %cst_141 = arith.constant dense<0.000000e+00> : vector<64x128xf32>
    %178 = tpu.matmul %175, %177, %cst_141 {dimension_numbers = #tpu.dot_dimension_numbers<[1], [0], [0], [1], [0, 0, 1, 1], [], []>} : vector<64x256xbf16>, vector<256x128xbf16>, vector<64x128xf32> -> vector<64x128xf32>
    %179 = arith.addf %173, %178 : vector<64x128xf32>
    %180 = vector.broadcast %42 : vector<1x128xf32> to vector<64x128xf32>
    %181 = arith.addf %179, %180 : vector<64x128xf32>
    %cst_142 = arith.constant 0.000000e+00 : f32
    %182 = vector.broadcast %cst_142 : f32 to vector<64x128xf32>
    %183 = arith.maximumf %181, %182 : vector<64x128xf32>
    %c256_143 = arith.constant 256 : index
    %c0_144 = arith.constant 0 : index
    %184 = vector.load %arg7[%c256_143, %c0_144] : memref<320x1xf32, #tpu.memory_space<vmem>>, vector<64x1xf32>
    %185 = vector.broadcast %184 : vector<64x1xf32> to vector<64x128xf32>
    %186 = arith.mulf %183, %185 : vector<64x128xf32>
    %187 = vector.broadcast %0 : vector<1x128xf32> to vector<64x128xf32>
    %188 = arith.mulf %186, %187 : vector<64x128xf32>
    %cst_145 = arith.constant dense<0.000000e+00> : vector<64xf32>
    %189 = vector.multi_reduction <add>, %188, %cst_145 [1] : vector<64x128xf32> to vector<64xf32>
    %190 = vector.shape_cast %189 : vector<64xf32> to vector<64x1xf32>
    %191 = vector.broadcast %1 : vector<1x1xf32> to vector<64x1xf32>
    %192 = arith.addf %190, %191 : vector<64x1xf32>
    %c0_146 = arith.constant 0 : index
    %c256_147 = arith.constant 256 : index
    %c0_148 = arith.constant 0 : index
    %193 = vector.load %arg10[%c0_146, %c256_147, %c0_148] : memref<1x320x1xf32, #tpu.memory_space<vmem>>, vector<1x64x1xf32>
    %194 = vector.shape_cast %193 : vector<1x64x1xf32> to vector<64x1xf32>
    %195 = vector.shape_cast %192 : vector<64x1xf32> to vector<1x64x1xf32>
    tpu.vector_store %arg10[%c0_146, %c256_147, %c0_148], %195 {strides = array<i32>} : memref<1x320x1xf32, #tpu.memory_space<vmem>>, vector<1x64x1xf32>,
    return
  }
  func.func @transform_0(%arg0: i32) -> (i32, i32, i32) {
    %c0_i32 = arith.constant 0 : i32
    %c0_i32_0 = arith.constant 0 : i32
    %c0_i32_1 = arith.constant 0 : i32
    return %arg0, %c0_i32, %c0_i32_0 : i32, i32, i32
  }
  func.func @transform_1(%arg0: i32) -> (i32, i32) {
    %c0_i32 = arith.constant 0 : i32
    %c0_i32_0 = arith.constant 0 : i32
    %c0_i32_1 = arith.constant 0 : i32
    return %c0_i32, %c0_i32_0 : i32, i32
  }
  func.func @transform_2(%arg0: i32) -> (i32, i32) {
    %c0_i32 = arith.constant 0 : i32
    %c0_i32_0 = arith.constant 0 : i32
    %c0_i32_1 = arith.constant 0 : i32
    return %c0_i32, %c0_i32_0 : i32, i32
  }
  func.func @transform_3(%arg0: i32) -> (i32, i32) {
    %c0_i32 = arith.constant 0 : i32
    %c0_i32_0 = arith.constant 0 : i32
    %c0_i32_1 = arith.constant 0 : i32
    return %c0_i32, %c0_i32_0 : i32, i32
  }
  func.func @transform_4(%arg0: i32) -> (i32, i32, i32) {
    %c0_i32 = arith.constant 0 : i32
    %c0_i32_0 = arith.constant 0 : i32
    %c0_i32_1 = arith.constant 0 : i32
    %c0_i32_2 = arith.constant 0 : i32
    return %c0_i32, %c0_i32_0, %c0_i32_1 : i32, i32, i32
  }
  func.func @transform_5(%arg0: i32) -> (i32, i32) {
    %c0_i32 = arith.constant 0 : i32
    %c0_i32_0 = arith.constant 0 : i32
    %c0_i32_1 = arith.constant 0 : i32
    return %c0_i32, %c0_i32_0 : i32, i32
  }
  func.func @transform_6(%arg0: i32) -> (i32, i32) {
    %c0_i32 = arith.constant 0 : i32
    %c0_i32_0 = arith.constant 0 : i32
    %c0_i32_1 = arith.constant 0 : i32
    return %c0_i32, %c0_i32_0 : i32, i32
  }
  func.func @transform_7(%arg0: i32) -> (i32, i32) {
    %c0_i32 = arith.constant 0 : i32
    %c0_i32_0 = arith.constant 0 : i32
    %c0_i32_1 = arith.constant 0 : i32
    return %c0_i32, %c0_i32_0 : i32, i32
  }
  func.func @transform_8(%arg0: i32) -> (i32, i32) {
    %c0_i32 = arith.constant 0 : i32
    %c0_i32_0 = arith.constant 0 : i32
    %c0_i32_1 = arith.constant 0 : i32
    return %c0_i32, %c0_i32_0 : i32, i32
  }
  func.func @transform_9(%arg0: i32) -> (i32, i32, i32) {
    %c0_i32 = arith.constant 0 : i32
    %c0_i32_0 = arith.constant 0 : i32
    %c0_i32_1 = arith.constant 0 : i32
    return %arg0, %c0_i32, %c0_i32_0 : i32, i32, i32
  }
}

</mosaic_0001>

<bundles_post_ra>
// kernel: tpu_custom_call.1
= control target key start
LH: loop header
LB: loop body
LE: loop exit
PB: predicated region body
PF: predicated region fallthrough
CT: control target
= control target key end

     0   :  { %s12649_s0 = inlined_call_operand.hbm [shape: bf16[2,368,128], index: 0, kind: input, shape index: {}]   ;;  %s12650_s1 = inlined_call_operand.hbm [shape: bf16[128,128], index: 1, kind: input, shape index: {}]   ;;  %s12651_s2 = inlined_call_operand.vmem [shape: f32[1,128], index: 2, kind: input, shape index: {}]   ;;  %s12652_s3 = inlined_call_operand.vmem [shape: f32[368,1], index: 3, kind: input, shape index: {}]   ;;  %s12653_s4 = inlined_call_operand.vmem [shape: bf16[5,256,128], index: 4, kind: input, shape index: {}]   ;;  %s12654_s5 = inlined_call_operand.vmem [shape: f32[1,128], index: 5, kind: input, shape index: {}]   ;;  %s12655_s6 = inlined_call_operand.vmem [shape: f32[320,1], index: 6, kind: input, shape index: {}]   ;;  %s12656_s7 = inlined_call_operand.vmem [shape: f32[1,128], index: 7, kind: input, shape index: {}]   ;;  %s12657_s8 = inlined_call_operand.<no memory space> [shape: f32[1,1], index: 8, kind: input, shape index: {}]   ;;  %s12658_s9 = inlined_call_operand.vmem [shape: f32[2,320,1], index: 9, kind: output, shape index: {}]  }
   0x1   :  { %v14_v0 = vstv %s12657_s8 }
   0x2   :  { %15 = vst [vmem:[#allocation3] sm:$0x1] %v14_v0 }
   0x3   :  { %16 = vsyncpa [#allocation5], 0 }
   0x4   :  { %18 = vsyncpa [#allocation5 + $0x1], 0 }
   0x5   :  { %19 = vsyncpa [#allocation7], 0  ;;  %s9236_s11 = smov 0   ;;  %s9238_s12 = smov 0  }
   0x6   :  { %s9240_s13 = smov 0   ;;  %s9242_s14 = smov 0  }
   0x7 LB: > { %s9255_s8 = sadd.s32 4294967295, %s9177_s14   ;;  %p45_p0 = scmp.ne.s32.totalorder %s9169_s12, %s9165_s11  ;;  %s9177_s14 = sphi %s9242_s14, %s12832_s14   ;;  %s9173_s13 = sphi %s9240_s13, %s12831_s13   ;;  %s9169_s12 = sphi %s9238_s12, %s12830_s12   ;;  %s9165_s11 = sphi %s9236_s11, %s12829_s11  }
   0x8   : > { %p46_p1 = scmp.eq.s32.totalorder %s9255_s8, 0  ;;  %p6800_p2 = scmp.ge.s32.totalorder %s9177_s14, 1 }
   0x9   : > { %p250_p3 = scmp.lt.s32.totalorder %s9177_s14, 3  ;;  %s261_s18 = sshll.u32 %s12650_s1, 4  ;;  %s262_s18 = int_to_ptr.hbm [resolvable:$true] %s261_s18 }
   0xa   : > { %p9263_p4 = por %p46_p1, %p45_p0  ;;  %s9179_s20 = smov [#allocation6]  }
   0xb   : > { %p9270_p5 = pnand %p6800_p2, %p250_p3  ;;  %s263_s21 = sshll.u32 %s9179_s20, 4  ;;  %s264_s21 = int_to_ptr.vmem [resolvable:$true] %s263_s21 }
   0xc   : > { %s9279_s22 = sadd.s32 1, %s9177_s14   ;;  %s12659_s23 = smov 64  }
   0xd   : > { %p9003_p6 = pneg %p9270_p5  ;;  %s12660_s24 = smov 4  }
   0xe   : > { %s29_s25 = ssub.s32 %s9177_s14, %s9279_s22  ;;  %s32_s26 = sadd.s32 1, %s9173_s13 }
   0xf   : > { %p9004_p7 = pnand %p9003_p6, %p46_p1  ;;  %p30_p8 = scmp.eq.s32.totalorder %s29_s25, 0 }
  0x10   : > { %p39_p9 = scmp.ne.s32.totalorder %s9173_s13, %s9169_s12  ;;  %p40_p10 = scmp.eq.s32.totalorder %s9177_s14, 0 }
  0x11   : > { %9006 = dma.hbm_to_vmem [thread:$0]  (!%p9004_p7), %s262_s18, 1024, %s264_s21, [#allocation7], %s12659_s23, %s12659_s23, %s12660_s24  }
  0x12   : > { %p9012_p11 = scmp.lt.s32.totalorder %s9177_s14, 2  ;;  %p41_p12 = por %p40_p10, %p39_p9 }
  0x13   : > { %s9292_s27 = scalar_select %p30_p8, %s9173_s13, %s32_s26  }
  0x14   : > { %s298_s28 = sand.u32 1, %s9173_s13   ;;  %s8994_s30 = smul.u32 184, %s9177_s14 }
  0x15   : > { %s8993_s29 = smul.u32 184, %s298_s28  ;;  %p9296_p13 = pnand %p9012_p11, %p41_p12 }
  0x16   : > { %s307_s17 = scalar_lea.hbm %s12649_s0, %s8994_s30  ;;  %s299_s25 = scalar_lea.sflag [#allocation5], %s298_s28 }
  0x17   : > { %s302_s18 = scalar_lea.vmem [#allocation4], %s8993_s29  ;;  %s308_s21 = sshll.u32 %s307_s17, 4  ;;  %s309_s21 = int_to_ptr.hbm [resolvable:$true] %s308_s21 }
  0x18   : > { %s310_s20 = sshll.u32 %s302_s18, 4  ;;  %s9106_s26 = sshra.s32 %s309_s21, 4  ;;  %s311_s20 = int_to_ptr.vmem [resolvable:$true] %s310_s20  ;;  %s9107_s26 = int_to_ptr.hbm [resolvable:$true] %s9106_s26 }
  0x19   : > { %s9108_s23 = scalar_lea.hbm %s9107_s26, 184  ;;  %p9110_p2 = pneg %p9296_p13 }
  0x1a   : > { %p9109_p0 = scmp.ne.s32.totalorder %s9107_s26, %s9108_s23  ;;  %s9113_s11 = scalar_lea.hbm %s12649_s0, 368 }
  0x1b   : > { %p9114_p7 = scmp.lt.s32.totalorder %s9107_s26, %s12649_s0  ;;  %p9115_p8 = scmp.lt.s32.totalorder %s9113_s11, %s9108_s23 }
  0x1c   : > { %p9111_p3 = pnand %p9110_p2, %p9109_p0 }
  0x1d   : > { %p9116_p9 = por %p9115_p8, %p9114_p7 }
  0x1e   : > { %p9112_p6 = pneg %p9111_p3 }
  0x20   : > { %p9117_p10 = pnand %p9116_p9, %p9112_p6 }
  0x22   : > { %9120 = shalt.err (!%p9117_p10)
}
  0x23   : > { %s12703_s28 = smov 4   ;;  %s12704_s29 = smov 64  }
  0x24   : > { %9010 = dma.hbm_to_vmem [thread:$0]  (!%p9296_p13), %s309_s21, 2944, %s311_s20, %s299_s25, %s12704_s29, %s12704_s29, %s12703_s28  }
  0x25   : > { %322 = sbr.rel (%p9270_p5) target bundleno = 1405 (0x57d), region = 56 }
  0x2a   : > { %s324_s24 = sand.u32 1, %s9169_s12  }
  0x2b   : > { %s8995_s17 = smul.u32 184, %s324_s24  ;;  %s325_s18 = scalar_lea.sflag [#allocation5], %s324_s24 }
  0x2d   : > { %s9319_s14 = scalar_lea.vmem [#allocation4], %s8995_s17 }
  0x2e   : > { %9153 = dma.done.wait (%p9263_p4), %s325_s18, 2944  }
  0x2f   : > { %9155 = vsyncadd (%p9263_p4), %s325_s18, 4294964352 }
  0x30   : > { %9157 = dma.done.wait (%p46_p1), [#allocation7], 1024  }
  0x31   : > { %9159 = vsyncadd (%p46_p1), [#allocation7], 4294966272  ;;  %v9182_v1 = vmov 0   ;;  %v577_v2 = vld [vmem:[%s12652_s3 + $0x20] sm:$0xff]  ;;  %v575_v3 = vld [vmem:[%s12652_s3 + $0x10] sm:$0xff]  ;;  %vm1555_vm0 = vcmask 1046528  }
  0x32   : > { %9052 = vset.pattern.permute.xlu2 %v9182_v1  ;;  %9051 = vset.pattern.permute.xlu1 %v9182_v1  ;;  %v573_v4 = vld [vmem:[%s12652_s3] sm:$0xff]  ;;  %v578_v11 = vld [vmem:[%s12652_s3 + $0x28] sm:$0xff]  ;;  %v576_v12 = vld [vmem:[%s12652_s3 + $0x18] sm:$0xff]  ;;  %vm1427_vm1 = vsmask.f32 7424  ;;  %p369_p1 = scmp.lt.s32.totalorder %s9255_s8, 1 }
  0x33   : > { %9050 = vset.pattern.permute.xlu0 %v9182_v1  ;;  %611 = vperm.xlu2 %9052, %v577_v2   ;;  %v8508_v5 = vld [vmem:[#allocation6 + $0x38] sm:$0xff]  ;;  %v8507_v8 = vld [vmem:[#allocation6 + $0x30] sm:$0xff]  ;;  %v8506_v14 = vld [vmem:[#allocation6 + $0x28] sm:$0xff]  ;;  %vm2098_vm2 = vsmask.f32 5376  ;;  %vm3321_vm3 = vcmask 7168  }
  0x34   : > { %601 = vperm.xlu1 %9051, %v575_v3   ;;  %v8524_v6 = vld [vmem:[#allocation6 + $0x38] sm:$0xff]  ;;  %591 = vperm.xlu0 %9050, %v573_v4   ;;  %v8523_v9 = vld [vmem:[#allocation6 + $0x30] sm:$0xff]  ;;  %v8522_v15 = vld [vmem:[#allocation6 + $0x28] sm:$0xff]  ;;  %s12834_s8 = smov (!%p369_p1, %s9255_s8), 1 }
  0x35   : > { %v8539_v7 = vld [vmem:[#allocation6 + $0x38] sm:$0xff]  ;;  %508 = vmatpush.bf16.msra.mxu0 %v8508_v5  ;;  %845 = vmatpush.bf16.msra.mxu1 %v8524_v6  ;;  %v8538_v10 = vld [vmem:[#allocation6 + $0x30] sm:$0xff]  ;;  %v8537_v16 = vld [vmem:[#allocation6 + $0x28] sm:$0xff]  ;;  %s8996_s25 = smul.u32 320, %s12834_s8 }
  0x36   : > { %1174 = vmatpush.bf16.msra.mxu2 %v8539_v7  ;;  %v574_v13 = vld [vmem:[%s12652_s3 + $0x8] sm:$0xff]  ;;  %v581_v20 = vld [vmem:[%s12652_s3 + $0x40] sm:$0xff]  ;;  %v580_v21 = vld [vmem:[%s12652_s3 + $0x38] sm:$0xff] }
  0x37   : > { %v8505_v17 = vld [vmem:[#allocation6 + $0x20] sm:$0xff]  ;;  %v8504_v23 = vld [vmem:[#allocation6 + $0x18] sm:$0xff]  ;;  %v8503_v26 = vld [vmem:[#allocation6 + $0x10] sm:$0xff]  ;;  %s11618_s11 = scalar_lea.vmem %s12658_s9, %s8996_s25 }
  0x38   : > { %v8521_v18 = vld [vmem:[#allocation6 + $0x20] sm:$0xff]  ;;  %v8520_v24 = vld [vmem:[#allocation6 + $0x18] sm:$0xff]  ;;  %v8519_v27 = vld [vmem:[#allocation6 + $0x10] sm:$0xff] }
  0x39   : > { %509 = vmatpush.bf16.msra.mxu0 %v8507_v8  ;;  %846 = vmatpush.bf16.msra.mxu1 %v8523_v9  ;;  %v8536_v19 = vld [vmem:[#allocation6 + $0x20] sm:$0xff]  ;;  %v8535_v25 = vld [vmem:[#allocation6 + $0x18] sm:$0xff]  ;;  %v8534_v28 = vld [vmem:[#allocation6 + $0x10] sm:$0xff] }
  0x3a   : > { %1175 = vmatpush.bf16.msra.mxu2 %v8538_v10  ;;  %v579_v22 = vld [vmem:[%s12652_s3 + $0x30] sm:$0xff]  ;;  %v584_v29 = vld [vmem:[%s12652_s3 + $0x58] sm:$0xff]  ;;  %v582_v31 = vld [vmem:[%s12652_s3 + $0x48] sm:$0xff] }
  0x3b   : > { %616 = vperm.xlu2 %9052, %v578_v11   ;;  %v583_v30 = vld [vmem:[%s12652_s3 + $0x50] sm:$0xff]  ;;  %v586_v39 = vld [vmem:[%s12652_s3 + $0x68] sm:$0xff]  ;;  %v585_v41 = vld [vmem:[%s12652_s3 + $0x60] sm:$0xff] }
  0x3c   : > { %606 = vperm.xlu1 %9051, %v576_v12   ;;  %596 = vperm.xlu0 %9050, %v574_v13   ;;  %v8502_v32 = vld [vmem:[#allocation6 + $0x8] sm:$0xff]  ;;  %v8501_v35 = vld [vmem:[#allocation6] sm:$0xff]  ;;  %v910_v45 = vld [vmem:[%s12652_s3 + $0x80] sm:$0xff] }
  0x3d   : > { %510 = vmatpush.bf16.msra.mxu0 %v8506_v14  ;;  %847 = vmatpush.bf16.msra.mxu1 %v8522_v15  ;;  %v8518_v33 = vld [vmem:[#allocation6 + $0x8] sm:$0xff]  ;;  %v8517_v36 = vld [vmem:[#allocation6] sm:$0xff]  ;;  %v914_v47 = vld [vmem:[%s12652_s3 + $0xa0] sm:$0xff] }
  0x3e   : > { %1176 = vmatpush.bf16.msra.mxu2 %v8537_v16  ;;  %v8533_v34 = vld [vmem:[#allocation6 + $0x8] sm:$0xff]  ;;  %v8532_v37 = vld [vmem:[#allocation6] sm:$0xff]  ;;  %v8494_v49 = vld [vmem:[%s9319_s14 + $0x8] sm:$0xff] }
  0x3f   : > { %v587_v38 = vld [vmem:[%s12652_s3 + $0x70] sm:$0xff]  ;;  %v911_v44 = vld [vmem:[%s12652_s3 + $0x88] sm:$0xff]  ;;  %v588_v46 = vld [vmem:[%s12652_s3 + $0x78] sm:$0xff] }
  0x40   : > { %v8493_v40 = vld [vmem:[%s9319_s14] sm:$0xff]  ;;  %v8510_v51 = vld [vmem:[%s9319_s14 + $0x48] sm:$0xff]  ;;  %v8495_v58 = vld [vmem:[%s9319_s14 + $0x10] sm:$0xff] }
  0x41   : > { %511 = vmatpush.bf16.msra.mxu0 %v8505_v17  ;;  %848 = vmatpush.bf16.msra.mxu1 %v8521_v18  ;;  %v8509_v42 = vld [vmem:[%s9319_s14 + $0x40] sm:$0xff]  ;;  %v8526_v52 = vld [vmem:[%s9319_s14 + $0x88] sm:$0xff]  ;;  %v8511_v60 = vld [vmem:[%s9319_s14 + $0x50] sm:$0xff] }
  0x42   : > { %1177 = vmatpush.bf16.msra.mxu2 %v8536_v19  ;;  %v8525_v43 = vld [vmem:[%s9319_s14 + $0x80] sm:$0xff]  ;;  %v915_v55 = vld [vmem:[%s12652_s3 + $0xa8] sm:$0xff] }
  0x43   : > { %631 = vperm.xlu2 %9052, %v581_v20   ;;  %v913_v48 = vld [vmem:[%s12652_s3 + $0x98] sm:$0xff]  ;;  %v912_v50 = vld [vmem:[%s12652_s3 + $0x90] sm:$0xff]  ;;  %v919_v57 = vld [vmem:[%s12652_s3 + $0xc8] sm:$0xff] }
  0x44   : > { %626 = vperm.xlu1 %9051, %v580_v21   ;;  %621 = vperm.xlu0 %9050, %v579_v22   ;;  %v917_v53 = vld [vmem:[%s12652_s3 + $0xb8] sm:$0xff]  ;;  %v916_v54 = vld [vmem:[%s12652_s3 + $0xb0] sm:$0xff]  ;;  %v918_v59 = vld [vmem:[%s12652_s3 + $0xc0] sm:$0xff] }
  0x45   : > { %512 = vmatpush.bf16.msra.mxu0 %v8504_v23  ;;  %849 = vmatpush.bf16.msra.mxu1 %v8520_v24  ;;  %v920_v56 = vld [vmem:[%s12652_s3 + $0xd0] sm:$0xff]  ;;  %v923_v62 = vld [vmem:[%s12652_s3 + $0xe8] sm:$0xff]  ;;  %v922_v63 = vld [vmem:[%s12652_s3 + $0xe0] sm:$0xff] }
  0x46   : > { %1178 = vmatpush.bf16.msra.mxu2 %v8535_v25  ;;  %v8527_v61 = vld [vmem:[%s9319_s14 + $0x90] sm:$0xff]  ;;  %v921_v0 = vld [vmem:[%s12652_s3 + $0xd8] sm:$0xff] }
  0x47   : > { %v1232_v1 = vld [vmem:[%s12652_s3 + $0x100] sm:$0xff]  ;;  %v925_v2 = vld [vmem:[%s12652_s3 + $0xf8] sm:$0xff]  ;;  %v924_v4 = vld [vmem:[%s12652_s3 + $0xf0] sm:$0xff] }
  0x48   : > { %v8496_v3 = vld [vmem:[%s9319_s14 + $0x18] sm:$0xff]  ;;  %v8497_v13 = vld [vmem:[%s9319_s14 + $0x20] sm:$0xff]  ;;  %v8498_v23 = vld [vmem:[%s9319_s14 + $0x28] sm:$0xff] }
  0x49   : > { %513 = vmatpush.bf16.msra.mxu0 %v8503_v26  ;;  %850 = vmatpush.bf16.msra.mxu1 %v8519_v27  ;;  %v8512_v5 = vld [vmem:[%s9319_s14 + $0x58] sm:$0xff]  ;;  %v1236_v14 = vld [vmem:[%s12652_s3 + $0x120] sm:$0xff] }
  0x4a   : > { %1179 = vmatpush.bf16.msra.mxu2 %v8534_v28  ;;  %v8528_v6 = vld [vmem:[%s9319_s14 + $0x98] sm:$0xff]  ;;  %v8513_v15 = vld [vmem:[%s9319_s14 + $0x60] sm:$0xff]  ;;  %v8514_v25 = vld [vmem:[%s9319_s14 + $0x68] sm:$0xff] }
  0x4b   : > { %646 = vperm.xlu2 %9052, %v584_v29   ;;  %v1235_v7 = vld [vmem:[%s12652_s3 + $0x118] sm:$0xff]  ;;  %v1234_v8 = vld [vmem:[%s12652_s3 + $0x110] sm:$0xff]  ;;  %v1233_v9 = vld [vmem:[%s12652_s3 + $0x108] sm:$0xff] }
  0x4c   : > { %641 = vperm.xlu1 %9051, %v583_v30   ;;  %636 = vperm.xlu0 %9050, %v582_v31   ;;  %v1238_v11 = vld [vmem:[%s12652_s3 + $0x130] sm:$0xff]  ;;  %v1237_v12 = vld [vmem:[%s12652_s3 + $0x128] sm:$0xff]  ;;  %v1240_v19 = vld [vmem:[%s12652_s3 + $0x140] sm:$0xff] }
  0x4d   : > { %514 = vmatpush.bf16.msra.mxu0 %v8502_v32  ;;  %851 = vmatpush.bf16.msra.mxu1 %v8518_v33  ;;  %v8529_v16 = vld [vmem:[%s9319_s14 + $0xa0] sm:$0xff]  ;;  %v1241_v18 = vld [vmem:[%s12652_s3 + $0x148] sm:$0xff] }
  0x4e   : > { %1180 = vmatpush.bf16.msra.mxu2 %v8533_v34  ;;  %v1239_v20 = vld [vmem:[%s12652_s3 + $0x138] sm:$0xff]  ;;  %v1244_v21 = vld [vmem:[%s12652_s3 + $0x160] sm:$0xff]  ;;  %v1242_v24 = vld [vmem:[%s12652_s3 + $0x150] sm:$0xff] }
  0x4f   : > { %v1243_v22 = vld [vmem:[%s12652_s3 + $0x158] sm:$0xff]  ;;  %v8552_v31 = vld [vmem:[%s12653_s4 + $0x30] sm:$0xff]  ;;  %v3140_v32 = vld [vmem:[%s12655_s6 + $0x8] sm:$0xff] }
  0x50   : > { %v8530_v26 = vld [vmem:[%s9319_s14 + $0xa8] sm:$0xff] }
  0x51   : > { %515 = vmatpush.bf16.msra.mxu0 %v8501_v35  ;;  %852 = vmatpush.bf16.msra.mxu1 %v8517_v36  ;;  %v8553_v28 = vld [vmem:[%s12653_s4 + $0x38] sm:$0xff]  ;;  %v3139_v33 = vld [vmem:[%s12655_s6] sm:$0xff]  ;;  %v1245_v34 = vld [vmem:[%s12652_s3 + $0x168] sm:$0xff] }
  0x52   : > { %1181 = vmatpush.bf16.msra.mxu2 %v8532_v37  ;;  %v8551_v35 = vld [vmem:[%s12653_s4 + $0x28] sm:$0xff] }
  0x53   : > { %661 = vperm.xlu2 %9052, %v587_v38  }
  0x54   : > { %656 = vperm.xlu1 %9051, %v586_v39   ;;  %651 = vperm.xlu0 %9050, %v585_v41   ;;  %v8550_v39 = vld [vmem:[%s12653_s4 + $0x20] sm:$0xff]  ;;  %v3142_v41 = vld [vmem:[%s12655_s6 + $0x18] sm:$0xff] }
  0x55   : > { %516 = vmatmul.bf16.vlgmr.msra.gmra.mxu0 %v8493_v40  ;;  %853 = vmatmul.bf16.vlgmr.msra.gmra.mxu1 %v8509_v42  ;;  %v3143_v40 = vld [vmem:[%s12655_s6 + $0x20] sm:$0xff] }
  0x56   : > { %1182 = vmatmul.bf16.vlgmr.msra.gmra.mxu2 %v8525_v43  ;;  %1935 = vmatpush.bf16.msrb.mxu0 %v8553_v28  ;;  %v8499_v42 = vld [vmem:[%s9319_s14 + $0x30] sm:$0xff] }
  0x57   : > { %v3141_v43 = vld [vmem:[%s12655_s6 + $0x10] sm:$0xff] }
  0x58   : > { %v3153_v28 = vld [vmem:[%s12655_s6 + $0x70] sm:$0xff] }
  0x5a   : > { %1936 = vmatpush.bf16.msrb.mxu0 %v8552_v31  ;;  %v8563_v31 = vld [vmem:[%s12653_s4 + $0x80] sm:$0xff] }
  0x5b   : > { %933 = vperm.xlu2 %9052, %v911_v44   ;;  %v8515_v44 = vld [vmem:[%s9319_s14 + $0x70] sm:$0xff] }
  0x5c   : > { %928 = vperm.xlu1 %9051, %v910_v45   ;;  %666 = vperm.xlu0 %9050, %v588_v46   ;;  %v8531_v45 = vld [vmem:[%s9319_s14 + $0xb0] sm:$0xff]  ;;  %v8549_v46 = vld [vmem:[%s12653_s4 + $0x18] sm:$0xff] }
  0x5e   : > { %1937 = vmatpush.bf16.msrb.mxu0 %v8551_v35 }
  0x62   : > { %1938 = vmatpush.bf16.msrb.mxu0 %v8550_v39 }
  0x63   : > { %948 = vperm.xlu2 %9052, %v914_v47  }
  0x64   : > { %943 = vperm.xlu1 %9051, %v913_v48   ;;  %938 = vperm.xlu0 %9050, %v912_v50   ;;  %v8570_v48 = vld [vmem:[%s12653_s4 + $0xb8] sm:$0xff] }
  0x65   : > { %521 = vmatmul.bf16.gmra.mxu0 %v8494_v49  ;;  %858 = vmatmul.bf16.gmra.mxu1 %v8510_v51  ;;  %v8548_v51 = vld [vmem:[%s12653_s4 + $0x10] sm:$0xff] }
  0x66   : > { %1187 = vmatmul.bf16.gmra.mxu2 %v8526_v52  ;;  %1939 = vmatpush.bf16.msrb.mxu0 %v8549_v46  ;;  %v8561_v52 = vld [vmem:[%s12653_s4 + $0x78] sm:$0xff] }
  0x67   : > { %1741 = vmatpush.bf16.msra.mxu3 %v8570_v48  ;;  %1984 = vmatpush.bf16.msrb.mxu1 %v8561_v52 }
  0x6a   : > { %1940 = vmatpush.bf16.msrb.mxu0 %v8548_v51  ;;  %v5109_v51 = vld [vmem:[%s12655_s6 + $0x88] sm:$0xff] }
  0x6b   : > { %963 = vperm.xlu2 %9052, %v917_v53   ;;  %v3146_v53 = vld [vmem:[%s12655_s6 + $0x38] sm:$0xff] }
  0x6c   : > { %958 = vperm.xlu1 %9051, %v916_v54   ;;  %953 = vperm.xlu0 %9050, %v915_v55   ;;  %v3145_v54 = vld [vmem:[%s12655_s6 + $0x30] sm:$0xff]  ;;  %v3144_v55 = vld [vmem:[%s12655_s6 + $0x28] sm:$0xff] }
  0x73   : > { %978 = vperm.xlu2 %9052, %v920_v56   ;;  %v8569_v56 = vld [vmem:[%s12653_s4 + $0xb0] sm:$0xff] }
  0x74   : > { %973 = vperm.xlu1 %9051, %v919_v57   ;;  %968 = vperm.xlu0 %9050, %v918_v59   ;;  %v8547_v57 = vld [vmem:[%s12653_s4 + $0x8] sm:$0xff] }
  0x75   : > { %526 = vmatmul.bf16.gmra.mxu0 %v8495_v58  ;;  %863 = vmatmul.bf16.gmra.mxu1 %v8511_v60  ;;  %v8560_v58 = vld [vmem:[%s12653_s4 + $0x70] sm:$0xff]  ;;  %v8568_v60 = vld [vmem:[%s12653_s4 + $0xa8] sm:$0xff] }
  0x76   : > { %1192 = vmatmul.bf16.gmra.mxu2 %v8527_v61  ;;  %1742 = vmatpush.bf16.msra.mxu3 %v8569_v56 }
  0x77   : > { %1985 = vmatpush.bf16.msrb.mxu1 %v8560_v58  ;;  %1941 = vmatpush.bf16.msrb.mxu0 %v8547_v57 }
  0x7a   : > { %1743 = vmatpush.bf16.msra.mxu3 %v8568_v60 }
  0x7b   : > { %993 = vperm.xlu2 %9052, %v923_v62   ;;  %v8546_v62 = vld [vmem:[%s12653_s4] sm:$0xff] }
  0x7c   : > { %988 = vperm.xlu1 %9051, %v922_v63   ;;  %983 = vperm.xlu0 %9050, %v921_v0   ;;  %v8559_v63 = vld [vmem:[%s12653_s4 + $0x68] sm:$0xff] }
  0x7d   : > { %1986 = vmatpush.bf16.msrb.mxu1 %v8559_v63  ;;  %1942 = vmatpush.bf16.msrb.mxu0 %v8546_v62 }
  0x83   : > { %1248 = vperm.xlu2 %9052, %v1232_v1   ;;  %v3149_v1 = vld [vmem:[%s12655_s6 + $0x50] sm:$0xff] }
  0x84   : > { %1003 = vperm.xlu1 %9051, %v925_v2   ;;  %998 = vperm.xlu0 %9050, %v924_v4   ;;  %v3148_v2 = vld [vmem:[%s12655_s6 + $0x48] sm:$0xff]  ;;  %v3147_v4 = vld [vmem:[%s12655_s6 + $0x40] sm:$0xff] }
  0x85   : > { %531 = vmatmul.bf16.gmra.mxu0 %v8496_v3  ;;  %868 = vmatmul.bf16.gmra.mxu1 %v8512_v5  ;;  %v8500_v3 = vld [vmem:[%s9319_s14 + $0x38] sm:$0xff] }
  0x86   : > { %1197 = vmatmul.bf16.gmra.mxu2 %v8528_v6  ;;  %v8516_v5 = vld [vmem:[%s9319_s14 + $0x78] sm:$0xff]  ;;  %v8567_v6 = vld [vmem:[%s12653_s4 + $0xa0] sm:$0xff] }
  0x87   : > { %1744 = vmatpush.bf16.msra.mxu3 %v8567_v6  ;;  %v5115_v6 = vld [vmem:[%s12655_s6 + $0xb8] sm:$0xff] }
  0x8b   : > { %1263 = vperm.xlu2 %9052, %v1235_v7   ;;  %v8558_v7 = vld [vmem:[%s12653_s4 + $0x60] sm:$0xff] }
  0x8c   : > { %1258 = vperm.xlu1 %9051, %v1234_v8   ;;  %1253 = vperm.xlu0 %9050, %v1233_v9   ;;  %v8566_v9 = vld [vmem:[%s12653_s4 + $0x98] sm:$0xff] }
  0x8d   : > { %v9449_v10 = vpop.permute.xlu2 %611  ;;  %1987 = vmatpush.bf16.msrb.mxu1 %v8558_v7  ;;  %1745 = vmatpush.bf16.msra.mxu3 %v8566_v9  ;;  %v5113_v7 = vld [vmem:[%s12655_s6 + $0xa8] sm:$0xff] }
  0x93   : > { %1278 = vperm.xlu2 %9052, %v1238_v11  }
  0x94   : > { %1273 = vperm.xlu1 %9051, %v1237_v12   ;;  %1268 = vperm.xlu0 %9050, %v1236_v14   ;;  %v8557_v12 = vld [vmem:[%s12653_s4 + $0x58] sm:$0xff]  ;;  %v3151_v14 = vld [vmem:[%s12655_s6 + $0x60] sm:$0xff] }
  0x95   : > { %536 = vmatmul.bf16.gmra.mxu0 %v8497_v13  ;;  %873 = vmatmul.bf16.gmra.mxu1 %v8513_v15  ;;  %v9463_v17 = vpop.permute.xlu2 %616  ;;  %v3152_v13 = vld [vmem:[%s12655_s6 + $0x68] sm:$0xff]  ;;  %v3150_v15 = vld [vmem:[%s12655_s6 + $0x58] sm:$0xff] }
  0x96   : > { %1202 = vmatmul.bf16.gmra.mxu2 %v8529_v16  ;;  %v8565_v16 = vld [vmem:[%s12653_s4 + $0x90] sm:$0xff]  ;;  %1988 = vmatpush.bf16.msrb.mxu1 %v8557_v12  ;;  %v8578_v12 = vld [vmem:[%s12653_s4 + $0xf8] sm:$0xff] }
  0x97   : > { %1746 = vmatpush.bf16.msra.mxu3 %v8565_v16  ;;  %1790 = vmatpush.bf16.msrb.mxu2 %v8578_v12 }
  0x9b   : > { %1293 = vperm.xlu2 %9052, %v1241_v18  }
  0x9c   : > { %1288 = vperm.xlu1 %9051, %v1240_v19   ;;  %1283 = vperm.xlu0 %9050, %v1239_v20   ;;  %v8556_v19 = vld [vmem:[%s12653_s4 + $0x50] sm:$0xff] }
  0x9d   : > { %v9486_v27 = vpop.permute.xlu2 %631  ;;  %1989 = vmatpush.bf16.msrb.mxu1 %v8556_v19  ;;  %v8577_v19 = vld [vmem:[%s12653_s4 + $0xf0] sm:$0xff] }
  0x9e   : > { %1791 = vmatpush.bf16.msrb.mxu2 %v8577_v19  ;;  %v8574_v19 = vld [vmem:[%s12653_s4 + $0xd8] sm:$0xff] }
  0xa3   : > { %1308 = vperm.xlu2 %9052, %v1244_v21   ;;  %v8564_v21 = vld [vmem:[%s12653_s4 + $0x88] sm:$0xff] }
  0xa4   : > { %1303 = vperm.xlu1 %9051, %v1243_v22   ;;  %1298 = vperm.xlu0 %9050, %v1242_v24   ;;  %v5108_v24 = vld [vmem:[%s12655_s6 + $0x80] sm:$0xff] }
  0xa5   : > { %541 = vmatmul.bf16.gmra.mxu0 %v8498_v23  ;;  %878 = vmatmul.bf16.gmra.mxu1 %v8514_v25  ;;  %v9510_v36 = vpop.permute.xlu2 %646  ;;  %v8555_v23 = vld [vmem:[%s12653_s4 + $0x48] sm:$0xff]  ;;  %v3154_v25 = vld [vmem:[%s12655_s6 + $0x78] sm:$0xff] }
  0xa6   : > { %1207 = vmatmul.bf16.gmra.mxu2 %v8530_v26  ;;  %v9491_v29 = vpop.permute.xlu1 %601  ;;  %v9493_v30 = vpop.permute.xlu0 %591  ;;  %1747 = vmatpush.bf16.msra.mxu3 %v8564_v21 }
  0xa7   : > { %1990 = vmatpush.bf16.msrb.mxu1 %v8555_v23 }
  0xaa   : > { %1748 = vmatpush.bf16.msra.mxu3 %v8563_v31 }
  0xab   : > { %3162 = vperm.xlu2 %9052, %v3140_v32   ;;  %v9649_v32 = vld [vmem:[%s12651_s2] ss:$0 sm:$0xff] }
  0xac   : > { %3157 = vperm.xlu1 %9051, %v3139_v33   ;;  %1313 = vperm.xlu0 %9050, %v1245_v34   ;;  %v8554_v34 = vld [vmem:[%s12653_s4 + $0x40] sm:$0xff] }
  0xad   : > { %v9539_v49 = vpop.permute.xlu2 %661  ;;  %1991 = vmatpush.bf16.msrb.mxu1 %v8554_v34 }
  0xae   : > { %v9512_v37 = vpop.permute.xlu1 %606  ;;  %v9514_v38 = vpop.permute.xlu0 %596 }
  0xb3   : > { %3177 = vperm.xlu2 %9052, %v3143_v40  }
  0xb4   : > { %3172 = vperm.xlu1 %9051, %v3142_v41   ;;  %3167 = vperm.xlu0 %9050, %v3141_v43  }
  0xb5   : > { %546 = vmatmul.bf16.gmra.mxu0 %v8499_v42  ;;  %883 = vmatmul.bf16.gmra.mxu1 %v8515_v44  ;;  %v9580_v0 = vpop.permute.xlu2 %933  ;;  %v5112_v44 = vld [vmem:[%s12655_s6 + $0xa0] sm:$0xff] }
  0xb6   : > { %1212 = vmatmul.bf16.gmra.mxu2 %v8531_v45  ;;  %v9534_v47 = vpop.permute.xlu1 %626  ;;  %v9541_v50 = vpop.permute.xlu0 %621  ;;  %v5110_v45 = vld [vmem:[%s12655_s6 + $0x90] sm:$0xff] }
  0xbb   : > { %3192 = vperm.xlu2 %9052, %v3146_v53  }
  0xbc   : > { %3187 = vperm.xlu1 %9051, %v3145_v54   ;;  %3182 = vperm.xlu0 %9050, %v3144_v55  }
  0xbd   : > { %v9621_v18 = vpop.permute.xlu2 %948 }
  0xbe   : > { %v9567_v59 = vpop.permute.xlu1 %641  ;;  %v9572_v61 = vpop.permute.xlu0 %636 }
  0xc3   : > { %3207 = vperm.xlu2 %9052, %v3149_v1  }
  0xc4   : > { %3202 = vperm.xlu1 %9051, %v3148_v2   ;;  %3197 = vperm.xlu0 %9050, %v3147_v4  }
  0xc5   : > { %551 = vmatmul.bf16.gmra.mxu0 %v8500_v3  ;;  %888 = vmatmul.bf16.gmra.mxu1 %v8516_v5  ;;  %v9654_v35 = vpop.permute.xlu2 %963 }
  0xc6   : > { %v9599_v8 = vpop.permute.xlu1 %656  ;;  %v9604_v11 = vpop.permute.xlu0 %651 }
  0xcb   : > { %3222 = vperm.xlu2 %9052, %v3152_v13  }
  0xcc   : > { %3217 = vperm.xlu1 %9051, %v3151_v14   ;;  %3212 = vperm.xlu0 %9050, %v3150_v15   ;;  %v8586_v14 = vld [vmem:[%s12653_s4 + $0x138] sm:$0xff] }
  0xcd   : > { %v9677_v62 = vpop.permute.xlu2 %978  ;;  %2331 = vmatpush.bf16.msrb.mxu3 %v8586_v14 }
  0xce   : > { %v929_v20 = vpop.permute.xlu1 %928  ;;  %v9629_v22 = vpop.permute.xlu0 %666 }
  0xd2   : > { %v517_v26 = vpop.f32.mrf.mxu0  ;;  %v854_v33 = vpop.f32.mrf.mxu1 }
  0xd3   : > { %5126 = vperm.xlu2 %9052, %v5108_v24   ;;  %v855_v39 = vadd.f32 %v9649_v32, %v854_v33  ;;  %v518_v41 = vadd.f32 %v9649_v32, %v517_v26  ;;  %v5118_v24 = vld [vmem:[%s12655_s6 + $0xd0] sm:$0xff] }
  0xd4   : > { %3232 = vperm.xlu1 %9051, %v3154_v25   ;;  %3227 = vperm.xlu0 %9050, %v3153_v28   ;;  %v5116_v25 = vld [vmem:[%s12655_s6 + $0xc0] sm:$0xff]  ;;  %v5114_v28 = vld [vmem:[%s12655_s6 + $0xb0] sm:$0xff] }
  0xd5   : > { %v894_v46 = vmax.f32 %v855_v39, 0.0  ;;  %v557_v52 = vmax.f32 %v518_v41, 0.0  ;;  %v9714_v21 = vpop.permute.xlu2 %993  ;;  %v8576_v39 = vld [vmem:[%s12653_s4 + $0xe8] sm:$0xff] }
  0xd6   : > { %v9657_v40 = vpop.permute.xlu1 %943  ;;  %v9660_v42 = vpop.permute.xlu0 %938  ;;  %1792 = vmatpush.bf16.msrb.mxu2 %v8576_v39 }
  0xd7   : > { %v1006_v57 = vmul.f32 %v929_v20, %v894_v46  ;;  %v669_v63 = vmul.f32 %v9493_v30, %v557_v52 }
  0xd9   : > { %v9662_v43 = vpop.f32.mrf.mxu2 }
  0xda   : > { %v519_v48 = vpop.f32.mrf.mxu0  ;;  %v856_v54 = vpop.f32.mrf.mxu1 }
  0xdb   : > { %v520_v53 = vadd.f32 %v9649_v32, %v519_v48  ;;  %v857_v55 = vadd.f32 %v9649_v32, %v856_v54  ;;  %5146 = vperm.xlu2 %9052, %v5112_v44  }
  0xdc   : > { %5136 = vperm.xlu1 %9051, %v5110_v45   ;;  %5131 = vperm.xlu0 %9050, %v5109_v51  }
  0xdd   : > { %v558_v56 = vmax.f32 %v520_v53, 0.0  ;;  %v895_v58 = vmax.f32 %v857_v55, 0.0 }
  0xde   : > { %v9675_v60 = vpop.permute.xlu1 %958  ;;  %v9681_v2 = vpop.permute.xlu0 %953 }
  0xdf   : > { %v670_v1 = vmul.f32 %v9514_v38, %v558_v56  ;;  %v1007_v3 = vmul.f32 %v9580_v0, %v895_v58  ;;  %v5111_v38 = vld [vmem:[%s12655_s6 + $0x98] sm:$0xff]  ;;  %v8575_v58 = vld [vmem:[%s12653_s4 + $0xe0] sm:$0xff] }
  0xe0   : > { %1793 = vmatpush.bf16.msrb.mxu2 %v8575_v58 }
  0xe1   : > { %v9684_v4 = vpack.c.bf16 %v670_v1, %v669_v63  ;;  %v9686_v5 = vpop.f32.mrf.mxu2  ;;  %v8861_v9 = vpack.c.bf16 %v1007_v3, %v1006_v57 }
  0xe2   : > { %v522_v30 = vpop.f32.mrf.mxu0  ;;  %v859_v0 = vpop.f32.mrf.mxu1 }
  0xe3   : > { %8822 = vst [vmem:[#allocation2] sm:$0xff] %v9684_v4   ;;  %1943 = vmatmul.bf16.vlgmr.msrb.gmra.mxu0 %v9684_v4  ;;  %5161 = vperm.xlu2 %9052, %v5115_v6   ;;  %v523_v15 = vadd.f32 %v9649_v32, %v522_v30  ;;  %v860_v20 = vadd.f32 %v9649_v32, %v859_v0  ;;  %v1431_v51 = vshll.u32 %v9684_v4, 16 }
  0xe4   : > { %8964 = vst [vmem:[#allocation2 + $0x40] sm:$0xff] %v8861_v9   ;;  %5151 = vperm.xlu1 %9051, %v5113_v7   ;;  %5141 = vperm.xlu0 %9050, %v5111_v38   ;;  %v1429_v38 = vshrl.u32 %v9684_v4, 16 }
  0xe5   : > { %v559_v31 = vmax.f32 %v523_v15, 0.0  ;;  %v896_v41 = vmax.f32 %v860_v20, 0.0  ;;  %v1433_v6 = vrot.slane %v1431_v51, 1  ;;  %1794 = vmatpush.bf16.msrb.mxu2 %v8574_v19 }
  0xe6   : > { %v9702_v13 = vpop.permute.xlu1 %973  ;;  %v9708_v16 = vpop.permute.xlu0 %968 }
  0xe7   : > { %v671_v54 = vmul.f32 %v9491_v29, %v559_v31  ;;  %v1008_v63 = vmul.f32 %v9660_v42, %v896_v41  ;;  %v5121_v29 = vld [vmem:[%s12655_s6 + $0xe8] sm:$0xff]  ;;  %v1434_v20 = vor.u32 %v1433_v6, %v1429_v38  ;;  %v8573_v41 = vld [vmem:[%s12653_s4 + $0xd0] sm:$0xff] }
  0xe8   : > { %v5117_v42 = vld [vmem:[%s12655_s6 + $0xc8] sm:$0xff] }
  0xe9   : > { %v1188_v23 = vpop.f32.mrf.mxu2  ;;  %1795 = vmatpush.bf16.msrb.mxu2 %v8573_v41  ;;  %v8572_v6 = vld [vmem:[%s12653_s4 + $0xc8] sm:$0xff] }
  0xea   : > { %v524_v26 = vpop.f32.mrf.mxu0  ;;  %v861_v34 = vpop.f32.mrf.mxu1  ;;  %v8980_v45 = vld [vmem:[#allocation2] sm:$0xf0]  ;;  %v8981_v46 = vld [vmem:[#allocation2] sm:$0xe]  ;;  %v1189_v31 = vadd.f32 %v9649_v32, %v1188_v23  ;;  %v6628_v23 = vld [vmem:[%s12655_s6 + $0x110] sm:$0xff] }
  0xeb   : > { %v525_v33 = vadd.f32 %v9649_v32, %v524_v26  ;;  %v862_v44 = vadd.f32 %v9649_v32, %v861_v34  ;;  %5176 = vperm.xlu2 %9052, %v5118_v24   ;;  %v8982_v57 = vor.u32 %v8981_v46, %v8980_v45  ;;  %v5122_v46 = vld [vmem:[%s12655_s6 + $0xf0] sm:$0xff] }
  0xec   : > { %5166 = vperm.xlu1 %9051, %v5116_v25   ;;  %5156 = vperm.xlu0 %9050, %v5114_v28   ;;  %v1184_v25 = vadd.f32 %v9649_v32, %v9662_v43  ;;  %v1186_v43 = vadd.f32 %v9649_v32, %v9686_v5  ;;  %v5120_v5 = vld [vmem:[%s12655_s6 + $0xe0] sm:$0xff] }
  0xed   : > { %v560_v48 = vmax.f32 %v525_v33, 0.0  ;;  %v897_v52 = vmax.f32 %v862_v44, 0.0  ;;  %v1606_v12 = vrot.slane %v8982_v57, 1  ;;  %v1220_v57 = vmax.f32 %v1189_v31, 0.0  ;;  %1796 = vmatpush.bf16.msrb.mxu2 %v8572_v6 }
  0xee   : > { %v9731_v53 = vpop.permute.xlu1 %988  ;;  %v9735_v56 = vpop.permute.xlu0 %983 }
  0xef   : > { %v672_v55 = vmul.f32 %v9512_v37, %v560_v48  ;;  %v1009_v1 = vmul.f32 %v9657_v40, %v897_v52  ;;  %v5119_v37 = vld [vmem:[%s12655_s6 + $0xd8] sm:$0xff]  ;;  %v1249_v40 = vpop.permute.xlu2 %1248  ;;  %v1218_v48 = vmax.f32 %v1184_v25, 0.0 }
  0xf1   : > { %v9742_v3 = vpack.c.bf16 %v672_v55, %v671_v54  ;;  %v1190_v7 = vpop.f32.mrf.mxu2  ;;  %v8866_v9 = vpack.c.bf16 %v1009_v1, %v1008_v63  ;;  %v8585_v55 = vld [vmem:[%s12653_s4 + $0x130] sm:$0xff] }
  0xf2   : > { %v527_v30 = vpop.f32.mrf.mxu0  ;;  %v864_v0 = vpop.f32.mrf.mxu1  ;;  %v1191_v26 = vadd.f32 %v9649_v32, %v1190_v7  ;;  %v1219_v7 = vmax.f32 %v1186_v43, 0.0  ;;  %2332 = vmatpush.bf16.msrb.mxu3 %v8585_v55 }
  0xf3   : > { %8957 = vst [vmem:[#allocation2 + $0x8] sm:$0xff] %v9742_v3   ;;  %1948 = vmatmul.bf16.gmra.mxu0 %v9742_v3  ;;  %v1607_v14 = vrot.slane %v9742_v3, 1  ;;  %v1436_v15 = vshll.u32 %v9742_v3, 16  ;;  %5191 = vperm.xlu2 %9052, %v5121_v29   ;;  %v528_v33 = vadd.f32 %v9649_v32, %v527_v30  ;;  %v865_v44 = vadd.f32 %v9649_v32, %v864_v0 }
  0xf4   : > { %8965 = vst [vmem:[#allocation2 + $0x48] sm:$0xff] %v8866_v9   ;;  %5181 = vperm.xlu1 %9051, %v5119_v37   ;;  %5171 = vperm.xlu0 %9050, %v5117_v42   ;;  %v1221_v51 = vmax.f32 %v1191_v26, 0.0  ;;  %v1316_v0 = vmul.f32 %v1249_v40, %v1218_v48  ;;  %v8940_v19 = vunpack.c.h.b16 %v9742_v3 }
  0xf5   : > { %v1608_v4 = vsel %vm1555_vm0, %v1606_v12, %v1607_v14  ;;  %v9764_v24 = vrot.slane %v1436_v15, 1  ;;  %v561_v58 = vmax.f32 %v528_v33, 0.0  ;;  %v898_v29 = vmax.f32 %v865_v44, 0.0 }
  0xf6   : > { %v9769_v28 = vpop.permute.xlu1 %1003  ;;  %1749 = vmatmul.bf16.vlgmr.msra.gmra.mxu3 %v1608_v4  ;;  %v9773_v34 = vpop.permute.xlu0 %998 }
  0xf7   : > { %v1439_v39 = vsel %vm1427_vm1, %v1434_v20, %v9764_v24  ;;  %v1264_v30 = vpop.permute.xlu2 %1263  ;;  %v673_v4 = vmul.f32 %v9449_v10, %v561_v58  ;;  %v1010_v41 = vmul.f32 %v9621_v18, %v898_v29 }
  0xf8   : > { %1992 = vmatmul.bf16.vlgmr.msrb.gmra.mxu1 %v1439_v39  ;;  %v1319_v12 = vmul.f32 %v1264_v30, %v1221_v51  ;;  %v8571_v39 = vld [vmem:[%s12653_s4 + $0xc0] sm:$0xff] }
  0xf9   : > { %v1193_v45 = vpop.f32.mrf.mxu2  ;;  %v6626_v51 = vld [vmem:[%s12655_s6 + $0x100] sm:$0xff]  ;;  %1797 = vmatpush.bf16.msrb.mxu2 %v8571_v39 }
  0xfa   : > { %v529_v52 = vpop.f32.mrf.mxu0  ;;  %v2034_v54 = vld [vmem:[#allocation2 + $0x8] sm:$0x8]  ;;  %v866_v1 = vpop.f32.mrf.mxu1  ;;  %v1194_v40 = vadd.f32 %v9649_v32, %v1193_v45 }
  0xfb   : > { %v530_v63 = vadd.f32 %v9649_v32, %v529_v52  ;;  %v867_v37 = vadd.f32 %v9649_v32, %v866_v1  ;;  %v1537_v9 = vld [vmem:[#allocation2 + $0x8] sm:$0xc]  ;;  %6646 = vperm.xlu2 %9052, %v6628_v23   ;;  %v2039_v38 = vunpack.c.l.b16 %v2034_v54 }
  0xfc   : > { %5196 = vperm.xlu1 %9051, %v5122_v46   ;;  %5186 = vperm.xlu0 %9050, %v5120_v5   ;;  %v1548_v26 = vunpack.c.l.b16 %v1537_v9 }
  0xfd   : > { %v562_v42 = vmax.f32 %v530_v63, 0.0  ;;  %v899_v15 = vmax.f32 %v867_v37, 0.0  ;;  %v2040_v46 = vpack.c.b16 %v8940_v19, %v2039_v38 }
  0xfe   : > { %v1259_v20 = vpop.permute.xlu1 %1258  ;;  %v1254_v33 = vpop.permute.xlu0 %1253  ;;  %v9819_v5 = vpack.c.b16 %v8940_v19, %v1548_v26 }
  0xff   : > { %v674_v25 = vmul.f32 %v9463_v17, %v562_v42  ;;  %v1318_v31 = vmul.f32 %v1259_v20, %v1220_v57  ;;  %v1011_v43 = vmul.f32 %v9681_v2, %v899_v15  ;;  %v1317_v44 = vmul.f32 %v1254_v33, %v1219_v7  ;;  %v6631_v17 = vld [vmem:[%s12655_s6 + $0x128] sm:$0xff]  ;;  %v5123_v2 = vld [vmem:[%s12655_s6 + $0xf8] sm:$0xff] }
 0x100   : > { %v1222_v57 = vmax.f32 %v1194_v40, 0.0  ;;  %v2044_v63 = vshll.u32 %v2040_v46, 16  ;;  %v2100_v37 = vshrl.u32 %v9819_v5, 16  ;;  %v1440_v42 = vshrl.u32 %v9742_v3, 16 }
 0x101   : > { %v8831_v23 = vpack.c.bf16 %v674_v25, %v673_v4  ;;  %v8906_v48 = vpack.c.bf16 %v1319_v12, %v1318_v31  ;;  %v1195_v10 = vpop.f32.mrf.mxu2  ;;  %v8871_v52 = vpack.c.bf16 %v1011_v43, %v1010_v41  ;;  %v8901_v54 = vpack.c.bf16 %v1317_v44, %v1316_v0  ;;  %v6630_v0 = vld [vmem:[%s12655_s6 + $0x120] sm:$0xff]  ;;  %v6627_v4 = vld [vmem:[%s12655_s6 + $0x108] sm:$0xff] }
 0x102   : > { %v1196_v18 = vadd.f32 %v9649_v32, %v1195_v10  ;;  %v532_v45 = vpop.f32.mrf.mxu0  ;;  %v869_v55 = vpop.f32.mrf.mxu1  ;;  %v2046_v12 = vrot.slane %v2044_v63, 1  ;;  %v2103_v15 = vshll.u32 %v9819_v5, 16  ;;  %v1442_v26 = vor.u32 %v1440_v42, %v9764_v24  ;;  %v8584_v31 = vld [vmem:[%s12653_s4 + $0x128] sm:$0xff] }
 0x103   : > { %8958 = vst [vmem:[#allocation2 + $0x10] sm:$0xff] %v8831_v23   ;;  %6661 = vperm.xlu2 %9052, %v6631_v17   ;;  %v533_v6 = vadd.f32 %v9649_v32, %v532_v45  ;;  %v870_v9 = vadd.f32 %v9649_v32, %v869_v55  ;;  %v2042_v40 = vshrl.u32 %v2040_v46, 16  ;;  %v2102_v43 = vrot.slane %v2100_v37, 2  ;;  %2333 = vmatpush.bf16.msrb.mxu3 %v8584_v31 }
 0x104   : > { %8966 = vst [vmem:[#allocation2 + $0x50] sm:$0xff] %v8871_v52   ;;  %v1223_v58 = vmax.f32 %v1196_v18, 0.0  ;;  %6636 = vperm.xlu1 %9051, %v6626_v51   ;;  %5201 = vperm.xlu0 %9050, %v5123_v2   ;;  %v2105_v46 = vrot.slane %v2103_v15, 3  ;;  %v1556_v31 = vrot.slane %v9819_v5, 1 }
 0x105   : > { %8973 = vst [vmem:[#allocation2 + $0x88] sm:$0xff] %v8906_v48   ;;  %v563_v33 = vmax.f32 %v533_v6, 0.0  ;;  %v900_v44 = vmax.f32 %v870_v9, 0.0  ;;  %v2047_v17 = vor.u32 %v2046_v12, %v2042_v40  ;;  %v1279_v12 = vpop.permute.xlu2 %1278  ;;  %v6632_v40 = vld [vmem:[%s12655_s6 + $0x130] sm:$0xff] }
 0x106   : > { %8972 = vst [vmem:[#allocation2 + $0x80] sm:$0xff] %v8901_v54   ;;  %v1274_v1 = vpop.permute.xlu1 %1273  ;;  %v1269_v29 = vpop.permute.xlu0 %1268 }
 0x107   : > { %v1321_v7 = vmul.f32 %v1274_v1, %v1223_v58  ;;  %v1320_v30 = vmul.f32 %v1269_v29, %v1222_v57  ;;  %v675_v2 = vmul.f32 %v9541_v50, %v563_v33  ;;  %v1012_v63 = vmul.f32 %v9675_v60, %v900_v44  ;;  %v6633_v50 = vld [vmem:[%s12655_s6 + $0x138] sm:$0xff] }
 0x109   : > { %v1198_v38 = vpop.f32.mrf.mxu2  ;;  %v8911_v19 = vpack.c.bf16 %v1321_v7, %v1320_v30 }
 0x10a   : > { %v534_v20 = vpop.f32.mrf.mxu0  ;;  %v9832_v25 = vld [vmem:[#allocation2 + $0x10] sm:$0xff]  ;;  %v871_v41 = vpop.f32.mrf.mxu1  ;;  %v1199_v52 = vadd.f32 %v9649_v32, %v1198_v38 }
 0x10b   : > { %v535_v39 = vadd.f32 %v9649_v32, %v534_v20  ;;  %8974 = vst [vmem:[#allocation2 + $0x90] sm:$0xff] %v8911_v19   ;;  %v872_v23 = vadd.f32 %v9649_v32, %v871_v41  ;;  %1953 = vmatmul.bf16.gmra.mxu0 %v9832_v25  ;;  %v9842_v48 = vrot.slane %v9832_v25, 1  ;;  %v1444_v24 = vshll.u32 %v9832_v25, 16 }
 0x10c   : > { %6656 = vperm.xlu1 %9051, %v6630_v0   ;;  %6641 = vperm.xlu0 %9050, %v6627_v4   ;;  %v1448_v51 = vshrl.u32 %v9832_v25, 16 }
 0x10d   : > { %v564_v10 = vmax.f32 %v535_v39, 0.0  ;;  %v901_v54 = vmax.f32 %v872_v23, 0.0  ;;  %v1612_v18 = vsel %vm1555_vm0, %v1607_v14, %v9842_v48  ;;  %v1446_v45 = vrot.slane %v1444_v24, 1  ;;  %v8583_v23 = vld [vmem:[%s12653_s4 + $0x120] sm:$0xff] }
 0x10e   : > { %1754 = vmatmul.bf16.gmra.mxu3 %v1612_v18  ;;  %v2107_v57 = vrot.slane %v1448_v51, 2  ;;  %v2108_v58 = vrot.slane %v1444_v24, 3  ;;  %v2106_v14 = vor.u32 %v2105_v46, %v2102_v43  ;;  %v1284_v15 = vpop.permute.xlu0 %1283  ;;  %v1558_v44 = vsel %vm1555_vm0, %v1556_v31, %v9842_v48  ;;  %v1289_v31 = vpop.permute.xlu1 %1288 }
 0x10f   : > { %v676_v55 = vmul.f32 %v9534_v47, %v564_v10  ;;  %v1013_v1 = vmul.f32 %v9654_v35, %v901_v54  ;;  %v1447_v6 = vsel %vm1427_vm1, %v1442_v26, %v1446_v45  ;;  %v2048_v7 = vsel %vm1427_vm1, %v2047_v17, %v1446_v45  ;;  %v6629_v35 = vld [vmem:[%s12655_s6 + $0x118] sm:$0xff]  ;;  %2334 = vmatpush.bf16.msrb.mxu3 %v8583_v23 }
 0x110   : > { %1997 = vmatmul.bf16.gmra.mxu1 %v1447_v6  ;;  %v1224_v47 = vmax.f32 %v1199_v52, 0.0  ;;  %v9864_v60 = vor.u32 %v2108_v58, %v2107_v57  ;;  %v2112_v33 = vshrl.u32 %v2048_v7, 16  ;;  %v2115_v10 = vshll.u32 %v2048_v7, 16 }
 0x111   : > { %v8836_v29 = vpack.c.bf16 %v676_v55, %v675_v2  ;;  %v1200_v3 = vpop.f32.mrf.mxu2  ;;  %v8876_v37 = vpack.c.bf16 %v1013_v1, %v1012_v63  ;;  %v1450_v46 = vor.u32 %v1448_v51, %v1446_v45  ;;  %v1609_v58 = vrot.slane %v1558_v44, 1 }
 0x112   : > { %v1201_v9 = vadd.f32 %v9649_v32, %v1200_v3  ;;  %v537_v30 = vpop.f32.mrf.mxu0  ;;  %v874_v42 = vpop.f32.mrf.mxu1  ;;  %v9868_v0 = vsel %vm2098_vm2, %v2106_v14, %v9864_v60  ;;  %v1322_v19 = vmul.f32 %v1279_v12, %v1224_v47  ;;  %v2114_v55 = vrot.slane %v2112_v33, 2 }
 0x113   : > { %8959 = vst [vmem:[#allocation2 + $0x18] sm:$0xff] %v8836_v29   ;;  %v538_v4 = vadd.f32 %v9649_v32, %v537_v30  ;;  %v875_v26 = vadd.f32 %v9649_v32, %v874_v42  ;;  %v2117_v29 = vrot.slane %v2115_v10, 3 }
 0x114   : > { %8967 = vst [vmem:[#allocation2 + $0x58] sm:$0xff] %v8876_v37   ;;  %v1225_v38 = vmax.f32 %v1201_v9, 0.0  ;;  %6671 = vperm.xlu1 %9051, %v6633_v50   ;;  %6651 = vperm.xlu0 %9050, %v6629_v35  }
 0x115   : > { %v565_v24 = vmax.f32 %v538_v4, 0.0  ;;  %v902_v52 = vmax.f32 %v875_v26, 0.0  ;;  %v1294_v26 = vpop.permute.xlu2 %1293 }
 0x116   : > { %v1323_v20 = vmul.f32 %v1284_v15, %v1225_v38 }
 0x117   : > { %v677_v7 = vmul.f32 %v9486_v27, %v565_v24  ;;  %v1014_v14 = vmul.f32 %v9708_v16, %v902_v52 }
 0x118   : > { %v8916_v25 = vpack.c.bf16 %v1323_v20, %v1322_v19 }
 0x119   : > { %v1203_v39 = vpop.f32.mrf.mxu2 }
 0x11a   : > { %8975 = vst [vmem:[#allocation2 + $0x98] sm:$0xff] %v8916_v25   ;;  %v539_v41 = vpop.f32.mrf.mxu0  ;;  %v9876_v43 = vld [vmem:[#allocation2 + $0x18] sm:$0xff]  ;;  %v876_v17 = vpop.f32.mrf.mxu1  ;;  %v1204_v1 = vadd.f32 %v9649_v32, %v1203_v39  ;;  %v2118_v39 = vor.u32 %v2117_v29, %v2114_v55 }
 0x11b   : > { %v540_v5 = vadd.f32 %v9649_v32, %v539_v41  ;;  %v877_v54 = vadd.f32 %v9649_v32, %v876_v17  ;;  %1958 = vmatmul.bf16.gmra.mxu0 %v9876_v43  ;;  %v1559_v18 = vrot.slane %v9876_v43, 1  ;;  %v1452_v2 = vshll.u32 %v9876_v43, 16 }
 0x11c   : > { %6666 = vperm.xlu0 %9050, %v6632_v40   ;;  %v1456_v63 = vshrl.u32 %v9876_v43, 16 }
 0x11d   : > { %v566_v57 = vmax.f32 %v540_v5, 0.0  ;;  %v903_v6 = vmax.f32 %v877_v54, 0.0  ;;  %v9894_v51 = vsel %vm1555_vm0, %v9842_v48, %v1559_v18  ;;  %v1454_v45 = vrot.slane %v1452_v2, 1  ;;  %v8582_v54 = vld [vmem:[%s12653_s4 + $0x118] sm:$0xff] }
 0x11e   : > { %v1610_v50 = vrot.slane %v9894_v51, 1  ;;  %1759 = vmatmul.bf16.gmra.mxu3 %v9894_v51  ;;  %v2128_v9 = vrot.slane %v1456_v63, 2  ;;  %v2129_v16 = vrot.slane %v1452_v2, 3 }
 0x11f   : > { %v678_v3 = vmul.f32 %v9572_v61, %v566_v57  ;;  %v1015_v47 = vmul.f32 %v9702_v13, %v903_v6  ;;  %v1455_v37 = vsel %vm1427_vm1, %v1450_v46, %v1454_v45  ;;  %v1226_v61 = vmax.f32 %v1204_v1, 0.0  ;;  %2335 = vmatpush.bf16.msrb.mxu3 %v8582_v54 }
 0x120   : > { %2002 = vmatmul.bf16.gmra.mxu1 %v1455_v37  ;;  %v2120_v35 = vshrl.u32 %v1455_v37, 16  ;;  %v2123_v42 = vshll.u32 %v1455_v37, 16  ;;  %v1611_v27 = vsel %vm1555_vm0, %v1609_v58, %v1610_v50  ;;  %v9907_v25 = vor.u32 %v2129_v16, %v2128_v9 }
 0x121   : > { %v8841_v30 = vpack.c.bf16 %v678_v3, %v677_v7  ;;  %v1205_v48 = vpop.f32.mrf.mxu2  ;;  %v8881_v38 = vpack.c.bf16 %v1015_v47, %v1014_v14  ;;  %1798 = vmatmul.bf16.vlgmr.msrb.gmra.mxu2 %v1611_v27  ;;  %v1324_v41 = vmul.f32 %v1289_v31, %v1226_v61  ;;  %v1458_v29 = vor.u32 %v1456_v63, %v1454_v45  ;;  %v8609_v14 = vld [vmem:[%s12653_s4 + $0x1b8] sm:$0xff]  ;;  %v1304_v31 = vpop.permute.xlu1 %1303 }
 0x122   : > { %v1206_v12 = vadd.f32 %v9649_v32, %v1205_v48  ;;  %v542_v15 = vpop.f32.mrf.mxu0  ;;  %v879_v13 = vpop.f32.mrf.mxu1  ;;  %v2122_v19 = vrot.slane %v2120_v35, 2  ;;  %v2125_v20 = vrot.slane %v2123_v42, 3  ;;  %v9914_v44 = vsel %vm2098_vm2, %v9864_v60, %v9907_v25  ;;  %2718 = vmatpush.bf16.msra.mxu0 %v8609_v14 }
 0x123   : > { %8960 = vst [vmem:[#allocation2 + $0x20] sm:$0xff] %v8841_v30   ;;  %v543_v23 = vadd.f32 %v9649_v32, %v542_v15  ;;  %v880_v5 = vadd.f32 %v9649_v32, %v879_v13 }
 0x124   : > { %8968 = vst [vmem:[#allocation2 + $0x60] sm:$0xff] %v8881_v38   ;;  %v1227_v4 = vmax.f32 %v1206_v12, 0.0  ;;  %v9909_v33 = vor.u32 %v2125_v20, %v2122_v19 }
 0x125   : > { %v567_v60 = vmax.f32 %v543_v23, 0.0  ;;  %v904_v57 = vmax.f32 %v880_v5, 0.0 }
 0x126   : > { %v1325_v40 = vmul.f32 %v1294_v26, %v1227_v4  ;;  %v9919_v24 = vsel %vm2098_vm2, %v2118_v39, %v9909_v33  ;;  %v1299_v39 = vpop.permute.xlu0 %1298 }
 0x127   : > { %v679_v48 = vmul.f32 %v9567_v59, %v567_v60  ;;  %v1016_v42 = vmul.f32 %v9677_v62, %v904_v57  ;;  %v8608_v62 = vld [vmem:[%s12653_s4 + $0x1b0] sm:$0xff] }
 0x128   : > { %v8921_v10 = vpack.c.bf16 %v1325_v40, %v1324_v41  ;;  %2719 = vmatpush.bf16.msra.mxu0 %v8608_v62  ;;  %v8607_v41 = vld [vmem:[%s12653_s4 + $0x1a8] sm:$0xff] }
 0x129   : > { %v1208_v17 = vpop.f32.mrf.mxu2 }
 0x12a   : > { %8976 = vst [vmem:[#allocation2 + $0xa0] sm:$0xff] %v8921_v10   ;;  %v544_v46 = vpop.f32.mrf.mxu0  ;;  %v9922_v52 = vld [vmem:[#allocation2 + $0x20] sm:$0xff]  ;;  %v881_v55 = vpop.f32.mrf.mxu1  ;;  %v1209_v47 = vadd.f32 %v9649_v32, %v1208_v17 }
 0x12b   : > { %v545_v2 = vadd.f32 %v9649_v32, %v544_v46  ;;  %v882_v58 = vadd.f32 %v9649_v32, %v881_v55  ;;  %1963 = vmatmul.bf16.gmra.mxu0 %v9922_v52  ;;  %v1561_v1 = vrot.slane %v9922_v52, 1  ;;  %v1460_v6 = vshll.u32 %v9922_v52, 16  ;;  %v8606_v46 = vld [vmem:[%s12653_s4 + $0x1a0] sm:$0xff] }
 0x12c   : > { %v1464_v3 = vshrl.u32 %v9922_v52, 16  ;;  %v1228_v15 = vmax.f32 %v1209_v47, 0.0  ;;  %2720 = vmatpush.bf16.msra.mxu0 %v8607_v41  ;;  %v8603_v41 = vld [vmem:[%s12653_s4 + $0x188] sm:$0xff] }
 0x12d   : > { %v568_v7 = vmax.f32 %v545_v2, 0.0  ;;  %v905_v37 = vmax.f32 %v882_v58, 0.0  ;;  %v9942_v9 = vsel %vm1555_vm0, %v1559_v18, %v1561_v1  ;;  %v1462_v30 = vrot.slane %v1460_v6, 1 }
 0x12e   : > { %v1613_v45 = vrot.slane %v9942_v9, 1  ;;  %1764 = vmatmul.bf16.gmra.mxu3 %v9942_v9  ;;  %v2141_v35 = vrot.slane %v1464_v3, 2  ;;  %v2142_v27 = vrot.slane %v1460_v6, 3  ;;  %v1326_v10 = vmul.f32 %v1299_v39, %v1228_v15  ;;  %v1314_v39 = vpop.permute.xlu0 %1313 }
 0x12f   : > { %v680_v63 = vmul.f32 %v9510_v36, %v568_v7  ;;  %v1017_v43 = vmul.f32 %v9735_v56, %v905_v37  ;;  %v1463_v18 = vsel %vm1427_vm1, %v1458_v29, %v1462_v30 }
 0x130   : > { %2007 = vmatmul.bf16.gmra.mxu1 %v1463_v18  ;;  %v2133_v59 = vshrl.u32 %v1463_v18, 16  ;;  %v2136_v36 = vshll.u32 %v1463_v18, 16  ;;  %v1614_v12 = vsel %vm1555_vm0, %v1610_v50, %v1613_v45  ;;  %v9962_v26 = vor.u32 %v2142_v27, %v2141_v35  ;;  %v8581_v50 = vld [vmem:[%s12653_s4 + $0x110] sm:$0xff]  ;;  %2721 = vmatpush.bf16.msra.mxu0 %v8606_v46  ;;  %v8605_v35 = vld [vmem:[%s12653_s4 + $0x198] sm:$0xff] }
 0x131   : > { %v8846_v61 = vpack.c.bf16 %v680_v63, %v679_v48  ;;  %v1210_v38 = vpop.f32.mrf.mxu2  ;;  %v8886_v56 = vpack.c.bf16 %v1017_v43, %v1016_v42  ;;  %1803 = vmatmul.bf16.gmra.mxu2 %v1614_v12  ;;  %2336 = vmatpush.bf16.msrb.mxu3 %v8581_v50  ;;  %v1466_v48 = vor.u32 %v1464_v3, %v1462_v30 }
 0x132   : > { %v1211_v16 = vadd.f32 %v9649_v32, %v1210_v38  ;;  %v547_v13 = vpop.f32.mrf.mxu0  ;;  %v884_v19 = vpop.f32.mrf.mxu1  ;;  %v2135_v20 = vrot.slane %v2133_v59, 2  ;;  %v2138_v4 = vrot.slane %v2136_v36, 3  ;;  %v9973_v40 = vsel %vm2098_vm2, %v9907_v25, %v9962_v26  ;;  %v8580_v38 = vld [vmem:[%s12653_s4 + $0x108] sm:$0xff] }
 0x133   : > { %8961 = vst [vmem:[#allocation2 + $0x28] sm:$0xff] %v8846_v61   ;;  %v548_v17 = vadd.f32 %v9649_v32, %v547_v13  ;;  %v885_v25 = vadd.f32 %v9649_v32, %v884_v19 }
 0x134   : > { %8969 = vst [vmem:[#allocation2 + $0x68] sm:$0xff] %v8886_v56   ;;  %v1229_v51 = vmax.f32 %v1211_v16, 0.0  ;;  %v9975_v23 = vor.u32 %v2138_v4, %v2135_v20  ;;  %2722 = vmatpush.bf16.msra.mxu0 %v8605_v35  ;;  %v8617_v20 = vld [vmem:[%s12653_s4 + $0x1f8] sm:$0xff] }
 0x135   : > { %v569_v58 = vmax.f32 %v548_v17, 0.0  ;;  %v906_v29 = vmax.f32 %v885_v25, 0.0  ;;  %2337 = vmatpush.bf16.msrb.mxu3 %v8580_v38  ;;  %2767 = vmatpush.bf16.msra.mxu1 %v8617_v20 }
 0x136   : > { %v1327_v5 = vmul.f32 %v1304_v31, %v1229_v51  ;;  %v9984_v54 = vsel %vm2098_vm2, %v9909_v33, %v9975_v23  ;;  %v1309_v31 = vpop.permute.xlu2 %1308 }
 0x137   : > { %v681_v3 = vmul.f32 %v9604_v11, %v569_v58 }
 0x138   : > { %v8926_v60 = vpack.c.bf16 %v1327_v5, %v1326_v10 }
 0x139   : > { %v1213_v2 = vpop.f32.mrf.mxu2 }
 0x13a   : > { %8977 = vst [vmem:[#allocation2 + $0xa8] sm:$0xff] %v8926_v60   ;;  %v549_v55 = vpop.f32.mrf.mxu0  ;;  %v9987_v57 = vld [vmem:[#allocation2 + $0x28] sm:$0xff]  ;;  %v886_v7 = vpop.f32.mrf.mxu1  ;;  %v1214_v42 = vadd.f32 %v9649_v32, %v1213_v2  ;;  %v8616_v60 = vld [vmem:[%s12653_s4 + $0x1f0] sm:$0xff] }
 0x13b   : > { %v550_v6 = vadd.f32 %v9649_v32, %v549_v55  ;;  %v887_v14 = vadd.f32 %v9649_v32, %v886_v7  ;;  %1968 = vmatmul.bf16.gmra.mxu0 %v9987_v57  ;;  %v1563_v33 = vrot.slane %v9987_v57, 1  ;;  %v1468_v47 = vshll.u32 %v9987_v57, 16  ;;  %v8602_v55 = vld [vmem:[%s12653_s4 + $0x180] sm:$0xff]  ;;  %2768 = vmatpush.bf16.msra.mxu1 %v8616_v60 }
 0x13c   : > { %v1472_v63 = vshrl.u32 %v9987_v57, 16  ;;  %v8579_v57 = vld [vmem:[%s12653_s4 + $0x100] sm:$0xff] }
 0x13d   : > { %v570_v37 = vmax.f32 %v550_v6, 0.0  ;;  %v907_v43 = vmax.f32 %v887_v14, 0.0  ;;  %v10006_v18 = vsel %vm1555_vm0, %v1561_v1, %v1563_v33  ;;  %v10008_v27 = vrot.slane %v1468_v47, 1  ;;  %v8615_v6 = vld [vmem:[%s12653_s4 + $0x1e8] sm:$0xff]  ;;  %2338 = vmatpush.bf16.msrb.mxu3 %v8579_v57 }
 0x13e   : > { %v1615_v61 = vrot.slane %v10006_v18, 1  ;;  %1769 = vmatmul.bf16.gmra.mxu3 %v10006_v18  ;;  %v2154_v52 = vrot.slane %v1472_v63, 2  ;;  %v1018_v1 = vmul.f32 %v9731_v53, %v906_v29  ;;  %v1230_v53 = vmax.f32 %v1214_v42, 0.0  ;;  %v2033_v14 = vld [vmem:[#allocation2 + $0x48] sm:$0x7] }
 0x13f   : > { %v682_v30 = vmul.f32 %v9599_v8, %v570_v37  ;;  %v1019_v59 = vmul.f32 %v9714_v21, %v907_v43  ;;  %v1471_v11 = vsel %vm1427_vm1, %v1466_v48, %v10008_v27  ;;  %v2155_v8 = vrot.slane %v1468_v47, 3  ;;  %v8604_v21 = vld [vmem:[%s12653_s4 + $0x190] sm:$0xff]  ;;  %2769 = vmatpush.bf16.msra.mxu1 %v8615_v6 }
 0x140   : > { %2012 = vmatmul.bf16.gmra.mxu1 %v1471_v11  ;;  %v2146_v62 = vshrl.u32 %v1471_v11, 16  ;;  %v2149_v15 = vshll.u32 %v1471_v11, 16  ;;  %v1616_v56 = vsel %vm1555_vm0, %v1613_v45, %v1615_v61  ;;  %2723 = vmatpush.bf16.msra.mxu0 %v8604_v21  ;;  %v1328_v17 = vmul.f32 %v1309_v31, %v1230_v53  ;;  %v8614_v11 = vld [vmem:[%s12653_s4 + $0x1e0] sm:$0xff]  ;;  %v8611_v31 = vld [vmem:[%s12653_s4 + $0x1c8] sm:$0xff] }
 0x141   : > { %v8851_v36 = vpack.c.bf16 %v682_v30, %v681_v3  ;;  %v1215_v12 = vpop.f32.mrf.mxu2  ;;  %v8891_v16 = vpack.c.bf16 %v1019_v59, %v1018_v1  ;;  %1808 = vmatmul.bf16.gmra.mxu2 %v1616_v56  ;;  %v10035_v45 = vor.u32 %v2155_v8, %v2154_v52  ;;  %v1474_v38 = vor.u32 %v1472_v63, %v10008_v27  ;;  %v10097_v53 = vld [vmem:[#allocation2 + $0x40] sm:$0xff] }
 0x142   : > { %v1216_v13 = vadd.f32 %v9649_v32, %v1215_v12  ;;  %v552_v19 = vpop.f32.mrf.mxu0  ;;  %v889_v4 = vpop.f32.mrf.mxu1  ;;  %v2148_v9 = vrot.slane %v2146_v62, 2  ;;  %v2151_v51 = vrot.slane %v2149_v15, 3  ;;  %v2036_v52 = vunpack.c.l.b16 %v2033_v14  ;;  %v8610_v14 = vld [vmem:[%s12653_s4 + $0x1c0] sm:$0xff] }
 0x143   : > { %8962 = vst [vmem:[#allocation2 + $0x30] sm:$0xff] %v8851_v36   ;;  %v10043_v10 = vsel %vm2098_vm2, %v9962_v26, %v10035_v45  ;;  %v553_v25 = vadd.f32 %v9649_v32, %v552_v19  ;;  %v890_v2 = vadd.f32 %v9649_v32, %v889_v4  ;;  %2770 = vmatpush.bf16.msra.mxu1 %v8614_v11  ;;  %v2050_v4 = vshll.u32 %v10097_v53, 16  ;;  %v10152_v11 = vld [vmem:[#allocation2 + $0x14] sm:$0xf0] }
 0x144   : > { %8970 = vst [vmem:[#allocation2 + $0x70] sm:$0xff] %v8891_v16   ;;  %v1231_v50 = vmax.f32 %v1216_v13, 0.0  ;;  %v10045_v5 = vor.u32 %v2151_v51, %v2148_v9  ;;  %2724 = vmatpush.bf16.msra.mxu0 %v8603_v41  ;;  %v10102_v20 = vpack.c.b16 %v2036_v52, %v2036_v52  ;;  %v8612_v9 = vld [vmem:[%s12653_s4 + $0x1d0] sm:$0xff] }
 0x145   : > { %v571_v47 = vmax.f32 %v553_v25, 0.0  ;;  %v908_v37 = vmax.f32 %v890_v2, 0.0  ;;  %v8594_v2 = vld [vmem:[%s12653_s4 + $0x178] sm:$0xff] }
 0x146   : > { %v1329_v46 = vmul.f32 %v1314_v39, %v1231_v50  ;;  %v10058_v26 = vsel %vm2098_vm2, %v9975_v23, %v10045_v5  ;;  %v12667_v50 = vshll.u32 %v10102_v20, 16  ;;  %v2054_v39 = vshrl.u32 %v10097_v53, 16  ;;  %2380 = vmatpush.bf16.msra.mxu2 %v8594_v2 }
 0x147   : > { %v683_v36 = vmul.f32 %v9539_v49, %v571_v47  ;;  %v1020_v63 = vmul.f32 %v9773_v34, %v908_v37  ;;  %v8625_v37 = vld [vmem:[%s12653_s4 + $0x238] sm:$0xff] }
 0x148   : > { %v8931_v58 = vpack.c.bf16 %v1329_v46, %v1328_v17  ;;  %2725 = vmatpush.bf16.msra.mxu0 %v8602_v55  ;;  %v1375_v17 = vld [vmem:[#allocation2 + $0x40] sm:$0x1]  ;;  %v10123_v46 = vrot.slane %v12667_v50, 1  ;;  %2990 = vmatpush.bf16.msra.mxu3 %v8625_v37  ;;  %v8664_v50 = vld [vmem:[%s12653_s4 + $0xb8] sm:$0xff] }
 0x14a   : > { %8978 = vst [vmem:[#allocation2 + $0xb0] sm:$0xff] %v8931_v58   ;;  %v554_v7 = vpop.f32.mrf.mxu0  ;;  %v10063_v29 = vld [vmem:[#allocation2 + $0x30] sm:$0xff]  ;;  %v891_v35 = vpop.f32.mrf.mxu1 }
 0x14b   : > { %v555_v48 = vadd.f32 %v9649_v32, %v554_v7  ;;  %v892_v23 = vadd.f32 %v9649_v32, %v891_v35  ;;  %1973 = vmatmul.bf16.gmra.mxu0 %v10063_v29  ;;  %v1565_v42 = vrot.slane %v10063_v29, 1  ;;  %v1476_v43 = vshll.u32 %v10063_v29, 16 }
 0x14c   : > { %v1480_v3 = vshrl.u32 %v10063_v29, 16  ;;  %v1425_v29 = vunpack.c.l.b16 %v1375_v17  ;;  %v2194_v35 = vrot.slane %v2050_v4, 3  ;;  %3717 = vmatpush.bf16.msrb.mxu0 %v8664_v50 }
 0x14d   : > { %v572_v30 = vmax.f32 %v555_v48, 0.0  ;;  %v909_v1 = vmax.f32 %v892_v23, 0.0  ;;  %v10077_v32 = vsel %vm1555_vm0, %v1563_v33, %v1565_v42  ;;  %v1478_v59 = vrot.slane %v1476_v43, 1 }
 0x14e   : > { %v2167_v8 = vrot.slane %v1480_v3, 2  ;;  %v1617_v62 = vrot.slane %v10077_v32, 1  ;;  %1774 = vmatmul.bf16.gmra.mxu3 %v10077_v32  ;;  %v2168_v33 = vrot.slane %v1476_v43, 3  ;;  %v2193_v48 = vrot.slane %v2054_v39, 2 }
 0x14f   : > { %v684_v12 = vmul.f32 %v9629_v22, %v572_v30  ;;  %v1021_v27 = vmul.f32 %v9769_v28, %v909_v1  ;;  %v1479_v15 = vsel %vm1427_vm1, %v1474_v38, %v1478_v59  ;;  %v8613_v28 = vld [vmem:[%s12653_s4 + $0x1d8] sm:$0xff]  ;;  %v1482_v6 = vor.u32 %v1480_v3, %v1478_v59 }
 0x150   : > { %2017 = vmatmul.bf16.gmra.mxu1 %v1479_v15  ;;  %v2159_v49 = vshrl.u32 %v1479_v15, 16  ;;  %v2162_v22 = vshll.u32 %v1479_v15, 16  ;;  %v1618_v21 = vsel %vm1555_vm0, %v1615_v61, %v1617_v62  ;;  %v2169_v34 = vor.u32 %v2168_v33, %v2167_v8  ;;  %v10150_v59 = vld [vmem:[#allocation2 + $0x14] sm:$0xff]  }
 0x151   : > { %v8856_v56 = vpack.c.bf16 %v684_v12, %v683_v36  ;;  %v8896_v16 = vpack.c.bf16 %v1021_v27, %v1020_v63  ;;  %1813 = vmatmul.bf16.gmra.mxu2 %v1618_v21  ;;  %2771 = vmatpush.bf16.msra.mxu1 %v8613_v28  ;;  %v10156_v27 = vor.u32 %v2194_v35, %v2193_v48 }
 0x152   : > { %v2161_v13 = vrot.slane %v2159_v49, 2  ;;  %v2164_v19 = vrot.slane %v2162_v22, 3  ;;  %v10106_v18 = vsel %vm2098_vm2, %v10035_v45, %v2169_v34  ;;  %v2052_v45 = vrot.slane %v2050_v4, 1 }
 0x153   : > { %8963 = vst [vmem:[#allocation2 + $0x38] sm:$0xff] %v8856_v56   ;;  %v1426_v15 = vpack.c.b16 %v1425_v29, %v1425_v29  ;;  %v1569_v4 = vrot.slane %v10097_v53, 1  ;;  %v8591_v29 = vld [vmem:[%s12653_s4 + $0x160] sm:$0xff] }
 0x154   : > { %8971 = vst [vmem:[#allocation2 + $0x78] sm:$0xff] %v8896_v16   ;;  %v2165_v61 = vor.u32 %v2164_v19, %v2161_v13  ;;  %v2056_v55 = vor.u32 %v2054_v39, %v2052_v45  ;;  %v8593_v13 = vld [vmem:[%s12653_s4 + $0x170] sm:$0xff] }
 0x155   : > { %2772 = vmatpush.bf16.msra.mxu1 %v8612_v9  ;;  %2381 = vmatpush.bf16.msra.mxu2 %v8593_v13  ;;  %v10238_v13 = vld [vmem:[#allocation2 + $0x90] sm:$0xff] }
 0x156   : > { %v10114_v51 = vsel %vm2098_vm2, %v10045_v5, %v2165_v61  ;;  %v2061_v23 = vsel %vm1427_vm1, %v2056_v55, %v10123_v46  ;;  %v1540_v55 = vld [vmem:[#allocation2 + $0x48] sm:$0x3]  ;;  %12706 = vst [vmem:[#allocation11_spill] sm:$0xff] %v10238_v13 }
 0x157   : > { %v2198_v8 = vshrl.u32 %v2061_v23, 16  ;;  %v2201_v36 = vshll.u32 %v2061_v23, 16  ;;  %v1551_v48 = vunpack.c.l.b16 %v1540_v55  ;;  %v10205_v23 = vld [vmem:[#allocation2 + $0x1c] sm:$0xff] }
 0x159   : > { %2773 = vmatpush.bf16.msra.mxu1 %v8611_v31  ;;  %v2200_v16 = vrot.slane %v2198_v8, 2  ;;  %v2203_v28 = vrot.slane %v2201_v36, 3  ;;  %v1492_v31 = vshll.u32 %v1426_v15, 16  ;;  %v2514_v8 = vshrl.u32 %v10150_v59, 16 }
 0x15a   : > { %v8545_v41 = vld [vmem:[#allocation2 + $0x38] sm:$0xff] }
 0x15b   : > { %1978 = vmatmul.bf16.gmra.mxu0 %v8545_v41  ;;  %v10125_v60 = vrot.slane %v8545_v41, 1  ;;  %v1484_v5 = vshll.u32 %v8545_v41, 16  ;;  %v1488_v25 = vshrl.u32 %v8545_v41, 16  ;;  %v10178_v17 = vor.u32 %v2203_v28, %v2200_v16  ;;  %v5800_v16 = vld [vmem:[#allocation2 + $0x88] sm:$0x8]  ;;  %v10378_v50 = vld [vmem:[#allocation2 + $0x3c] sm:$0xff] }
 0x15d   : > { %v10132_v58 = vsel %vm1555_vm0, %v1565_v42, %v10125_v60  ;;  %v1486_v7 = vrot.slane %v1484_v5, 1  ;;  %2774 = vmatpush.bf16.msra.mxu1 %v8610_v14  ;;  %v2180_v3 = vrot.slane %v1488_v25, 2  ;;  %v2181_v30 = vrot.slane %v1484_v5, 3  ;;  %v8624_v14 = vld [vmem:[%s12653_s4 + $0x230] sm:$0xff] }
 0x15e   : > { %v1619_v47 = vrot.slane %v10132_v58, 1  ;;  %1779 = vmatmul.bf16.gmra.mxu3 %v10132_v58  ;;  %v1570_v39 = vsel %vm1555_vm0, %v10125_v60, %v1569_v4 }
 0x15f   : > { %v1487_v42 = vsel %vm1427_vm1, %v1482_v6, %v1486_v7  ;;  %v1490_v43 = vor.u32 %v1488_v25, %v1486_v7  ;;  %v2182_v63 = vor.u32 %v2181_v30, %v2180_v3  ;;  %v1621_v2 = vrot.slane %v1570_v39, 1  ;;  %2991 = vmatpush.bf16.msra.mxu3 %v8624_v14 }
 0x160   : > { %2022 = vmatmul.bf16.gmra.mxu1 %v1487_v42  ;;  %v2172_v38 = vshrl.u32 %v1487_v42, 16  ;;  %v2175_v52 = vshll.u32 %v1487_v42, 16  ;;  %v1620_v1 = vsel %vm1555_vm0, %v1617_v62, %v1619_v47  ;;  %v10154_v33 = vpop.f32.mrf.mxu0  ;;  %v1494_v7 = vrot.slane %v1492_v31, 1 }
 0x161   : > { %1818 = vmatmul.bf16.gmra.mxu2 %v1620_v1  ;;  %v2053_v32 = vsel %vm1427_vm1, %v1490_v43, %v2052_v45  ;;  %v10160_v62 = vsel %vm2098_vm2, %v2169_v34, %v2182_v63  ;;  %v10164_v56 = vsel %vm2098_vm2, %v2182_v63, %v10156_v27  ;;  %v8592_v45 = vld [vmem:[%s12653_s4 + $0x168] sm:$0xff]  ;;  %v1622_v35 = vsel %vm1555_vm0, %v1619_v47, %v1621_v2 }
 0x162   : > { %v2174_v12 = vrot.slane %v2172_v38, 2  ;;  %v2177_v57 = vrot.slane %v2175_v52, 3  ;;  %v2185_v22 = vshrl.u32 %v2053_v32, 16  ;;  %v2188_v21 = vshll.u32 %v2053_v32, 16  ;;  %2382 = vmatpush.bf16.msra.mxu2 %v8592_v45  ;;  %v8588_v52 = vld [vmem:[%s12653_s4 + $0x148] sm:$0xff] }
 0x163   : > { %v1495_v37 = vsel %vm1427_vm1, %v1490_v43, %v1494_v7  ;;  %v1554_v42 = vpack.c.b16 %v1551_v48, %v1551_v48  ;;  %v2516_v3 = vshll.u32 %v10150_v59, 16  ;;  %v8589_v43 = vld [vmem:[%s12653_s4 + $0x150] sm:$0xff]  ;;  %v2521_v47 = vshll.u32 %v10205_v23, 16  ;;  %v8623_v32 = vld [vmem:[%s12653_s4 + $0x228] sm:$0xff] }
 0x164   : > { %v2178_v49 = vor.u32 %v2177_v57, %v2174_v12  ;;  %v2187_v34 = vrot.slane %v2185_v22, 2  ;;  %v2190_v9 = vrot.slane %v2188_v21, 3  ;;  %v10232_v22 = vld [vmem:[#allocation2 + $0x88] sm:$0xff]   ;;  %2992 = vmatpush.bf16.msra.mxu3 %v8623_v32  ;;  %v12663_v31 = vshll.u32 %v10238_v13, 16 }
 0x165   : > { %v1571_v30 = vrot.slane %v1554_v42, 1  ;;  %v2518_v38 = vrot.slane %v2516_v3, 1  ;;  %v2523_v36 = vrot.slane %v2521_v47, 1  ;;  %12705 = vst [vmem:[#allocation10_spill] sm:$0xff] %v10232_v22  ;;  %v12664_v28 = vunpack.c.h.b16 %v10232_v22 }
 0x166   : > { %v10170_v19 = vsel %vm2098_vm2, %v2165_v61, %v2178_v49  ;;  %v2191_v41 = vor.u32 %v2190_v9, %v2187_v34  ;;  %v1625_v61 = vrot.slane %v1426_v15, 1  ;;  %2383 = vmatpush.bf16.msra.mxu2 %v8591_v29  ;;  %v8587_v15 = vld [vmem:[%s12653_s4 + $0x140] sm:$0xff]  ;;  %v5805_v34 = vunpack.c.l.b16 %v5800_v16 }
 0x167   : > { %v1572_v12 = vsel %vm1555_vm0, %v1569_v4, %v1571_v30  ;;  %v2519_v57 = vor.u32 %v2518_v38, %v2514_v8  ;;  %v10240_v4 = vld [vmem:[#allocation2 + $0x24] sm:$0xff]  ;;  %v10254_v55 = vrot.slane %v12663_v31, 1  ;;  %v2525_v29 = vshrl.u32 %v10205_v23, 16 }
 0x168   : > { %v10182_v5 = vsel %vm2098_vm2, %v2178_v49, %v2191_v41  ;;  %v10186_v53 = vsel %vm2098_vm2, %v2191_v41, %v10178_v17  ;;  %v10188_v25 = vpop.f32.mrf.mxu0  ;;  %v1626_v6 = vsel %vm1555_vm0, %v10125_v60, %v1625_v61  ;;  %v8590_v60 = vld [vmem:[%s12653_s4 + $0x158] sm:$0xff]  ;;  %v1623_v63 = vrot.slane %v1572_v12, 1 }
 0x169   : > { %v5806_v45 = vpack.c.b16 %v12664_v28, %v5805_v34  ;;  %v2529_v39 = vshll.u32 %v10240_v4, 16  ;;  %12707 = vst [vmem:[#allocation12_spill] sm:$0xff] %v10254_v55  ;;  %v2533_v34 = vshrl.u32 %v10240_v4, 16 }
 0x16a   : > { %2384 = vmatpush.bf16.msra.mxu2 %v8590_v60  ;;  %v2527_v60 = vor.u32 %v2525_v29, %v2523_v36 }
 0x16b   : > { %2726 = vmatmul.bf16.vlgmr.msra.gmra.mxu0 %v10150_v59  ;;  %v2524_v59 = vsel %vm1427_vm1, %v2519_v57, %v2523_v36  ;;  %v5810_v61 = vshll.u32 %v5806_v45, 16  ;;  %v2531_v14 = vrot.slane %v2529_v39, 1  ;;  %v3354_v36 = vld [vmem:[#allocation2 + $0x80] sm:$0x1] }
 0x16c   : > { %v3404_v32 = vunpack.c.l.b16 %v3354_v36  ;;  %v10323_v36 = vld [vmem:[#allocation2 + $0x34] sm:$0xff] }
 0x16d   : > { %v5812_v7 = vrot.slane %v5810_v61, 1  ;;  %v2532_v3 = vsel %vm1427_vm1, %v2527_v60, %v2531_v14  ;;  %v2535_v29 = vor.u32 %v2533_v34, %v2531_v14  ;;  %v8621_v60 = vld [vmem:[%s12653_s4 + $0x218] sm:$0xff] }
 0x16e   : > { %1784 = vmatmul.bf16.gmra.mxu3 %v1626_v6  ;;  %2385 = vmatpush.bf16.msra.mxu2 %v8589_v43  ;;  %v5808_v6 = vshrl.u32 %v5806_v45, 16  ;;  %v8622_v43 = vld [vmem:[%s12653_s4 + $0x220] sm:$0xff]  ;;  %v10293_v39 = vpack.c.b16 %v3404_v32, %v3404_v32 }
 0x16f   : > { %2993 = vmatpush.bf16.msra.mxu3 %v8622_v43 }
 0x170   : > { %2027 = vmatmul.bf16.gmra.mxu1 %v1495_v37  ;;  %v10211_v58 = vpop.f32.mrf.mxu0  ;;  %v1627_v37 = vrot.slane %v1571_v30, 1  ;;  %v5813_v48 = vor.u32 %v5812_v7, %v5808_v6  ;;  %12711 = vst [vmem:[#allocation16_spill] sm:$0xff] %v10293_v39 }
 0x171   : > { %1823 = vmatmul.bf16.gmra.mxu2 %v1622_v35 }
 0x172   : > { %2386 = vmatpush.bf16.msra.mxu2 %v8588_v52  ;;  %v10263_v42 = vsel %vm1427_vm1, %v5813_v48, %v10254_v55  ;;  %v1628_v30 = vsel %vm1555_vm0, %v1623_v63, %v1627_v37  ;;  %v10276_v52 = vld [vmem:[#allocation2 + $0xa0] sm:$0xff] }
 0x173   : > { %12708 = vst [vmem:[#allocation13_spill] sm:$0xff] %v10263_v42  ;;  %v12662_v16 = vshrl.u32 %v10276_v52, 16  ;;  %2994 = vmatpush.bf16.msra.mxu3 %v8621_v60  ;;  %v2545_v60 = vshll.u32 %v10323_v36, 16  ;;  %v5799_v42 = vld [vmem:[#allocation2 + $0xa8] sm:$0x7] }
 0x174   : > { %12709 = vst [vmem:[#allocation14_spill] sm:$0xff] %v10276_v52 }
 0x175   : > { %v10217_v1 = vpop.f32.mrf.mxu1 }
 0x176   : > { %2387 = vmatpush.bf16.msra.mxu2 %v8587_v15  ;;  %v10283_v15 = vld [vmem:[#allocation2 + $0x78] sm:$0xff] }
 0x177   : > { %12710 = vst [vmem:[#allocation15_spill] sm:$0xff] %v10283_v15  ;;  %v12665_v61 = vshll.u32 %v10283_v15, 16  ;;  %v12666_v43 = vshrl.u32 %v10283_v15, 16  ;;  %v10436_v15 = vld [vmem:[#allocation2 + $0x44] sm:$0xff] }
 0x178   : > { %v10234_v21 = vpop.f32.mrf.mxu0 }
 0x179   : > { %v10229_v49 = vpop.f32.mrf.mxu3  ;;  %v10305_v37 = vrot.slane %v12665_v61, 1 }
 0x17b   : > { %2731 = vmatmul.bf16.gmra.mxu0 %v10205_v23  ;;  %12712 = vst [vmem:[#allocation17_spill] sm:$0xff] %v10305_v37 }
 0x17d   : > { %v10242_v9 = vpop.f32.mrf.mxu1 }
 0x17e   : > { %2339 = vmatmul.bf16.vlgmr.msrb.gmra.mxu3 %v9868_v0  ;;  %v1624_v0 = vsel %vm1555_vm0, %v1621_v2, %v1623_v63  ;;  %v12661_v63 = vshll.u32 %v10276_v52, 16 }
 0x180   : > { %2775 = vmatmul.bf16.vlgmr.msra.gmra.mxu1 %v2524_v59 }
 0x181   : > { %1828 = vmatmul.bf16.gmra.mxu2 %v1624_v0  ;;  %v10250_v2 = vpop.f32.mrf.mxu3  ;;  %v5818_v0 = vrot.slane %v12661_v63, 1 }
 0x183   : > { %v10298_v6 = vor.u32 %v12662_v16, %v5818_v0 }
 0x188   : > { %v10248_v41 = vpop.f32.mrf.mxu0 }
 0x18b   : > { %2736 = vmatmul.bf16.gmra.mxu0 %v10240_v4 }
 0x18d   : > { %v10258_v35 = vpop.f32.mrf.mxu1 }
 0x18e   : > { %2344 = vmatmul.bf16.gmra.mxu3 %v9914_v44  ;;  %v10274_v44 = vld [vmem:[#allocation2 + $0x2c] sm:$0xff] }
 0x18f   : > { %v2537_v12 = vshll.u32 %v10274_v44, 16 }
 0x190   : > { %v10269_v47 = vpop.f32.mrf.mxu0  ;;  %2780 = vmatmul.bf16.gmra.mxu1 %v2532_v3 }
 0x191   : > { %v10272_v38 = vpop.f32.mrf.mxu3  ;;  %1833 = vmatmul.bf16.gmra.mxu2 %v1628_v30  ;;  %v2539_v45 = vrot.slane %v2537_v12, 1  ;;  %v3470_v30 = vshll.u32 %v10293_v39, 16  ;;  %v10325_v12 = vld [vmem:[#allocation2 + $0x98] sm:$0xff] }
 0x192   : > { %12714 = vst [vmem:[#allocation19_spill] sm:$0xff] %v10325_v12  ;;  %v12669_v16 = vshll.u32 %v10325_v12, 16 }
 0x193   : > { %v2540_v48 = vsel %vm1427_vm1, %v2535_v29, %v2539_v45  ;;  %v3472_v34 = vrot.slane %v3470_v30, 1  ;;  %v2547_v30 = vrot.slane %v2545_v60, 1 }
 0x195   : > { %v10278_v8 = vpop.f32.mrf.mxu1 }
 0x198   : > { %v10281_v57 = vpop.f32.mrf.mxu0 }
 0x199   : > { %v10286_v59 = vpop.f32.mrf.mxu3 }
 0x19b   : > { %2741 = vmatmul.bf16.gmra.mxu0 %v10274_v44 }
 0x19d   : > { %v10300_v7 = vpop.f32.mrf.mxu1 }
 0x19e   : > { %2349 = vmatmul.bf16.gmra.mxu3 %v9973_v40  ;;  %v10321_v40 = vor.u32 %v12666_v43, %v10305_v37  ;;  %v12670_v43 = vshrl.u32 %v10325_v12, 16 }
 0x1a0   : > { %v10311_v3 = vpop.f32.mrf.mxu0  ;;  %2785 = vmatmul.bf16.gmra.mxu1 %v2540_v48  ;;  %12713 = vst [vmem:[#allocation18_spill] sm:$0xff] %v10321_v40  ;;  %v10332_v63 = vsel %vm1427_vm1, %v10321_v40, %v3472_v34 }
 0x1a1   : > { %v10315_v14 = vpop.f32.mrf.mxu3  ;;  %2388 = vmatmul.bf16.vlgmr.msra.gmra.mxu2 %v9919_v24  ;;  %12715 = vst [vmem:[#allocation20_spill] sm:$0xff] %v10332_v63 }
 0x1a4   : > { %v1799_v32 = vpop.f32.mrf.mxu2 }
 0x1a5   : > { %v1800_v29 = vadd.f32 %v1799_v32, %v10229_v49  ;;  %v10328_v48 = vpop.f32.mrf.mxu1  ;;  %v2541_v49 = vshrl.u32 %v10274_v44, 16  ;;  %v10345_v32 = vrot.slane %v12669_v16, 1 }
 0x1a7   : > { %v1945_v24 = vadd.f32 %v10154_v33, %v1800_v29  ;;  %12716 = vst [vmem:[#allocation21_spill] sm:$0xff] %v10345_v32  ;;  %v2543_v61 = vor.u32 %v2541_v49, %v2539_v45  ;;  %v10363_v45 = vor.u32 %v12670_v43, %v10345_v32 }
 0x1a8   : > { %v10337_v31 = vpop.f32.mrf.mxu0 }
 0x1a9   : > { %v10339_v28 = vpop.f32.mrf.mxu3  ;;  %v2548_v16 = vsel %vm1427_vm1, %v2543_v61, %v2547_v30  ;;  %12717 = vst [vmem:[#allocation22_spill] sm:$0xff] %v10363_v45  ;;  %v5802_v61 = vunpack.c.l.b16 %v5799_v42  ;;  %v8662_v42 = vld [vmem:[%s12653_s4 + $0xa8] sm:$0xff] }
 0x1ab   : > { %2746 = vmatmul.bf16.gmra.mxu0 %v10323_v36  ;;  %v10383_v32 = vpack.c.b16 %v5802_v61, %v5802_v61 }
 0x1ac   : > { %v1801_v34 = vpop.f32.mrf.mxu2 }
 0x1ad   : > { %v1802_v33 = vadd.f32 %v1801_v34, %v10250_v2  ;;  %v10348_v29 = vpop.f32.mrf.mxu1  ;;  %v8620_v2 = vld [vmem:[%s12653_s4 + $0x210] sm:$0xff]  ;;  %v5819_v34 = vsel %vm1427_vm1, %v10363_v45, %v5818_v0  ;;  %12718 = vst [vmem:[#allocation23_spill] sm:$0xff] %v10383_v32 }
 0x1ae   : > { %2354 = vmatmul.bf16.gmra.mxu3 %v10043_v10  ;;  %v8663_v10 = vld [vmem:[%s12653_s4 + $0xb0] sm:$0xff]  ;;  %v5897_v55 = vshrl.u32 %v5819_v34, 16  ;;  %v5900_v13 = vshll.u32 %v5819_v34, 16  ;;  %v8672_v34 = vld [vmem:[%s12653_s4 + $0xf8] sm:$0xff] }
 0x1af   : > { %v1947_v60 = vadd.f32 %v10188_v25, %v1802_v33  ;;  %2995 = vmatpush.bf16.msra.mxu3 %v8620_v2  ;;  %3718 = vmatpush.bf16.msrb.mxu0 %v8663_v10  ;;  %v2553_v10 = vshll.u32 %v10378_v50, 16 }
 0x1b0   : > { %v10365_v49 = vpop.f32.mrf.mxu0  ;;  %2790 = vmatmul.bf16.gmra.mxu1 %v2548_v16  ;;  %v10381_v16 = vadd.f32 %v10217_v1, %v1945_v24  ;;  %v8661_v1 = vld [vmem:[%s12653_s4 + $0xa0] sm:$0xff]  ;;  %v12681_v24 = vshll.u32 %v10383_v32, 16 }
 0x1b1   : > { %v10370_v25 = vpop.f32.mrf.mxu3  ;;  %2393 = vmatmul.bf16.gmra.mxu2 %v9984_v54  ;;  %v2555_v45 = vrot.slane %v2553_v10, 1  ;;  %v10404_v12 = vadd.f32 %v10242_v9, %v1947_v60  ;;  %v8619_v9 = vld [vmem:[%s12653_s4 + $0x208] sm:$0xff]  ;;  %v12687_v60 = vshrl.u32 %v10383_v32, 16  ;;  %3766 = vmatpush.bf16.msrb.mxu1 %v8672_v34 }
 0x1b3   : > { %3719 = vmatpush.bf16.msrb.mxu0 %v8662_v42  ;;  %v5826_v42 = vrot.slane %v12681_v24, 1  ;;  %2996 = vmatpush.bf16.msra.mxu3 %v8619_v9 }
 0x1b4   : > { %v1804_v33 = vpop.f32.mrf.mxu2 }
 0x1b5   : > { %v1805_v43 = vadd.f32 %v1804_v33, %v10272_v38  ;;  %v10376_v52 = vpop.f32.mrf.mxu1  ;;  %v2549_v38 = vshrl.u32 %v10323_v36, 16  ;;  %v5827_v10 = vsel %vm1427_vm1, %v10298_v6, %v5826_v42 }
 0x1b7   : > { %v1950_v54 = vadd.f32 %v10211_v58, %v1805_v43  ;;  %v2551_v58 = vor.u32 %v2549_v38, %v2547_v30  ;;  %3720 = vmatpush.bf16.msrb.mxu0 %v8661_v1  ;;  %v5830_v1 = vor.u32 %v12687_v60, %v5826_v42 }
 0x1b8   : > { %v10389_v0 = vpop.f32.mrf.mxu0 }
 0x1b9   : > { %v10391_v2 = vpop.f32.mrf.mxu3  ;;  %v2556_v30 = vsel %vm1427_vm1, %v2551_v58, %v2555_v45  ;;  %v5899_v58 = vrot.slane %v5897_v55, 2  ;;  %v10439_v6 = vadd.f32 %v10258_v35, %v1950_v54 }
 0x1bb   : > { %2751 = vmatmul.bf16.gmra.mxu0 %v10378_v50 }
 0x1bc   : > { %v1806_v43 = vpop.f32.mrf.mxu2 }
 0x1bd   : > { %v1807_v61 = vadd.f32 %v1806_v43, %v10286_v59  ;;  %v10401_v33 = vpop.f32.mrf.mxu1  ;;  %v8660_v59 = vld [vmem:[%s12653_s4 + $0x98] sm:$0xff]  ;;  %v5902_v43 = vrot.slane %v5900_v13, 3 }
 0x1be   : > { %2359 = vmatmul.bf16.gmra.mxu3 %v10106_v18  ;;  %3721 = vmatpush.bf16.msrb.mxu0 %v8660_v59  ;;  %v5926_v59 = vshll.u32 %v5830_v1, 16 }
 0x1bf   : > { %v1952_v22 = vadd.f32 %v10234_v21, %v1807_v61  ;;  %v8659_v21 = vld [vmem:[%s12653_s4 + $0x90] sm:$0xff]  ;;  %v5910_v61 = vshrl.u32 %v5827_v10, 16  ;;  %v10441_v42 = vor.u32 %v5902_v43, %v5899_v58 }
 0x1c0   : > { %v10418_v38 = vpop.f32.mrf.mxu0  ;;  %2795 = vmatmul.bf16.gmra.mxu1 %v2556_v30  ;;  %v5923_v30 = vshrl.u32 %v5830_v1, 16  ;;  %v5928_v13 = vrot.slane %v5926_v59, 3 }
 0x1c1   : > { %v10420_v18 = vpop.f32.mrf.mxu3  ;;  %2398 = vmatmul.bf16.gmra.mxu2 %v10058_v26  ;;  %v5913_v26 = vshll.u32 %v5827_v10, 16  ;;  %v5912_v63 = vrot.slane %v5910_v61, 2  ;;  %12719 = vst [vmem:[#allocation24_spill] sm:$0xff] %v10441_v42  ;;  %v8658_v10 = vld [vmem:[%s12653_s4 + $0x88] sm:$0xff]  ;;  %v10474_v59 = vadd.f32 %v10278_v8, %v1952_v22 }
 0x1c2   : > { %3722 = vmatpush.bf16.msrb.mxu0 %v8659_v21  ;;  %v5925_v55 = vrot.slane %v5923_v30, 2  ;;  %v10493_v22 = vld [vmem:[#allocation2 + $0x4c] sm:$0xff] }
 0x1c3   : > { %v5915_v40 = vrot.slane %v5913_v26, 3 }
 0x1c4   : > { %v1809_v24 = vpop.f32.mrf.mxu2 }
 0x1c5   : > { %v1810_v37 = vadd.f32 %v1809_v24, %v10315_v14  ;;  %v10434_v39 = vpop.f32.mrf.mxu1  ;;  %v5916_v9 = vor.u32 %v5915_v40, %v5912_v63  ;;  %v8671_v14 = vld [vmem:[%s12653_s4 + $0xf0] sm:$0xff]  ;;  %v5929_v24 = vor.u32 %v5928_v13, %v5925_v55  ;;  %v2557_v63 = vshrl.u32 %v10378_v50, 16  ;;  %v8670_v40 = vld [vmem:[%s12653_s4 + $0xe8] sm:$0xff] }
 0x1c6   : > { %3723 = vmatpush.bf16.msrb.mxu0 %v8658_v10  ;;  %3767 = vmatpush.bf16.msrb.mxu1 %v8671_v14 }
 0x1c7   : > { %v1955_v34 = vadd.f32 %v10248_v41, %v1810_v37  ;;  %v10454_v35 = vsel %vm2098_vm2, %v10441_v42, %v5916_v9  ;;  %v2561_v41 = vshll.u32 %v10436_v15, 16  ;;  %v8657_v37 = vld [vmem:[%s12653_s4 + $0x80] sm:$0xff]  ;;  %v10467_v1 = vsel %vm2098_vm2, %v5916_v9, %v5929_v24 }
 0x1c8   : > { %v10450_v21 = vpop.f32.mrf.mxu0  ;;  %12720 = vst [vmem:[#allocation25_spill] sm:$0xff] %v10454_v35  ;;  %v2559_v58 = vor.u32 %v2557_v63, %v2555_v45  ;;  %v8669_v45 = vld [vmem:[%s12653_s4 + $0xe0] sm:$0xff] }
 0x1c9   : > { %v10456_v54 = vpop.f32.mrf.mxu3  ;;  %12721 = vst [vmem:[#allocation26_spill] sm:$0xff] %v10467_v1  ;;  %v2563_v30 = vrot.slane %v2561_v41, 1  ;;  %v10499_v24 = vadd.f32 %v10300_v7, %v1955_v34  ;;  %v8667_v41 = vld [vmem:[%s12653_s4 + $0xd0] sm:$0xff]  ;;  %v2565_v7 = vshrl.u32 %v10436_v15, 16 }
 0x1ca   : > { %3724 = vmatpush.bf16.msrb.mxu0 %v8657_v37  ;;  %3768 = vmatpush.bf16.msrb.mxu1 %v8670_v40 }
 0x1cb   : > { %2756 = vmatmul.bf16.gmra.mxu0 %v10436_v15  ;;  %v2564_v13 = vsel %vm1427_vm1, %v2559_v58, %v2563_v30  ;;  %v2461_v58 = vld [vmem:[#allocation2 + $0x54] sm:$0x1] }
 0x1cc   : > { %v1811_v43 = vpop.f32.mrf.mxu2 }
 0x1cd   : > { %v1812_v61 = vadd.f32 %v1811_v43, %v10339_v28  ;;  %v10471_v26 = vpop.f32.mrf.mxu1  ;;  %v8618_v28 = vld [vmem:[%s12653_s4 + $0x200] sm:$0xff] }
 0x1ce   : > { %2364 = vmatmul.bf16.gmra.mxu3 %v10160_v62  ;;  %3769 = vmatpush.bf16.msrb.mxu1 %v8669_v45  ;;  %v8668_v62 = vld [vmem:[%s12653_s4 + $0xd8] sm:$0xff] }
 0x1cf   : > { %v1957_v55 = vadd.f32 %v10269_v47, %v1812_v61  ;;  %2997 = vmatpush.bf16.msra.mxu3 %v8618_v28  ;;  %v8985_v28 = vld [vmem:[#allocation2 + $0x40] sm:$0xf0] }
 0x1d0   : > { %v10485_v9 = vpop.f32.mrf.mxu0  ;;  %2800 = vmatmul.bf16.gmra.mxu1 %v2564_v13  ;;  %v2567_v13 = vor.u32 %v2565_v7, %v2563_v30  ;;  %v8665_v30 = vld [vmem:[%s12653_s4 + $0xc0] sm:$0xff] }
 0x1d1   : > { %v10487_v10 = vpop.f32.mrf.mxu3  ;;  %2403 = vmatmul.bf16.gmra.mxu2 %v10114_v51  ;;  %v2569_v51 = vshll.u32 %v10493_v22, 16  ;;  %v10519_v45 = vadd.f32 %v10328_v48, %v1957_v55  ;;  %v8647_v48 = vld [vmem:[%s12653_s4 + $0x38] sm:$0xff] }
 0x1d2   : > { %3770 = vmatpush.bf16.msrb.mxu1 %v8668_v62  ;;  %v8986_v62 = vld [vmem:[#allocation2 + $0x40] sm:$0xe] }
 0x1d3   : > { %3911 = vmatpush.bf16.msrb.mxu3 %v8647_v48 }
 0x1d4   : > { %v1814_v47 = vpop.f32.mrf.mxu2 }
 0x1d5   : > { %v1815_v8 = vadd.f32 %v1814_v47, %v10370_v25  ;;  %v10496_v14 = vpop.f32.mrf.mxu1  ;;  %v8666_v25 = vld [vmem:[%s12653_s4 + $0xc8] sm:$0xff] }
 0x1d6   : > { %3771 = vmatpush.bf16.msrb.mxu1 %v8667_v41  ;;  %v8987_v41 = vor.u32 %v8986_v62, %v8985_v28 }
 0x1d7   : > { %v1960_v63 = vadd.f32 %v10281_v57, %v1815_v8  ;;  %v2571_v57 = vrot.slane %v2569_v51, 1  ;;  %v2511_v51 = vunpack.c.l.b16 %v2461_v58 }
 0x1d8   : > { %v10506_v37 = vpop.f32.mrf.mxu0  ;;  %v3582_v28 = vrot.slane %v8987_v41, 1 }
 0x1d9   : > { %v10508_v40 = vpop.f32.mrf.mxu3  ;;  %v2572_v8 = vsel %vm1427_vm1, %v2567_v13, %v2571_v57  ;;  %v10541_v7 = vpack.c.b16 %v2511_v51, %v2511_v51 }
 0x1da   : > { %3772 = vmatpush.bf16.msrb.mxu1 %v8666_v25  ;;  %v10539_v25 = vld [vmem:[#allocation2 + $0x48] sm:$0xff]  }
 0x1db   : > { %2761 = vmatmul.bf16.gmra.mxu0 %v10493_v22  ;;  %v3583_v62 = vrot.slane %v10539_v25, 1 }
 0x1dc   : > { %v1816_v34 = vpop.f32.mrf.mxu2 }
 0x1dd   : > { %v1817_v43 = vadd.f32 %v1816_v34, %v10391_v2  ;;  %v10516_v61 = vpop.f32.mrf.mxu1  ;;  %v8633_v2 = vld [vmem:[%s12653_s4 + $0x278] sm:$0xff] }
 0x1de   : > { %2369 = vmatmul.bf16.gmra.mxu3 %v10164_v56  ;;  %3773 = vmatpush.bf16.msrb.mxu1 %v8665_v30  ;;  %v10551_v30 = vadd.f32 %v10348_v29, %v1960_v63  ;;  %v8631_v29 = vld [vmem:[%s12653_s4 + $0x268] sm:$0xff]  ;;  %v3584_v63 = vsel %vm1555_vm0, %v3582_v28, %v3583_v62  ;;  %v8646_v28 = vld [vmem:[%s12653_s4 + $0x30] sm:$0xff] }
 0x1df   : > { %v1962_v47 = vadd.f32 %v10311_v3, %v1817_v43  ;;  %v12688_v3 = vshrl.u32 %v10102_v20, 16  ;;  %3039 = vmatpush.bf16.msrb.mxu2 %v8633_v2  ;;  %v2577_v2 = vshll.u32 %v10541_v7, 16  ;;  %3912 = vmatpush.bf16.msrb.mxu3 %v8646_v28 }
 0x1e0   : > { %v10533_v56 = vpop.f32.mrf.mxu0  ;;  %2805 = vmatmul.bf16.gmra.mxu1 %v2572_v8 }
 0x1e1   : > { %v10535_v55 = vpop.f32.mrf.mxu3  ;;  %2408 = vmatmul.bf16.gmra.mxu2 %v10170_v19  ;;  %v2206_v13 = vrot.slane %v12688_v3, 2  ;;  %v12723_v19 = vshll.u32 %v10102_v20, 16  ;;  %v2579_v41 = vrot.slane %v2577_v2, 1 }
 0x1e3   : > { %v2207_v8 = vrot.slane %v12723_v19, 3  ;;  %v2573_v19 = vshrl.u32 %v10493_v22, 16 }
 0x1e4   : > { %v1819_v34 = vpop.f32.mrf.mxu2 }
 0x1e5   : > { %v1820_v58 = vadd.f32 %v1819_v34, %v10420_v18  ;;  %v10544_v43 = vpop.f32.mrf.mxu1  ;;  %v8632_v18 = vld [vmem:[%s12653_s4 + $0x270] sm:$0xff]  ;;  %v2208_v60 = vor.u32 %v2207_v8, %v2206_v13  ;;  %v3515_v8 = vld [vmem:[#allocation2 + $0x48] sm:$0xc] }
 0x1e6   : > { %12722 = vst [vmem:[#allocation27_spill] sm:$0xff] %v10544_v43  ;;  %3040 = vmatpush.bf16.msrb.mxu2 %v8632_v18  ;;  %v10572_v18 = vadd.f32 %v10376_v52, %v1962_v47  ;;  %v12689_v52 = vunpack.c.h.b16 %v10539_v25  ;;  %v3526_v47 = vunpack.c.l.b16 %v3515_v8 }
 0x1e7   : > { %v1965_v51 = vadd.f32 %v10337_v31, %v1820_v58  ;;  %v2575_v31 = vor.u32 %v2573_v19, %v2571_v57  ;;  %v2209_v13 = vsel %vm2098_vm2, %v10156_v27, %v2208_v60  ;;  %v10584_v60 = vld [vmem:[#allocation2 + $0x58] sm:$0xff] }
 0x1e8   : > { %v2727_v48 = vpop.f32.mrf.mxu0  ;;  %v8629_v19 = vld [vmem:[%s12653_s4 + $0x258] sm:$0xff] }
 0x1e9   : > { %v10559_v34 = vpop.f32.mrf.mxu3  ;;  %v2580_v57 = vsel %vm1427_vm1, %v2575_v31, %v2579_v41  ;;  %v10598_v31 = vpack.c.b16 %v12689_v52, %v3526_v47  ;;  %v10622_v52 = vadd.f32 %v10401_v33, %v1965_v51  ;;  %v8626_v33 = vld [vmem:[%s12653_s4 + $0x240] sm:$0xff] }
 0x1ea   : > { %3041 = vmatpush.bf16.msrb.mxu2 %v8631_v29  ;;  %v10641_v51 = vld [vmem:[#allocation2 + $0x60] sm:$0xff] }
 0x1eb   : > { %3725 = vmatmul.bf16.vlgmr.msrb.gmra.mxu0 %v3584_v63  ;;  %v3536_v63 = vrot.slane %v10584_v60, 1  ;;  %v3533_v47 = vrot.slane %v10598_v31, 1 }
 0x1ec   : > { %v1821_v58 = vpop.f32.mrf.mxu2 }
 0x1ed   : > { %v1822_v3 = vadd.f32 %v1821_v58, %v10456_v54  ;;  %v10567_v1 = vpop.f32.mrf.mxu1  ;;  %v8630_v54 = vld [vmem:[%s12653_s4 + $0x260] sm:$0xff] }
 0x1ee   : > { %12724 = vst [vmem:[#allocation28_spill] sm:$0xff] %v10567_v1  ;;  %2374 = vmatmul.bf16.gmra.mxu3 %v2209_v13  ;;  %3042 = vmatpush.bf16.msrb.mxu2 %v8630_v54 }
 0x1ef   : > { %v10575_v35 = vadd.f32 %v10365_v49, %v1822_v3  ;;  %v10590_v49 = vld [vmem:[#allocation2 + $0x50] sm:$0xff] }
 0x1f0   : > { %v2729_v27 = vpop.f32.mrf.mxu0  ;;  %2810 = vmatmul.bf16.gmra.mxu1 %v2580_v57  ;;  %12725 = vst [vmem:[#allocation29_spill] sm:$0xff] %v10590_v49  ;;  %v9071_v3 = vld [vmem:[#allocation2 + $0x14] sm:$0xe] }
 0x1f1   : > { %v10587_v2 = vpop.f32.mrf.mxu3  ;;  %2413 = vmatmul.bf16.gmra.mxu2 %v10182_v5  ;;  %v3534_v5 = vrot.slane %v10590_v49, 1  ;;  %v9072_v8 = vor.u32 %v9071_v3, %v10152_v11  ;;  %v8628_v57 = vld [vmem:[%s12653_s4 + $0x250] sm:$0xff]  ;;  %v8627_v11 = vld [vmem:[%s12653_s4 + $0x248] sm:$0xff] }
 0x1f2   : > { %3043 = vmatpush.bf16.msrb.mxu2 %v8629_v19 }
 0x1f3   : > { %v3537_v28 = vsel %vm1555_vm0, %v3534_v5, %v3536_v63  ;;  %v3588_v19 = vsel %vm1555_vm0, %v3583_v62, %v3534_v5  ;;  %v2869_v3 = vrot.slane %v9072_v8, 1 }
 0x1f4   : > { %v1824_v29 = vpop.f32.mrf.mxu2 }
 0x1f5   : > { %v1825_v41 = vadd.f32 %v1824_v29, %v10487_v10  ;;  %v10601_v58 = vpop.f32.mrf.mxu1  ;;  %v2870_v29 = vrot.slane %v10205_v23, 1 }
 0x1f6   : > { %12726 = vst [vmem:[#allocation30_spill] sm:$0xff] %v10601_v58  ;;  %3044 = vmatpush.bf16.msrb.mxu2 %v8628_v57 }
 0x1f7   : > { %v10605_v13 = vadd.f32 %v10389_v0, %v1825_v41  ;;  %v3535_v0 = vsel %vm1555_vm0, %v3533_v47, %v3534_v5  ;;  %v3586_v41 = vrot.slane %v3537_v28, 1  ;;  %v10626_v23 = vsel %vm1555_vm0, %v2869_v3, %v2870_v29 }
 0x1f8   : > { %v2732_v54 = vpop.f32.mrf.mxu0  ;;  %v3585_v62 = vrot.slane %v3535_v0, 1  ;;  %v3538_v47 = vrot.slane %v10641_v51, 1 }
 0x1f9   : > { %v10613_v10 = vpop.f32.mrf.mxu3 }
 0x1fa   : > { %3045 = vmatpush.bf16.msrb.mxu2 %v8627_v11  ;;  %v3587_v8 = vsel %vm1555_vm0, %v3585_v62, %v3586_v41 }
 0x1fb   : > { %3730 = vmatmul.bf16.gmra.mxu0 %v3588_v19 }
 0x1fc   : > { %v1826_v42 = vpop.f32.mrf.mxu2 }
 0x1fd   : > { %v1827_v32 = vadd.f32 %v1826_v42, %v10508_v40  ;;  %v2776_v58 = vpop.f32.mrf.mxu1  ;;  %v8645_v42 = vld [vmem:[%s12653_s4 + $0x28] sm:$0xff] }
 0x1fe   : > { %v10628_v5 = vadd.f32 %v2776_v58, %v2727_v48  ;;  %2998 = vmatmul.bf16.vlgmr.msra.gmra.mxu3 %v10626_v23  ;;  %v12727_v48 = vshrl.u32 %v10102_v20, 16  ;;  %3046 = vmatpush.bf16.msrb.mxu2 %v8626_v33  ;;  %v2872_v33 = vrot.slane %v10240_v4, 1  ;;  %v8644_v4 = vld [vmem:[%s12653_s4 + $0x20] sm:$0xff] }
 0x1ff   : > { %v10632_v57 = vadd.f32 %v10418_v38, %v1827_v32  ;;  %3913 = vmatpush.bf16.msrb.mxu3 %v8645_v42 }
 0x200   : > { %v2734_v40 = vpop.f32.mrf.mxu0  ;;  %3774 = vmatmul.bf16.vlgmr.msrb.gmra.mxu1 %v3587_v8  ;;  %v2064_v58 = vor.u32 %v12727_v48, %v10123_v46  ;;  %v3539_v46 = vsel %vm1555_vm0, %v3536_v63, %v3538_v47 }
 0x201   : > { %v10646_v32 = vpop.f32.mrf.mxu3  ;;  %2418 = vmatmul.bf16.gmra.mxu2 %v10186_v53  ;;  %v3589_v1 = vrot.slane %v3539_v46, 1 }
 0x202   : > { %v2211_v19 = vshrl.u32 %v2064_v58, 16  ;;  %v2214_v0 = vshll.u32 %v2064_v58, 16 }
 0x203   : > { %3914 = vmatpush.bf16.msrb.mxu3 %v8644_v4 }
 0x204   : > { %v1829_v38 = vpop.f32.mrf.mxu2  ;;  %v2213_v48 = vrot.slane %v2211_v19, 2  ;;  %v2216_v53 = vrot.slane %v2214_v0, 3  ;;  %v3590_v19 = vsel %vm1555_vm0, %v3586_v41, %v3589_v1 }
 0x205   : > { %v1830_v11 = vadd.f32 %v1829_v38, %v10535_v55  ;;  %v2778_v3 = vpop.f32.mrf.mxu1 }
 0x206   : > { %v10651_v62 = vadd.f32 %v2778_v3, %v2729_v27  ;;  %v2217_v58 = vor.u32 %v2216_v53, %v2213_v48  ;;  %v10660_v27 = vsel %vm1555_vm0, %v2870_v29, %v2872_v33 }
 0x207   : > { %v10654_v8 = vadd.f32 %v10450_v21, %v1830_v11 }
 0x208   : > { %v2737_v20 = vpop.f32.mrf.mxu0 }
 0x209   : > { %v2342_v42 = vpop.f32.mrf.mxu3 }
 0x20b   : > { %3735 = vmatmul.bf16.gmra.mxu0 %v3537_v28 }
 0x20c   : > { %v1831_v43 = vpop.f32.mrf.mxu2 }
 0x20d   : > { %v1832_v55 = vadd.f32 %v1831_v43, %v10559_v34  ;;  %v2781_v38 = vpop.f32.mrf.mxu1  ;;  %v2218_v43 = vsel %vm2098_vm2, %v10178_v17, %v2217_v58  ;;  %v10674_v34 = vld [vmem:[#allocation2 + $0x68] sm:$0xff]  ;;  %v2874_v58 = vrot.slane %v10274_v44, 1  ;;  %v8643_v44 = vld [vmem:[%s12653_s4 + $0x18] sm:$0xff] }
 0x20e   : > { %v10662_v21 = vadd.f32 %v2781_v38, %v2732_v54  ;;  %3003 = vmatmul.bf16.gmra.mxu3 %v10660_v27 }
 0x20f   : > { %v10666_v63 = vadd.f32 %v10485_v9, %v1832_v55  ;;  %v3540_v9 = vrot.slane %v10674_v34, 1  ;;  %3915 = vmatpush.bf16.msrb.mxu3 %v8643_v44 }
 0x210   : > { %v2739_v28 = vpop.f32.mrf.mxu0  ;;  %3779 = vmatmul.bf16.gmra.mxu1 %v3590_v19 }
 0x211   : > { %v2345_v54 = vpop.f32.mrf.mxu3  ;;  %2423 = vmatmul.bf16.gmra.mxu2 %v2218_v43  ;;  %v3541_v53 = vsel %vm1555_vm0, %v3538_v47, %v3540_v9 }
 0x212   : > { %v3591_v55 = vrot.slane %v3541_v53, 1 }
 0x214   : > { %v1834_v29 = vpop.f32.mrf.mxu2  ;;  %v3592_v47 = vsel %vm1555_vm0, %v3589_v1, %v3591_v55 }
 0x215   : > { %v1835_v0 = vadd.f32 %v1834_v29, %v10587_v2  ;;  %v2783_v41 = vpop.f32.mrf.mxu1  ;;  %v10689_v2 = vsel %vm1555_vm0, %v2872_v33, %v2874_v58 }
 0x216   : > { %v10678_v11 = vadd.f32 %v2783_v41, %v2734_v40 }
 0x217   : > { %v10681_v3 = vadd.f32 %v10506_v37, %v1835_v0 }
 0x218   : > { %v2742_v48 = vpop.f32.mrf.mxu0 }
 0x219   : > { %v10684_v17 = vpop.f32.mrf.mxu3 }
 0x21b   : > { %3740 = vmatmul.bf16.gmra.mxu0 %v3539_v46 }
 0x21c   : > { %v1836_v38 = vpop.f32.mrf.mxu2 }
 0x21d   : > { %v1837_v19 = vadd.f32 %v1836_v38, %v10613_v10  ;;  %v2786_v4 = vpop.f32.mrf.mxu1  ;;  %v10701_v10 = vld [vmem:[#allocation2 + $0x70] sm:$0xff] }
 0x21e   : > { %v10691_v40 = vadd.f32 %v2786_v4, %v2737_v20  ;;  %3008 = vmatmul.bf16.gmra.mxu3 %v10689_v2  ;;  %v3542_v33 = vrot.slane %v10701_v10, 1  ;;  %v2876_v4 = vrot.slane %v10323_v36, 1  ;;  %v8680_v36 = vld [vmem:[%s12653_s4 + $0x138] sm:$0xff] }
 0x21f   : > { %v10695_v37 = vadd.f32 %v10533_v56, %v1837_v19  ;;  %4305 = vmatpush.bf16.msra.mxu0 %v8680_v36 }
 0x220   : > { %v2744_v46 = vpop.f32.mrf.mxu0  ;;  %3784 = vmatmul.bf16.gmra.mxu1 %v3592_v47  ;;  %v3543_v38 = vsel %vm1555_vm0, %v3540_v9, %v3542_v33 }
 0x221   : > { %12728 = vst [vmem:[#allocation31_spill] sm:$0xff] %v10695_v37  ;;  %v10703_v43 = vpop.f32.mrf.mxu3  ;;  %3047 = vmatmul.bf16.vlgmr.msrb.gmra.mxu2 %v10626_v23  ;;  %v3593_v23 = vrot.slane %v3543_v38, 1 }
 0x223   : > { %v3594_v9 = vsel %vm1555_vm0, %v3591_v55, %v3593_v23  ;;  %v12729_v55 = vld [vmem:[#allocation15_spill] sm:$0xff] }
 0x224   : > { %v2389_v20 = vpop.f32.mrf.mxu2 }
 0x225   : > { %v2390_v56 = vadd.f32 %v2389_v20, %v10646_v32  ;;  %v2788_v29 = vpop.f32.mrf.mxu1  ;;  %v10718_v32 = vsel %vm1555_vm0, %v2874_v58, %v2876_v4 }
 0x226   : > { %v10708_v1 = vadd.f32 %v2788_v29, %v2739_v28 }
 0x227   : > { %v10711_v0 = vadd.f32 %v2390_v56, %v10381_v16 }
 0x228   : > { %v2747_v41 = vpop.f32.mrf.mxu0 }
 0x229   : > { %v10714_v19 = vpop.f32.mrf.mxu3 }
 0x22b   : > { %3745 = vmatmul.bf16.gmra.mxu0 %v3541_v53 }
 0x22c   : > { %v2391_v47 = vpop.f32.mrf.mxu2 }
 0x22d   : > { %v2392_v44 = vadd.f32 %v2391_v47, %v2342_v42  ;;  %v2791_v37 = vpop.f32.mrf.mxu1  ;;  %v8642_v42 = vld [vmem:[%s12653_s4 + $0x10] sm:$0xff] }
 0x22e   : > { %v10720_v28 = vadd.f32 %v2791_v37, %v2742_v48  ;;  %3013 = vmatmul.bf16.gmra.mxu3 %v10718_v32  ;;  %v10740_v37 = vrot.slane %v12729_v55, 1 }
 0x22f   : > { %v10724_v16 = vadd.f32 %v2392_v44, %v10404_v12  ;;  %v8679_v12 = vld [vmem:[%s12653_s4 + $0x130] sm:$0xff]  ;;  %3916 = vmatpush.bf16.msrb.mxu3 %v8642_v42  ;;  %v2878_v42 = vrot.slane %v10378_v50, 1 }
 0x230   : > { %v2749_v53 = vpop.f32.mrf.mxu0  ;;  %3789 = vmatmul.bf16.gmra.mxu1 %v3594_v9  ;;  %4306 = vmatpush.bf16.msra.mxu0 %v8679_v12  ;;  %v3545_v9 = vsel %vm1555_vm0, %v3542_v33, %v10740_v37 }
 0x231   : > { %v10733_v58 = vpop.f32.mrf.mxu3  ;;  %3052 = vmatmul.bf16.gmra.mxu2 %v10660_v27  ;;  %v8678_v27 = vld [vmem:[%s12653_s4 + $0x128] sm:$0xff] }
 0x234   : > { %v2394_v48 = vpop.f32.mrf.mxu2  ;;  %4307 = vmatpush.bf16.msra.mxu0 %v8678_v27 }
 0x235   : > { %v2395_v20 = vadd.f32 %v2394_v48, %v2345_v54  ;;  %v2793_v56 = vpop.f32.mrf.mxu1  ;;  %v8677_v54 = vld [vmem:[%s12653_s4 + $0x120] sm:$0xff] }
 0x236   : > { %v10742_v29 = vadd.f32 %v2793_v56, %v2744_v46 }
 0x237   : > { %v10745_v47 = vadd.f32 %v2395_v20, %v10439_v6  ;;  %v3595_v6 = vrot.slane %v3545_v9, 1  ;;  %v10760_v20 = vsel %vm1555_vm0, %v2876_v4, %v2878_v42 }
 0x238   : > { %12730 = vst [vmem:[#allocation32_spill] sm:$0xff] %v10742_v29  ;;  %v2752_v44 = vpop.f32.mrf.mxu0  ;;  %4308 = vmatpush.bf16.msra.mxu0 %v8677_v54  ;;  %v12739_v29 = vunpack.c.h.b16 %v10539_v25 }
 0x239   : > { %v10752_v36 = vpop.f32.mrf.mxu3  ;;  %v3596_v56 = vsel %vm1555_vm0, %v3593_v23, %v3595_v6  ;;  %v10784_v23 = vld [vmem:[#allocation2 + $0x80] sm:$0xff] }
 0x23a   : > { %12732 = vst [vmem:[#allocation34_spill] sm:$0xff] %v10784_v23 }
 0x23b   : > { %3750 = vmatmul.bf16.gmra.mxu0 %v3543_v38  ;;  %v8676_v38 = vld [vmem:[%s12653_s4 + $0x118] sm:$0xff] }
 0x23c   : > { %v2396_v46 = vpop.f32.mrf.mxu2  ;;  %4309 = vmatpush.bf16.msra.mxu0 %v8676_v38  ;;  %v8674_v38 = vld [vmem:[%s12653_s4 + $0x108] sm:$0xff] }
 0x23d   : > { %v2397_v12 = vadd.f32 %v2396_v46, %v10684_v17  ;;  %v2796_v48 = vpop.f32.mrf.mxu1  ;;  %v8641_v17 = vld [vmem:[%s12653_s4 + $0x8] sm:$0xff] }
 0x23e   : > { %v10762_v33 = vadd.f32 %v2796_v48, %v2747_v41  ;;  %3018 = vmatmul.bf16.gmra.mxu3 %v10760_v20  ;;  %v8688_v41 = vld [vmem:[%s12653_s4 + $0x178] sm:$0xff] }
 0x23f   : > { %v10766_v50 = vadd.f32 %v2397_v12, %v10474_v59  ;;  %v8675_v59 = vld [vmem:[%s12653_s4 + $0x110] sm:$0xff]  ;;  %3917 = vmatpush.bf16.msrb.mxu3 %v8641_v17  ;;  %4354 = vmatpush.bf16.msra.mxu1 %v8688_v41 }
 0x240   : > { %12731 = vst [vmem:[#allocation33_spill] sm:$0xff] %v10762_v33  ;;  %v2754_v4 = vpop.f32.mrf.mxu0  ;;  %3794 = vmatmul.bf16.gmra.mxu1 %v3596_v56  ;;  %4310 = vmatpush.bf16.msra.mxu0 %v8675_v59  ;;  %v8687_v17 = vld [vmem:[%s12653_s4 + $0x170] sm:$0xff] }
 0x241   : > { %v10775_v27 = vpop.f32.mrf.mxu3  ;;  %3057 = vmatmul.bf16.gmra.mxu2 %v10689_v2  ;;  %v3546_v2 = vrot.slane %v10784_v23, 1 }
 0x243   : > { %4355 = vmatpush.bf16.msra.mxu1 %v8687_v17 }
 0x244   : > { %v2399_v54 = vpop.f32.mrf.mxu2  ;;  %4311 = vmatpush.bf16.msra.mxu0 %v8674_v38 }
 0x245   : > { %v2400_v46 = vadd.f32 %v2399_v54, %v10703_v43  ;;  %v2798_v12 = vpop.f32.mrf.mxu1  ;;  %v3547_v43 = vsel %vm1555_vm0, %v10740_v37, %v3546_v2  ;;  %v2880_v54 = vrot.slane %v10436_v15, 1 }
 0x246   : > { %v10787_v48 = vadd.f32 %v2798_v12, %v2749_v53  ;;  %v8686_v53 = vld [vmem:[%s12653_s4 + $0x168] sm:$0xff] }
 0x247   : > { %v10791_v56 = vadd.f32 %v2400_v46, %v10499_v24  ;;  %v8673_v24 = vld [vmem:[%s12653_s4 + $0x100] sm:$0xff]  ;;  %v3597_v46 = vrot.slane %v3547_v43, 1  ;;  %v3518_v12 = vld [vmem:[#allocation2 + $0x88] sm:$0x3]  ;;  %v10812_v38 = vsel %vm1555_vm0, %v2878_v42, %v2880_v54  ;;  %4356 = vmatpush.bf16.msra.mxu1 %v8686_v53 }
 0x248   : > { %12733 = vst [vmem:[#allocation35_spill] sm:$0xff] %v10787_v48  ;;  %v2757_v41 = vpop.f32.mrf.mxu0  ;;  %4312 = vmatpush.bf16.msra.mxu0 %v8673_v24  ;;  %v3529_v33 = vunpack.c.l.b16 %v3518_v12  ;;  %v8640_v42 = vld [vmem:[%s12653_s4] sm:$0xff] }
 0x249   : > { %v10801_v59 = vpop.f32.mrf.mxu3  ;;  %v3598_v15 = vsel %vm1555_vm0, %v3595_v6, %v3597_v46  ;;  %3918 = vmatpush.bf16.msrb.mxu3 %v8640_v42 }
 0x24b   : > { %3755 = vmatmul.bf16.gmra.mxu0 %v3545_v9 }
 0x24c   : > { %v2401_v23 = vpop.f32.mrf.mxu2 }
 0x24d   : > { %v2402_v48 = vadd.f32 %v2401_v23, %v10714_v19  ;;  %v2801_v55 = vpop.f32.mrf.mxu1  ;;  %v8685_v19 = vld [vmem:[%s12653_s4 + $0x160] sm:$0xff] }
 0x24e   : > { %v10814_v17 = vadd.f32 %v2801_v55, %v2752_v44  ;;  %3023 = vmatmul.bf16.gmra.mxu3 %v10812_v38  ;;  %4357 = vmatpush.bf16.msra.mxu1 %v8685_v19  ;;  %v10833_v44 = vpack.c.b16 %v3529_v33, %v3529_v33  ;;  %v12736_v33 = vld [vmem:[#allocation16_spill] sm:$0xff] }
 0x24f   : > { %v10818_v9 = vadd.f32 %v2402_v48, %v10519_v45  ;;  %v8684_v45 = vld [vmem:[%s12653_s4 + $0x158] sm:$0xff]  ;;  %v3601_v19 = vrot.slane %v12736_v33, 1  ;;  %v4010_v33 = vld [vmem:[#allocation2 + $0x48] sm:$0x8] }
 0x250   : > { %12734 = vst [vmem:[#allocation36_spill] sm:$0xff] %v10814_v17  ;;  %v2759_v23 = vpop.f32.mrf.mxu0  ;;  %3799 = vmatmul.bf16.gmra.mxu1 %v3598_v15  ;;  %v3548_v53 = vrot.slane %v10833_v44, 1 }
 0x251   : > { %v10827_v55 = vpop.f32.mrf.mxu3  ;;  %3062 = vmatmul.bf16.gmra.mxu2 %v10718_v32  ;;  %v8683_v32 = vld [vmem:[%s12653_s4 + $0x150] sm:$0xff] }
 0x252   : > { %4358 = vmatpush.bf16.msra.mxu1 %v8684_v45  ;;  %v10857_v45 = vsel %vm1555_vm0, %v3546_v2, %v3548_v53  ;;  %v3426_v2 = vshrl.u32 %v10590_v49, 16 }
 0x254   : > { %v2404_v6 = vpop.f32.mrf.mxu2 }
 0x255   : > { %v2405_v48 = vadd.f32 %v2404_v6, %v10733_v58  ;;  %v2803_v43 = vpop.f32.mrf.mxu1  ;;  %v12695_v58 = vrot.slane %v10493_v22, 1 }
 0x256   : > { %v10836_v24 = vadd.f32 %v2803_v43, %v2754_v4  ;;  %4359 = vmatpush.bf16.msra.mxu1 %v8683_v32  ;;  %v8682_v4 = vld [vmem:[%s12653_s4 + $0x148] sm:$0xff]  ;;  %v3599_v32 = vrot.slane %v10857_v45, 1  ;;  %v4077_v45 = vshll.u32 %v10598_v31, 16 }
 0x257   : > { %v10840_v12 = vadd.f32 %v2405_v48, %v10551_v30  ;;  %v3602_v30 = vsel %vm1555_vm0, %v10740_v37, %v3601_v19  ;;  %v10863_v43 = vsel %vm1555_vm0, %v2880_v54, %v12695_v58  ;;  %v3422_v37 = vshll.u32 %v10590_v49, 16  ;;  %v8655_v54 = vld [vmem:[%s12653_s4 + $0x78] sm:$0xff] }
 0x258   : > { %12735 = vst [vmem:[#allocation37_spill] sm:$0xff] %v10836_v24  ;;  %v10845_v15 = vpop.f32.mrf.mxu0  ;;  %v3600_v19 = vsel %vm1555_vm0, %v3597_v46, %v3599_v32  ;;  %v4015_v46 = vunpack.c.l.b16 %v4010_v33  ;;  %3960 = vmatpush.bf16.msra.mxu2 %v8655_v54  ;;  %v4079_v17 = vrot.slane %v4077_v45, 3  ;;  %v8654_v54 = vld [vmem:[%s12653_s4 + $0x70] sm:$0xff] }
 0x259   : > { %v10848_v42 = vpop.f32.mrf.mxu3 }
 0x25a   : > { %4360 = vmatpush.bf16.msra.mxu1 %v8682_v4  ;;  %v8703_v4 = vld [vmem:[%s12653_s4 + $0x1b8] sm:$0xff] }
 0x25b   : > { %3760 = vmatmul.bf16.gmra.mxu0 %v3602_v30  ;;  %4691 = vmatpush.bf16.msra.mxu3 %v8703_v4 }
 0x25c   : > { %v2406_v44 = vpop.f32.mrf.mxu2  ;;  %3961 = vmatpush.bf16.msra.mxu2 %v8654_v54 }
 0x25d   : > { %v2407_v6 = vadd.f32 %v2406_v44, %v10752_v36  ;;  %v2806_v48 = vpop.f32.mrf.mxu1 }
 0x25e   : > { %v10866_v24 = vadd.f32 %v2806_v48, %v2757_v41  ;;  %3028 = vmatmul.bf16.gmra.mxu3 %v10863_v43  ;;  %v8681_v41 = vld [vmem:[%s12653_s4 + $0x140] sm:$0xff]  ;;  %v4082_v48 = vrot.slane %v3422_v37, 3 }
 0x25f   : > { %v10872_v36 = vadd.f32 %v2407_v6, %v10572_v18  ;;  %v4074_v18 = vshrl.u32 %v10598_v31, 16  ;;  %4361 = vmatpush.bf16.msra.mxu1 %v8681_v41  ;;  %v4081_v6 = vrot.slane %v3426_v2, 2 }
 0x260   : > { %12737 = vst [vmem:[#allocation16_spill] sm:$0xff] %v10866_v24  ;;  %v10884_v30 = vpop.f32.mrf.mxu0  ;;  %3804 = vmatmul.bf16.gmra.mxu1 %v3600_v19  ;;  %v4016_v19 = vpack.c.b16 %v12739_v29, %v4015_v46 }
 0x261   : > { %12738 = vst [vmem:[#allocation38_spill] sm:$0xff] %v10872_v36  ;;  %v10888_v44 = vpop.f32.mrf.mxu3  ;;  %3067 = vmatmul.bf16.gmra.mxu2 %v10760_v20  ;;  %v4076_v24 = vrot.slane %v4074_v18, 2  ;;  %v10896_v33 = vor.u32 %v4082_v48, %v4081_v6  ;;  %v3430_v18 = vshll.u32 %v10584_v60, 16 }
 0x262   : > { %v4020_v29 = vshll.u32 %v4016_v19, 16 }
 0x263   : > { %v4080_v4 = vor.u32 %v4079_v17, %v4076_v24  ;;  %v10919_v17 = vadd.f32 %v10628_v5, %v10711_v0  ;;  %v3603_v24 = vrot.slane %v3548_v53, 1  ;;  %v3434_v53 = vshrl.u32 %v10584_v60, 16 }
 0x264   : > { %v2409_v58 = vpop.f32.mrf.mxu2  ;;  %v4022_v46 = vrot.slane %v4020_v29, 1 }
 0x265   : > { %v2410_v36 = vadd.f32 %v2409_v58, %v10775_v27  ;;  %v2808_v49 = vpop.f32.mrf.mxu1  ;;  %v10913_v27 = vrot.slane %v3422_v37, 1  ;;  %v12740_v37 = vrot.slane %v10493_v22, 1  ;;  %v8652_v22 = vld [vmem:[%s12653_s4 + $0x60] sm:$0xff] }
 0x266   : > { %v10894_v31 = vadd.f32 %v2808_v49, %v2759_v23  ;;  %v2884_v49 = vrot.slane %v10541_v7, 1  ;;  %v4084_v23 = vsel %vm2098_vm2, %v4080_v4, %v10896_v33  ;;  %v2016_v7 = vadd.f32 %v10434_v39, %v10575_v35 }
 0x267   : > { %v10899_v20 = vadd.f32 %v2410_v36, %v10622_v52  ;;  %v8653_v52 = vld [vmem:[%s12653_s4 + $0x68] sm:$0xff]  ;;  %v3432_v36 = vrot.slane %v3430_v18, 1  ;;  %v3428_v5 = vor.u32 %v3426_v2, %v10913_v27  ;;  %v4018_v4 = vshrl.u32 %v4016_v19, 16 }
 0x268   : > { %v10904_v41 = vpop.f32.mrf.mxu0  ;;  %v10927_v54 = vsel %vm1555_vm0, %v12740_v37, %v2884_v49  ;;  %3962 = vmatpush.bf16.msra.mxu2 %v8653_v52  ;;  %v3604_v35 = vsel %vm1555_vm0, %v3599_v32, %v3603_v24  ;;  %v4102_v32 = vrot.slane %v3434_v53, 2  ;;  %v4103_v49 = vrot.slane %v3430_v18, 3 }
 0x269   : > { %v10907_v45 = vpop.f32.mrf.mxu3  ;;  %v4023_v29 = vor.u32 %v4022_v46, %v4018_v4  ;;  %v10959_v24 = vadd.f32 %v10651_v62, %v10724_v16  ;;  %v2019_v18 = vadd.f32 %v10471_v26, %v10605_v13  ;;  %v3438_v26 = vshll.u32 %v10641_v51, 16 }
 0x26a   : > { %v4104_v4 = vor.u32 %v4103_v49, %v4102_v32  ;;  %v8649_v32 = vld [vmem:[%s12653_s4 + $0x48] sm:$0xff]  ;;  %v10984_v49 = vadd.f32 %v10662_v21, %v10745_v47  ;;  %v3442_v21 = vshrl.u32 %v10641_v51, 16 }
 0x26b   : > { %4313 = vmatmul.bf16.vlgmr.msra.gmra.mxu0 %v4084_v23  ;;  %v4024_v52 = vsel %vm1427_vm1, %v4023_v29, %v10913_v27  ;;  %v8651_v23 = vld [vmem:[%s12653_s4 + $0x58] sm:$0xff] }
 0x26c   : > { %v2411_v58 = vpop.f32.mrf.mxu2  ;;  %3963 = vmatpush.bf16.msra.mxu2 %v8652_v22  ;;  %v4089_v37 = vshll.u32 %v4024_v52, 16  ;;  %v8650_v22 = vld [vmem:[%s12653_s4 + $0x50] sm:$0xff] }
 0x26d   : > { %v2412_v6 = vadd.f32 %v2411_v58, %v10801_v59  ;;  %v2811_v48 = vpop.f32.mrf.mxu1  ;;  %v8702_v59 = vld [vmem:[%s12653_s4 + $0x1b0] sm:$0xff] }
 0x26e   : > { %v10931_v0 = vadd.f32 %v2811_v48, %v10845_v15  ;;  %3033 = vmatmul.bf16.gmra.mxu3 %v10927_v54  ;;  %v10947_v15 = vsel %vm1427_vm1, %v3428_v5, %v3432_v36  ;;  %v4086_v48 = vshrl.u32 %v4024_v52, 16  ;;  %v4091_v29 = vrot.slane %v4089_v37, 3 }
 0x26f   : > { %v10935_v39 = vadd.f32 %v2412_v6, %v2016_v7  ;;  %4692 = vmatpush.bf16.msra.mxu3 %v8702_v59  ;;  %v4094_v58 = vshrl.u32 %v10947_v15, 16  ;;  %v4097_v46 = vshll.u32 %v10947_v15, 16 }
 0x270   : > { %v10944_v2 = vpop.f32.mrf.mxu0  ;;  %3809 = vmatmul.bf16.gmra.mxu1 %v3604_v35  ;;  %3964 = vmatpush.bf16.msra.mxu2 %v8651_v23 }
 0x271   : > { %v10949_v19 = vpop.f32.mrf.mxu3  ;;  %3072 = vmatmul.bf16.gmra.mxu2 %v10812_v38  ;;  %v4096_v16 = vrot.slane %v4094_v58, 2  ;;  %v4099_v35 = vrot.slane %v4097_v46, 3  ;;  %v3440_v58 = vrot.slane %v3438_v26, 1  ;;  %v2021_v46 = vadd.f32 %v10496_v14, %v10632_v57  ;;  %v8648_v14 = vld [vmem:[%s12653_s4 + $0x40] sm:$0xff]  ;;  %v8701_v57 = vld [vmem:[%s12653_s4 + $0x1a8] sm:$0xff] }
 0x273   : > { %v4100_v52 = vor.u32 %v4099_v35, %v4096_v16  ;;  %4693 = vmatpush.bf16.msra.mxu3 %v8701_v57  ;;  %v4116_v16 = vrot.slane %v3438_v26, 3  ;;  %v11013_v35 = vadd.f32 %v10678_v11, %v10766_v50 }
 0x274   : > { %v2414_v38 = vpop.f32.mrf.mxu2  ;;  %3965 = vmatpush.bf16.msra.mxu2 %v8650_v22 }
 0x275   : > { %v2415_v7 = vadd.f32 %v2414_v38, %v10827_v55  ;;  %v2813_v6 = vpop.f32.mrf.mxu1  ;;  %v4088_v55 = vrot.slane %v4086_v48, 2 }
 0x276   : > { %v10967_v5 = vadd.f32 %v2813_v6, %v10884_v30  ;;  %v4105_v30 = vsel %vm2098_vm2, %v10896_v33, %v4104_v4  ;;  %v10989_v33 = vld [vmem:[#allocation2 + $0x40] sm:$0xff]   ;;  %v3436_v6 = vor.u32 %v3434_v53, %v3432_v36  ;;  %v4115_v53 = vrot.slane %v3442_v21, 2 }
 0x277   : > { %v10969_v62 = vadd.f32 %v2415_v7, %v2019_v18  ;;  %v4092_v7 = vor.u32 %v4091_v29, %v4088_v55 }
 0x278   : > { %v3731_v59 = vpop.f32.mrf.mxu0  ;;  %3966 = vmatpush.bf16.msra.mxu2 %v8649_v32  ;;  %v4117_v26 = vor.u32 %v4116_v16, %v4115_v53  ;;  %v3444_v16 = vor.u32 %v3442_v21, %v3440_v58 }
 0x279   : > { %v10975_v13 = vpop.f32.mrf.mxu3  ;;  %v4101_v37 = vsel %vm2098_vm2, %v4092_v7, %v4100_v52 }
 0x27b   : > { %4318 = vmatmul.bf16.gmra.mxu0 %v4105_v30  ;;  %v2024_v30 = vadd.f32 %v10516_v61, %v10654_v8  ;;  %v11031_v61 = vadd.f32 %v10691_v40, %v10791_v56 }
 0x27c   : > { %v2416_v23 = vpop.f32.mrf.mxu2  ;;  %3967 = vmatpush.bf16.msra.mxu2 %v8648_v14 }
 0x27d   : > { %v2417_v38 = vadd.f32 %v2416_v23, %v10848_v42  ;;  %v3775_v18 = vpop.f32.mrf.mxu1 }
 0x27e   : > { %v10992_v48 = vadd.f32 %v3775_v18, %v10904_v41  ;;  %3919 = vmatmul.bf16.vlgmr.msrb.gmra.mxu3 %v10989_v33  ;;  %v11006_v41 = vsel %vm1427_vm1, %v3436_v6, %v3440_v58  ;;  %v3446_v18 = vshll.u32 %v10674_v34, 16  ;;  %v4118_v6 = vsel %vm2098_vm2, %v4104_v4, %v4117_v26 }
 0x27f   : > { %v10996_v47 = vadd.f32 %v2417_v38, %v2021_v46  ;;  %v4107_v22 = vshrl.u32 %v11006_v41, 16  ;;  %v4110_v55 = vshll.u32 %v11006_v41, 16  ;;  %v3450_v4 = vshrl.u32 %v10674_v34, 16 }
 0x280   : > { %v3733_v42 = vpop.f32.mrf.mxu0  ;;  %4362 = vmatmul.bf16.vlgmr.msra.gmra.mxu1 %v4101_v37  ;;  %v12741_v37 = vld [vmem:[#allocation27_spill] sm:$0xff]  ;;  %v4129_v34 = vrot.slane %v3446_v18, 3  ;;  %v11056_v58 = vadd.f32 %v10708_v1, %v10818_v9 }
 0x281   : > { %v11008_v36 = vpop.f32.mrf.mxu3  ;;  %3077 = vmatmul.bf16.gmra.mxu2 %v10863_v43  ;;  %v4109_v38 = vrot.slane %v4107_v22, 2  ;;  %v4112_v11 = vrot.slane %v4110_v55, 3  ;;  %v2026_v14 = vadd.f32 %v12741_v37, %v10666_v63  ;;  %v3407_v37 = vshrl.u32 %v10989_v33, 16 }
 0x283   : > { %v4113_v8 = vor.u32 %v4112_v11, %v4109_v38 }
 0x284   : > { %v2419_v29 = vpop.f32.mrf.mxu2 }
 0x285   : > { %v2420_v32 = vadd.f32 %v2419_v29, %v10888_v44  ;;  %v3777_v23 = vpop.f32.mrf.mxu1  ;;  %v4114_v40 = vsel %vm2098_vm2, %v4100_v52, %v4113_v8 }
 0x286   : > { %v11021_v43 = vadd.f32 %v3777_v23, %v10944_v2  ;;  %v3448_v2 = vrot.slane %v3446_v18, 1 }
 0x287   : > { %v11023_v46 = vadd.f32 %v2420_v32, %v2024_v30  ;;  %v3409_v30 = vshll.u32 %v10989_v33, 16 }
 0x288   : > { %v3736_v50 = vpop.f32.mrf.mxu0  ;;  %v11046_v29 = vsel %vm1427_vm1, %v3444_v16, %v3448_v2  ;;  %v3454_v16 = vshll.u32 %v10701_v10, 16 }
 0x289   : > { %v11026_v7 = vpop.f32.mrf.mxu3  ;;  %v4120_v52 = vshrl.u32 %v11046_v29, 16  ;;  %v4123_v21 = vshll.u32 %v11046_v29, 16 }
 0x28b   : > { %4323 = vmatmul.bf16.gmra.mxu0 %v4118_v6  ;;  %v4122_v1 = vrot.slane %v4120_v52, 2  ;;  %v4125_v9 = vrot.slane %v4123_v21, 3  ;;  %v12743_v52 = vld [vmem:[#allocation31_spill] sm:$0xff]  ;;  %v12744_v21 = vld [vmem:[#allocation30_spill] sm:$0xff] }
 0x28c   : > { %v2421_v44 = vpop.f32.mrf.mxu2 }
 0x28d   : > { %v2422_v57 = vadd.f32 %v2421_v44, %v10907_v45  ;;  %v3780_v53 = vpop.f32.mrf.mxu1  ;;  %v8700_v45 = vld [vmem:[%s12653_s4 + $0x1a0] sm:$0xff] }
 0x28e   : > { %v11036_v22 = vadd.f32 %v3780_v53, %v3731_v59  ;;  %3924 = vmatmul.bf16.gmra.mxu3 %v10539_v25  ;;  %v4128_v59 = vrot.slane %v3450_v4, 2  ;;  %v3414_v53 = vshll.u32 %v10539_v25, 16 }
 0x28f   : > { %v11040_v55 = vadd.f32 %v2422_v57, %v2026_v14  ;;  %4694 = vmatpush.bf16.msra.mxu3 %v8700_v45  ;;  %v3411_v14 = vrot.slane %v3409_v30, 1  ;;  %v2031_v30 = vadd.f32 %v12744_v21, %v12743_v52  ;;  %v11113_v52 = vld [vmem:[%s12654_s5] ss:$0 sm:$0xff] }
 0x290   : > { %v11043_v56 = vpop.f32.mrf.mxu0  ;;  %4367 = vmatmul.bf16.gmra.mxu1 %v4114_v40  ;;  %v4130_v18 = vor.u32 %v4129_v34, %v4128_v59  ;;  %v4126_v40 = vor.u32 %v4125_v9, %v4122_v1  ;;  %v3416_v33 = vrot.slane %v3414_v53, 1  ;;  %v3456_v34 = vrot.slane %v3454_v16, 1  ;;  %v12746_v53 = vld [vmem:[#allocation38_spill] sm:$0xff] }
 0x291   : > { %v11048_v63 = vpop.f32.mrf.mxu3  ;;  %3082 = vmatmul.bf16.gmra.mxu2 %v10927_v54  ;;  %v12742_v54 = vld [vmem:[#allocation28_spill] sm:$0xff]  ;;  %v3412_v45 = vor.u32 %v3411_v14, %v3407_v37 }
 0x292   : > { %v2029_v23 = vadd.f32 %v12742_v54, %v10681_v3  ;;  %v3452_v54 = vor.u32 %v3450_v4, %v3448_v2  ;;  %v4142_v4 = vrot.slane %v3454_v16, 3 }
 0x293   : > { %v3417_v1 = vsel %vm1427_vm1, %v3412_v45, %v3416_v33 }
 0x294   : > { %v2424_v32 = vpop.f32.mrf.mxu2  ;;  %v11094_v9 = vsel %vm1427_vm1, %v3452_v54, %v3456_v34 }
 0x295   : > { %v2425_v38 = vadd.f32 %v2424_v32, %v10949_v19  ;;  %v3782_v11 = vpop.f32.mrf.mxu1  ;;  %v4131_v19 = vsel %vm2098_vm2, %v4117_v26, %v4130_v18  ;;  %v12745_v26 = vld [vmem:[#allocation29_spill] sm:$0xff]  ;;  %v4136_v37 = vshll.u32 %v11094_v9, 16 }
 0x296   : > { %v11064_v6 = vadd.f32 %v3782_v11, %v3733_v42  ;;  %v11078_v42 = vadd.f32 %v10720_v28, %v10840_v12  ;;  %v3458_v28 = vshrl.u32 %v10701_v10, 16  ;;  %v8699_v10 = vld [vmem:[%s12653_s4 + $0x198] sm:$0xff] }
 0x297   : > { %v11066_v44 = vadd.f32 %v2425_v38, %v2029_v23  ;;  %v4127_v38 = vsel %vm2098_vm2, %v4113_v8, %v4126_v40  ;;  %v4133_v8 = vshrl.u32 %v11094_v9, 16  ;;  %4695 = vmatpush.bf16.msra.mxu3 %v8699_v10  ;;  %v4138_v54 = vrot.slane %v4136_v37, 3 }
 0x298   : > { %v11069_v57 = vpop.f32.mrf.mxu0  ;;  %v4141_v2 = vrot.slane %v3458_v28, 2 }
 0x299   : > { %v11073_v3 = vpop.f32.mrf.mxu3 }
 0x29b   : > { %4328 = vmatmul.bf16.gmra.mxu0 %v4131_v19  ;;  %v12747_v19 = vld [vmem:[#allocation32_spill] sm:$0xff] }
 0x29c   : > { %v2426_v59 = vpop.f32.mrf.mxu2  ;;  %v11107_v45 = vadd.f32 %v12747_v19, %v12746_v53  ;;  %v12749_v53 = vld [vmem:[#allocation33_spill] sm:$0xff] }
 0x29d   : > { %v2427_v25 = vadd.f32 %v2426_v59, %v10975_v13  ;;  %v3785_v32 = vpop.f32.mrf.mxu1  ;;  %v11096_v13 = vpop.permute.xlu0 %3167  ;;  %v11139_v19 = vadd.f32 %v12749_v53, %v10899_v20 }
 0x29e   : > { %v11083_v23 = vadd.f32 %v3785_v32, %v3736_v50  ;;  %3929 = vmatmul.bf16.gmra.mxu3 %v12745_v26  ;;  %v4135_v32 = vrot.slane %v4133_v8, 2  ;;  %v9057_v8 = vld [vmem:[#allocation2 + $0x48] sm:$0xff]  }
 0x29f   : > { %v11087_v12 = vadd.f32 %v2427_v25, %v2031_v30  ;;  %v11118_v30 = vor.u32 %v4142_v4, %v4141_v2  ;;  %v3418_v37 = vshrl.u32 %v9057_v8, 16 }
 0x2a0   : > { %v11090_v11 = vpop.f32.mrf.mxu0  ;;  %4372 = vmatmul.bf16.gmra.mxu1 %v4127_v38  ;;  %v3158_v38 = vpop.permute.xlu1 %3157  ;;  %v11130_v2 = vor.u32 %v4138_v54, %v4135_v32 }
 0x2a1   : > { %v11098_v50 = vpop.f32.mrf.mxu3  ;;  %3968 = vmatmul.bf16.vlgmr.msra.gmra.mxu2 %v3417_v1  ;;  %v4144_v10 = vsel %vm2098_vm2, %v4130_v18, %v11118_v30  ;;  %v3420_v54 = vor.u32 %v3418_v37, %v3416_v33 }
 0x2a2   : > { %v4140_v8 = vsel %vm2098_vm2, %v4126_v40, %v11130_v2  ;;  %v8698_v40 = vld [vmem:[%s12653_s4 + $0x190] sm:$0xff] }
 0x2a3   : > { %4696 = vmatpush.bf16.msra.mxu3 %v8698_v40 }
 0x2a4   : > { %v3048_v14 = vpop.f32.mrf.mxu2 }
 0x2a5   : > { %v3049_v59 = vadd.f32 %v3048_v14, %v11008_v36  ;;  %v3787_v21 = vpop.f32.mrf.mxu1  ;;  %v11128_v14 = vpop.permute.xlu0 %3182 }
 0x2a6   : > { %v11116_v16 = vadd.f32 %v3787_v21, %v11043_v56 }
 0x2a7   : > { %v3088_v25 = vadd.f32 %v3049_v59, %v10919_v17  ;;  %v11135_v17 = vld [vmem:[%s12656_s7] ss:$0 sm:$0xff] }
 0x2a8   : > { %12748 = vst [vmem:[#allocation27_spill] sm:$0xff] %v11116_v16  ;;  %v11121_v26 = vpop.f32.mrf.mxu0  ;;  %v11171_v37 = vpop.permute.xlu1 %3172 }
 0x2a9   : > { %v3107_v36 = vadd.f32 %v11113_v52, %v3088_v25  ;;  %v11124_v1 = vpop.f32.mrf.mxu3  ;;  %v3163_v25 = vpop.permute.xlu2 %3162 }
 0x2ab   : > { %v3123_v56 = vmax.f32 %v3107_v36, 0.0  ;;  %4333 = vmatmul.bf16.gmra.mxu0 %v4144_v10  ;;  %v3460_v36 = vor.u32 %v3458_v28, %v3456_v34  ;;  %v12751_v34 = vld [vmem:[#allocation17_spill] sm:$0xff]  ;;  %v12752_v28 = vld [vmem:[#allocation15_spill] sm:$0xff] }
 0x2ac   : > { %v3050_v4 = vpop.f32.mrf.mxu2 }
 0x2ad   : > { %v3051_v18 = vadd.f32 %v3050_v4, %v11026_v7  ;;  %v3790_v59 = vpop.f32.mrf.mxu1  ;;  %v3235_v21 = vmul.f32 %v3158_v38, %v3123_v56  ;;  %v3425_v7 = vsel %vm1427_vm1, %v3420_v54, %v10913_v27  ;;  %v12753_v27 = vshrl.u32 %v12752_v28, 16 }
 0x2ae   : > { %v11143_v32 = vadd.f32 %v3790_v59, %v11069_v57  ;;  %3934 = vmatmul.bf16.gmra.mxu3 %v10584_v60  ;;  %v11156_v57 = vsel %vm1427_vm1, %v3460_v36, %v12751_v34  ;;  %v12754_v56 = vshll.u32 %v12752_v28, 16  ;;  %v8718_v36 = vld [vmem:[%s12653_s4 + $0x230] sm:$0xff] }
 0x2af   : > { %v3089_v10 = vadd.f32 %v3051_v18, %v10959_v24  ;;  %v3254_v20 = vmul.f32 %v11135_v17, %v3235_v21  ;;  %v8719_v24 = vld [vmem:[%s12653_s4 + $0x238] sm:$0xff]  ;;  %v4154_v38 = vrot.slane %v12753_v27, 2  ;;  %v4146_v59 = vshrl.u32 %v11156_v57, 16 }
 0x2b0   : > { %12750 = vst [vmem:[#allocation28_spill] sm:$0xff] %v11143_v32  ;;  %v11150_v53 = vpop.f32.mrf.mxu0  ;;  %4377 = vmatmul.bf16.gmra.mxu1 %v4140_v8  ;;  %v4155_v4 = vrot.slane %v12754_v56, 3  ;;  %v4149_v21 = vshll.u32 %v11156_v57, 16  ;;  %4962 = vmatpush.bf16.msrb.mxu0 %v8719_v24  ;;  %v12755_v28 = vld [vmem:[#allocation35_spill] sm:$0xff] }
 0x2b1   : > { %v3108_v60 = vadd.f32 %v11113_v52, %v3089_v10  ;;  %v11159_v33 = vpop.f32.mrf.mxu3  ;;  %3973 = vmatmul.bf16.gmra.mxu2 %v3425_v7  ;;  %3270 = vadd.xlane.f32.xlu2 %v3254_v20  ;;  %v11178_v10 = vpop.permute.xlu0 %3197  ;;  %v11188_v24 = vadd.f32 %v12755_v28, %v10935_v39  ;;  %v4148_v56 = vrot.slane %v4146_v59, 2  ;;  %v8717_v59 = vld [vmem:[%s12653_s4 + $0x228] sm:$0xff]  ;;  %v12758_v28 = vld [vmem:[#allocation36_spill] sm:$0xff] }
 0x2b2   : > { %v4151_v32 = vrot.slane %v4149_v21, 3  ;;  %v11192_v16 = vpop.permute.xlu2 %3177 }
 0x2b3   : > { %v3124_v18 = vmax.f32 %v3108_v60, 0.0  ;;  %v11184_v60 = vor.u32 %v4155_v4, %v4154_v38  ;;  %v12756_v38 = vld [vmem:[#allocation34_spill] sm:$0xff] }
 0x2b4   : > { %v3053_v54 = vpop.f32.mrf.mxu2  ;;  %4963 = vmatpush.bf16.msrb.mxu0 %v8718_v36  ;;  %v11208_v36 = vpop.permute.xlu1 %3187 }
 0x2b5   : > { %v3054_v8 = vadd.f32 %v3053_v54, %v11048_v63  ;;  %v3792_v20 = vpop.f32.mrf.mxu1  ;;  %v3236_v7 = vmul.f32 %v3163_v25, %v3124_v18  ;;  %v4157_v39 = vsel %vm2098_vm2, %v11118_v30, %v11184_v60  ;;  %v11203_v18 = vor.u32 %v4151_v32, %v4148_v56 }
 0x2b6   : > { %v11182_v34 = vadd.f32 %v3792_v20, %v11090_v11 }
 0x2b7   : > { %v3090_v40 = vadd.f32 %v3054_v8, %v10984_v49  ;;  %v3255_v27 = vmul.f32 %v11135_v17, %v3236_v7  ;;  %v4026_v49 = vshll.u32 %v12756_v38, 16  ;;  %v8716_v7 = vld [vmem:[%s12653_s4 + $0x220] sm:$0xff] }
 0x2b8   : > { %v11194_v63 = vpop.f32.mrf.mxu0  ;;  %4964 = vmatpush.bf16.msrb.mxu0 %v8717_v59 }
 0x2b9   : > { %v3109_v11 = vadd.f32 %v11113_v52, %v3090_v40  ;;  %v11197_v25 = vpop.f32.mrf.mxu3  ;;  %3272 = vadd.xlane.f32.xlu0 %v3255_v27  ;;  %v4028_v32 = vrot.slane %v4026_v49, 1  ;;  %v11221_v40 = vadd.f32 %v12758_v28, %v10969_v62  ;;  %v11223_v27 = vpop.permute.xlu0 %3212 }
 0x2bb   : > { %v3125_v4 = vmax.f32 %v3109_v11, 0.0  ;;  %4338 = vmatmul.bf16.gmra.mxu0 %v4157_v39  ;;  %v4030_v11 = vshrl.u32 %v12756_v38, 16  ;;  %v12759_v39 = vld [vmem:[#allocation18_spill] sm:$0xff]  ;;  %v8715_v38 = vld [vmem:[%s12653_s4 + $0x218] sm:$0xff] }
 0x2bc   : > { %v3055_v21 = vpop.f32.mrf.mxu2  ;;  %v4029_v62 = vsel %vm1427_vm1, %v12759_v39, %v4028_v32  ;;  %4965 = vmatpush.bf16.msrb.mxu0 %v8716_v7 }
 0x2bd   : > { %v3056_v54 = vadd.f32 %v3055_v21, %v11073_v3  ;;  %v3795_v8 = vpop.f32.mrf.mxu1  ;;  %v3237_v20 = vmul.f32 %v11096_v13, %v3125_v4  ;;  %v4153_v13 = vsel %vm2098_vm2, %v11130_v2, %v11203_v18  ;;  %v11242_v2 = vpop.permute.xlu2 %3192 }
 0x2be   : > { %v11213_v30 = vadd.f32 %v3795_v8, %v11121_v26  ;;  %3939 = vmatmul.bf16.gmra.mxu3 %v10641_v51  ;;  %v4009_v51 = vld [vmem:[#allocation2 + $0x88] sm:$0x7] }
 0x2bf   : > { %v3091_v3 = vadd.f32 %v3056_v54, %v11013_v35  ;;  %v3256_v26 = vmul.f32 %v11135_v17, %v3237_v20  ;;  %v8697_v35 = vld [vmem:[%s12653_s4 + $0x188] sm:$0xff]  ;;  %v4012_v21 = vunpack.c.l.b16 %v4009_v51  ;;  %v8727_v54 = vld [vmem:[%s12653_s4 + $0x278] sm:$0xff]  ;;  %v4159_v20 = vshrl.u32 %v4029_v62, 16 }
 0x2c0   : > { %12757 = vst [vmem:[#allocation31_spill] sm:$0xff] %v11213_v30  ;;  %v11230_v56 = vpop.f32.mrf.mxu0  ;;  %4382 = vmatmul.bf16.gmra.mxu1 %v4153_v13  ;;  %4697 = vmatpush.bf16.msra.mxu3 %v8697_v35  ;;  %v4168_v13 = vrot.slane %v4026_v49, 3  ;;  %v11264_v49 = vpop.permute.xlu1 %3202 }
 0x2c1   : > { %v3110_v4 = vadd.f32 %v11113_v52, %v3091_v3  ;;  %v11236_v59 = vpop.f32.mrf.mxu3  ;;  %3978 = vmatmul.bf16.gmra.mxu2 %v10947_v15  ;;  %3274 = vadd.xlane.f32.xlu1 %v3256_v26  ;;  %v4162_v15 = vshll.u32 %v4029_v62, 16  ;;  %v4167_v3 = vrot.slane %v4030_v11, 2  ;;  %v11255_v30 = vpack.c.b16 %v4012_v21, %v4012_v21  ;;  %v8714_v62 = vld [vmem:[%s12653_s4 + $0x210] sm:$0xff] }
 0x2c2   : > { %5011 = vmatpush.bf16.msrb.mxu1 %v8727_v54  ;;  %4966 = vmatpush.bf16.msrb.mxu0 %v8715_v38  ;;  %v4161_v54 = vrot.slane %v4159_v20, 2  ;;  %v11272_v38 = vpop.permute.xlu0 %3227 }
 0x2c3   : > { %v3126_v8 = vmax.f32 %v3110_v4, 0.0  ;;  %v12760_v4 = vld [vmem:[#allocation37_spill] sm:$0xff]  ;;  %v11270_v21 = vor.u32 %v4168_v13, %v4167_v3  ;;  %v8726_v13 = vld [vmem:[%s12653_s4 + $0x270] sm:$0xff] }
 0x2c4   : > { %v3058_v28 = vpop.f32.mrf.mxu2  ;;  %v11262_v35 = vadd.f32 %v12760_v4, %v10996_v47  ;;  %v8713_v3 = vld [vmem:[%s12653_s4 + $0x208] sm:$0xff]  ;;  %v4032_v4 = vor.u32 %v4030_v11, %v4028_v32  ;;  %v8712_v32 = vld [vmem:[%s12653_s4 + $0x200] sm:$0xff] }
 0x2c5   : > { %v3059_v26 = vadd.f32 %v3058_v28, %v11098_v50  ;;  %v3797_v7 = vpop.f32.mrf.mxu1  ;;  %v3238_v51 = vmul.f32 %v11171_v37, %v3126_v8  ;;  %v4170_v47 = vsel %vm2098_vm2, %v11184_v60, %v11270_v21 }
 0x2c6   : > { %v11253_v39 = vadd.f32 %v3797_v7, %v11150_v53  ;;  %v4164_v53 = vrot.slane %v4162_v15, 3  ;;  %4967 = vmatpush.bf16.msrb.mxu0 %v8714_v62  ;;  %5012 = vmatpush.bf16.msrb.mxu1 %v8726_v13 }
 0x2c7   : > { %v3092_v50 = vadd.f32 %v3059_v26, %v11031_v61  ;;  %v3257_v37 = vmul.f32 %v11135_v17, %v3238_v51  ;;  %v4034_v61 = vshll.u32 %v11255_v30, 16  ;;  %v11289_v26 = vpop.permute.xlu2 %3207 }
 0x2c8   : > { %v11268_v8 = vpop.f32.mrf.mxu0  ;;  %v11281_v15 = vor.u32 %v4164_v53, %v4161_v54  ;;  %v9058_v54 = vld [vmem:[#allocation2 + $0x68] sm:$0xff]  ;;  %v11316_v13 = vpop.permute.xlu1 %3217 }
 0x2c9   : > { %v3111_v28 = vadd.f32 %v11113_v52, %v3092_v50  ;;  %v11275_v7 = vpop.f32.mrf.mxu3  ;;  %3276 = vadd.xlane.f32.xlu2 %v3257_v37  ;;  %v11296_v53 = vrot.slane %v4034_v61, 1 }
 0x2ca   : > { %4968 = vmatpush.bf16.msrb.mxu0 %v8713_v3 }
 0x2cb   : > { %v3127_v20 = vmax.f32 %v3111_v28, 0.0  ;;  %4343 = vmatmul.bf16.gmra.mxu0 %v4170_v47  ;;  %v12697_v28 = vshrl.u32 %v11255_v30, 16  ;;  %v4166_v47 = vsel %vm2098_vm2, %v11203_v18, %v11281_v15  ;;  %v4181_v18 = vrot.slane %v4034_v61, 3 }
 0x2cc   : > { %v3060_v51 = vpop.f32.mrf.mxu2 }
 0x2cd   : > { %v3061_v60 = vadd.f32 %v3060_v51, %v11124_v1  ;;  %v3800_v50 = vpop.f32.mrf.mxu1  ;;  %v3239_v62 = vmul.f32 %v11192_v16, %v3127_v20  ;;  %v8725_v1 = vld [vmem:[%s12653_s4 + $0x268] sm:$0xff]  ;;  %v12762_v16 = vld [vmem:[#allocation16_spill] sm:$0xff] }
 0x2ce   : > { %v11294_v37 = vadd.f32 %v3800_v50, %v11194_v63  ;;  %3944 = vmatmul.bf16.gmra.mxu3 %v9058_v54  ;;  %v11307_v11 = vadd.f32 %v12762_v16, %v11023_v46  ;;  %v8696_v46 = vld [vmem:[%s12653_s4 + $0x180] sm:$0xff]  ;;  %4969 = vmatpush.bf16.msrb.mxu0 %v8712_v32  ;;  %v11332_v54 = vpop.permute.xlu0 %5131 }
 0x2cf   : > { %v3093_v63 = vadd.f32 %v3061_v60, %v11056_v58  ;;  %v3258_v20 = vmul.f32 %v11135_v17, %v3239_v62  ;;  %v4180_v58 = vrot.slane %v12697_v28, 2  ;;  %v4037_v60 = vsel %vm1427_vm1, %v4032_v4, %v11296_v53  ;;  %5013 = vmatpush.bf16.msrb.mxu1 %v8725_v1  ;;  %v8724_v62 = vld [vmem:[%s12653_s4 + $0x260] sm:$0xff]  ;;  %4698 = vmatpush.bf16.msra.mxu3 %v8696_v46  ;;  %v8723_v1 = vld [vmem:[%s12653_s4 + $0x258] sm:$0xff] }
 0x2d0   : > { %12761 = vst [vmem:[#allocation30_spill] sm:$0xff] %v11294_v37  ;;  %v11314_v3 = vpop.f32.mrf.mxu0  ;;  %4387 = vmatmul.bf16.gmra.mxu1 %v4166_v47  ;;  %v4172_v61 = vshrl.u32 %v4037_v60, 16  ;;  %v4175_v28 = vshll.u32 %v4037_v60, 16  ;;  %v11336_v37 = vpop.permute.xlu2 %3222 }
 0x2d1   : > { %v3112_v51 = vadd.f32 %v11113_v52, %v3093_v63  ;;  %v11319_v50 = vpop.f32.mrf.mxu3  ;;  %3983 = vmatmul.bf16.gmra.mxu2 %v11006_v41  ;;  %3278 = vadd.xlane.f32.xlu2 %v3258_v20  ;;  %v4182_v32 = vor.u32 %v4181_v18, %v4180_v58 }
 0x2d2   : > { %v4174_v58 = vrot.slane %v4172_v61, 2  ;;  %v4177_v18 = vrot.slane %v4175_v28, 3  ;;  %v9160_v61 = vld [vmem:[#allocation2 + $0x54] sm:$0xf0] }
 0x2d3   : > { %v3128_v41 = vmax.f32 %v3112_v51, 0.0  ;;  %5014 = vmatpush.bf16.msrb.mxu1 %v8724_v62  ;;  %v11346_v51 = vadd.f32 %v10894_v31, %v11040_v55  ;;  %v4183_v62 = vsel %vm2098_vm2, %v11270_v21, %v4182_v32  ;;  %v8722_v55 = vld [vmem:[%s12653_s4 + $0x250] sm:$0xff] }
 0x2d4   : > { %v3063_v16 = vpop.f32.mrf.mxu2  ;;  %v11368_v21 = vld [vmem:[#allocation2 + $0x54] sm:$0xff]  }
 0x2d5   : > { %v3064_v63 = vadd.f32 %v3063_v16, %v11159_v33  ;;  %v3802_v47 = vpop.f32.mrf.mxu1  ;;  %v3240_v20 = vmul.f32 %v11128_v14, %v3128_v41  ;;  %v11357_v41 = vpop.permute.xlu1 %3232 }
 0x2d6   : > { %v11339_v4 = vadd.f32 %v3802_v47, %v11230_v56  ;;  %v11362_v16 = vpop.permute.xlu0 %5141 }
 0x2d7   : > { %v3094_v33 = vadd.f32 %v3064_v63, %v11078_v42  ;;  %v3259_v14 = vmul.f32 %v11135_v17, %v3240_v20  ;;  %5015 = vmatpush.bf16.msrb.mxu1 %v8723_v1  ;;  %v11365_v20 = vor.u32 %v4177_v18, %v4174_v58  ;;  %v9059_v1 = vld [vmem:[#allocation2 + $0x70] sm:$0xff]  ;;  %v12763_v58 = vshrl.u32 %v11255_v30, 16  ;;  %v8754_v30 = vld [vmem:[%s12653_s4 + $0xb8] sm:$0xff] }
 0x2d8   : > { %v11350_v46 = vpop.f32.mrf.mxu0  ;;  %5587 = vmatpush.bf16.msrb.mxu3 %v8754_v30 }
 0x2d9   : > { %v3113_v60 = vadd.f32 %v11113_v52, %v3094_v33  ;;  %v11353_v56 = vpop.f32.mrf.mxu3  ;;  %3280 = vadd.xlane.f32.xlu0 %v3259_v14  ;;  %v8721_v33 = vld [vmem:[%s12653_s4 + $0x248] sm:$0xff]  ;;  %v4040_v18 = vor.u32 %v12763_v58, %v11296_v53  ;;  %v8720_v53 = vld [vmem:[%s12653_s4 + $0x240] sm:$0xff]  ;;  %v11417_v58 = vadd.f32 %v10967_v5, %v11087_v12 }
 0x2db   : > { %v3129_v31 = vmax.f32 %v3113_v60, 0.0  ;;  %4348 = vmatmul.bf16.gmra.mxu0 %v4183_v62  ;;  %5016 = vmatpush.bf16.msrb.mxu1 %v8722_v55  ;;  %v9161_v60 = vld [vmem:[#allocation2 + $0x54] sm:$0xe]  ;;  %v11388_v62 = vpop.permute.xlu2 %5126 }
 0x2dc   : > { %v3065_v42 = vpop.f32.mrf.mxu2 }
 0x2dd   : > { %v3066_v63 = vadd.f32 %v3065_v42, %v11197_v25  ;;  %v3805_v47 = vpop.f32.mrf.mxu1  ;;  %v3241_v28 = vmul.f32 %v11208_v36, %v3129_v31  ;;  %v11378_v25 = vadd.f32 %v10931_v0, %v11066_v44  ;;  %v4179_v36 = vsel %vm2098_vm2, %v11281_v15, %v11365_v20  ;;  %v11402_v15 = vld [vmem:[#allocation2 + $0x5c] sm:$0xff] }
 0x2de   : > { %v11371_v32 = vadd.f32 %v3805_v47, %v11268_v8  ;;  %3949 = vmatmul.bf16.gmra.mxu3 %v9059_v1  ;;  %v4185_v42 = vshrl.u32 %v4040_v18, 16  ;;  %v9162_v47 = vor.u32 %v9161_v60, %v9160_v61 }
 0x2df   : > { %v3095_v14 = vadd.f32 %v3066_v63, %v11107_v45  ;;  %v3260_v8 = vmul.f32 %v11135_v17, %v3241_v28  ;;  %v8711_v45 = vld [vmem:[%s12653_s4 + $0x1f8] sm:$0xff]  ;;  %5017 = vmatpush.bf16.msrb.mxu1 %v8721_v33  ;;  %v4188_v63 = vshll.u32 %v4040_v18, 16  ;;  %v11407_v28 = vpop.permute.xlu1 %5136  ;;  %v11419_v18 = vpop.permute.xlu0 %5156 }
 0x2e0   : > { %v11390_v31 = vpop.f32.mrf.mxu0  ;;  %4392 = vmatmul.bf16.gmra.mxu1 %v4179_v36  ;;  %4740 = vmatpush.bf16.msrb.mxu2 %v8711_v45 }
 0x2e1   : > { %v3114_v0 = vadd.f32 %v11113_v52, %v3095_v14  ;;  %v11393_v44 = vpop.f32.mrf.mxu3  ;;  %3988 = vmatmul.bf16.gmra.mxu2 %v11046_v29  ;;  %3282 = vadd.xlane.f32.xlu1 %v3260_v8  ;;  %v4842_v8 = vrot.slane %v11402_v15, 1 }
 0x2e3   : > { %v3130_v55 = vmax.f32 %v3114_v0, 0.0  ;;  %5018 = vmatpush.bf16.msrb.mxu1 %v8720_v53  ;;  %v4190_v0 = vrot.slane %v4188_v63, 3  ;;  %v11428_v53 = vpop.permute.xlu2 %5146 }
 0x2e4   : > { %v3068_v29 = vpop.f32.mrf.mxu2 }
 0x2e5   : > { %v3069_v1 = vadd.f32 %v3068_v29, %v11236_v59  ;;  %v3807_v14 = vpop.f32.mrf.mxu1  ;;  %v3242_v36 = vmul.f32 %v11242_v2, %v3130_v55  ;;  %v4187_v59 = vrot.slane %v4185_v42, 2  ;;  %v4841_v2 = vrot.slane %v9162_v47, 1  ;;  %v8710_v55 = vld [vmem:[%s12653_s4 + $0x1f0] sm:$0xff] }
 0x2e6   : > { %v11412_v33 = vadd.f32 %v3807_v14, %v11314_v3  ;;  %4741 = vmatpush.bf16.msrb.mxu2 %v8710_v55  ;;  %v9060_v14 = vld [vmem:[#allocation2 + $0x78] sm:$0xff] }
 0x2e7   : > { %v3096_v61 = vadd.f32 %v3069_v1, %v11139_v19  ;;  %v3261_v60 = vmul.f32 %v11135_v17, %v3242_v36  ;;  %v11431_v5 = vsel %vm1555_vm0, %v4841_v2, %v4842_v8  ;;  %v4191_v19 = vor.u32 %v4190_v0, %v4187_v59  ;;  %v8709_v36 = vld [vmem:[%s12653_s4 + $0x1e8] sm:$0xff] }
 0x2e8   : > { %v11423_v45 = vpop.f32.mrf.mxu0 }
 0x2e9   : > { %v3115_v3 = vadd.f32 %v11113_v52, %v3096_v61  ;;  %v11426_v30 = vpop.f32.mrf.mxu3  ;;  %3284 = vadd.xlane.f32.xlu2 %v3261_v60  ;;  %v11445_v61 = vpop.permute.xlu1 %5151 }
 0x2ea   : > { %4742 = vmatpush.bf16.msrb.mxu2 %v8709_v36 }
 0x2eb   : > { %v3131_v12 = vmax.f32 %v3115_v3, 0.0  ;;  %4970 = vmatmul.bf16.vlgmr.msrb.gmra.mxu0 %v11431_v5  ;;  %v11462_v3 = vld [vmem:[#allocation2 + $0x64] sm:$0xff] }
 0x2ec   : > { %v3070_v42 = vpop.f32.mrf.mxu2 }
 0x2ed   : > { %v3071_v63 = vadd.f32 %v3070_v42, %v11275_v7  ;;  %v3810_v29 = vpop.f32.mrf.mxu1  ;;  %v3243_v47 = vmul.f32 %v11178_v10, %v3131_v12  ;;  %v4192_v7 = vsel %vm2098_vm2, %v11365_v20, %v4191_v19  ;;  %v8708_v20 = vld [vmem:[%s12653_s4 + $0x1e0] sm:$0xff]  ;;  %v11467_v19 = vpop.permute.xlu2 %5161 }
 0x2ee   : > { %v11440_v1 = vadd.f32 %v3810_v29, %v11350_v46  ;;  %3954 = vmatmul.bf16.gmra.mxu3 %v9060_v14  ;;  %v11453_v46 = vpop.permute.xlu0 %5171  ;;  %4743 = vmatpush.bf16.msrb.mxu2 %v8708_v20  ;;  %v8707_v14 = vld [vmem:[%s12653_s4 + $0x1d8] sm:$0xff] }
 0x2ef   : > { %v3097_v60 = vadd.f32 %v3071_v63, %v11188_v24  ;;  %v3262_v59 = vmul.f32 %v11135_v17, %v3243_v47  ;;  %v8753_v24 = vld [vmem:[%s12653_s4 + $0xb0] sm:$0xff]  ;;  %v4844_v47 = vrot.slane %v11462_v3, 1 }
 0x2f0   : > { %v11451_v10 = vpop.f32.mrf.mxu0  ;;  %4397 = vmatmul.bf16.gmra.mxu1 %v4192_v7  ;;  %5588 = vmatpush.bf16.msrb.mxu3 %v8753_v24 }
 0x2f1   : > { %v3116_v0 = vadd.f32 %v11113_v52, %v3097_v60  ;;  %v11456_v2 = vpop.f32.mrf.mxu3  ;;  %3993 = vmatmul.bf16.gmra.mxu2 %v11094_v9  ;;  %3286 = vadd.xlane.f32.xlu0 %v3262_v59  ;;  %v11480_v59 = vpop.permute.xlu1 %5166 }
 0x2f2   : > { %4744 = vmatpush.bf16.msrb.mxu2 %v8707_v14 }
 0x2f3   : > { %v3132_v12 = vmax.f32 %v3116_v0, 0.0 }
 0x2f4   : > { %v3073_v55 = vpop.f32.mrf.mxu2 }
 0x2f5   : > { %v3074_v42 = vadd.f32 %v3073_v55, %v11319_v50  ;;  %v3812_v9 = vpop.f32.mrf.mxu1  ;;  %v3244_v63 = vmul.f32 %v11264_v49, %v3132_v12 }
 0x2f6   : > { %v11472_v29 = vadd.f32 %v3812_v9, %v11390_v31  ;;  %v4845_v31 = vsel %vm1555_vm0, %v4842_v8, %v4844_v47  ;;  %v11486_v0 = vpop.permute.xlu0 %5186  ;;  %v11493_v9 = vpop.permute.xlu2 %5176  ;;  %v8705_v8 = vld [vmem:[%s12653_s4 + $0x1c8] sm:$0xff] }
 0x2f7   : > { %v3098_v36 = vadd.f32 %v3074_v42, %v11221_v40  ;;  %v3263_v60 = vmul.f32 %v11135_v17, %v3244_v63  ;;  %12764 = vst [vmem:[#allocation29_spill] sm:$0xff] %v11486_v0  ;;  %v8706_v40 = vld [vmem:[%s12653_s4 + $0x1d0] sm:$0xff] }
 0x2f8   : > { %v4319_v7 = vpop.f32.mrf.mxu0  ;;  %12765 = vst [vmem:[#allocation38_spill] sm:$0xff] %v11493_v9  ;;  %4745 = vmatpush.bf16.msrb.mxu2 %v8706_v40 }
 0x2f9   : > { %v3117_v50 = vadd.f32 %v11113_v52, %v3098_v36  ;;  %v11483_v49 = vpop.f32.mrf.mxu3  ;;  %3288 = vadd.xlane.f32.xlu1 %v3263_v60 }
 0x2fb   : > { %v3133_v24 = vmax.f32 %v3117_v50, 0.0  ;;  %4975 = vmatmul.bf16.gmra.mxu0 %v4845_v31 }
 0x2fc   : > { %v3075_v20 = vpop.f32.mrf.mxu2  ;;  %4746 = vmatpush.bf16.msrb.mxu2 %v8705_v8 }
 0x2fd   : > { %v3076_v12 = vadd.f32 %v3075_v20, %v11353_v56  ;;  %v4363_v55 = vpop.f32.mrf.mxu1  ;;  %v3245_v42 = vmul.f32 %v11289_v26, %v3133_v24  ;;  %v11513_v24 = vld [vmem:[#allocation2 + $0x6c] sm:$0xff] }
 0x2fe   : > { %v11496_v63 = vadd.f32 %v4363_v55, %v11423_v45  ;;  %4699 = vmatmul.bf16.vlgmr.msra.gmra.mxu3 %v11368_v21  ;;  %v8752_v45 = vld [vmem:[%s12653_s4 + $0xa8] sm:$0xff]  ;;  %v11520_v20 = vpop.permute.xlu0 %5201  ;;  %v4846_v8 = vrot.slane %v11513_v24, 1 }
 0x2ff   : > { %v3099_v14 = vadd.f32 %v3076_v12, %v11262_v35  ;;  %v3264_v36 = vmul.f32 %v11135_v17, %v3245_v42  ;;  %v8704_v35 = vld [vmem:[%s12653_s4 + $0x1c0] sm:$0xff]  ;;  %5589 = vmatpush.bf16.msrb.mxu3 %v8752_v45  ;;  %12767 = vst [vmem:[#allocation33_spill] sm:$0xff] %v11520_v20 }
 0x300   : > { %v4321_v56 = vpop.f32.mrf.mxu0  ;;  %5019 = vmatmul.bf16.vlgmr.msrb.gmra.mxu1 %v11431_v5  ;;  %v11518_v5 = vpop.permute.xlu1 %5181  ;;  %4747 = vmatpush.bf16.msrb.mxu2 %v8704_v35 }
 0x301   : > { %v3118_v26 = vadd.f32 %v11113_v52, %v3099_v14  ;;  %v3920_v60 = vpop.f32.mrf.mxu3  ;;  %3998 = vmatmul.bf16.gmra.mxu2 %v11156_v57  ;;  %3290 = vadd.xlane.f32.xlu2 %v3264_v36  ;;  %12766 = vst [vmem:[#allocation32_spill] sm:$0xff] %v11518_v5 }
 0x302   : > { %v11511_v50 = vadd.f32 %v3920_v60, %v10992_v48 }
 0x303   : > { %v3134_v40 = vmax.f32 %v3118_v26, 0.0  ;;  %v11530_v26 = vpop.permute.xlu2 %5191 }
 0x304   : > { %v3078_v57 = vpop.f32.mrf.mxu2  ;;  %12768 = vst [vmem:[#allocation17_spill] sm:$0xff] %v11530_v26 }
 0x305   : > { %v3079_v12 = vadd.f32 %v3078_v57, %v11393_v44  ;;  %v4365_v55 = vpop.f32.mrf.mxu1  ;;  %v3246_v48 = vmul.f32 %v11223_v27, %v3134_v40  ;;  %v4847_v27 = vsel %vm1555_vm0, %v4844_v47, %v4846_v8 }
 0x306   : > { %v11525_v42 = vadd.f32 %v4365_v55, %v11451_v10 }
 0x307   : > { %v3100_v14 = vadd.f32 %v3079_v12, %v11307_v11  ;;  %v3265_v36 = vmul.f32 %v11135_v17, %v3246_v48  ;;  %v11544_v48 = vpop.permute.xlu0 %6641 }
 0x308   : > { %v4324_v60 = vpop.f32.mrf.mxu0  ;;  %v11537_v35 = vpop.permute.xlu1 %5196  ;;  %12770 = vst [vmem:[#allocation35_spill] sm:$0xff] %v11544_v48 }
 0x309   : > { %v3119_v45 = vadd.f32 %v11113_v52, %v3100_v14  ;;  %v3922_v20 = vpop.f32.mrf.mxu3  ;;  %3292 = vadd.xlane.f32.xlu0 %v3265_v36  ;;  %12769 = vst [vmem:[#allocation15_spill] sm:$0xff] %v11537_v35 }
 0x30a   : > { %v11534_v44 = vadd.f32 %v3922_v20, %v11021_v43  ;;  %v8751_v20 = vld [vmem:[%s12653_s4 + $0xa0] sm:$0xff] }
 0x30b   : > { %v3135_v10 = vmax.f32 %v3119_v45, 0.0  ;;  %4980 = vmatmul.bf16.gmra.mxu0 %v4847_v27  ;;  %v11555_v36 = vpop.permute.xlu2 %6646  ;;  %v11560_v45 = vld [vmem:[#allocation2 + $0x74] sm:$0xff]  ;;  %5590 = vmatpush.bf16.msrb.mxu3 %v8751_v20  ;;  %v4495_v20 = vshll.u32 %v11402_v15, 16 }
 0x30c   : > { %v3080_v40 = vpop.f32.mrf.mxu2  ;;  %12772 = vst [vmem:[#allocation34_spill] sm:$0xff] %v11555_v36 }
 0x30d   : > { %v3081_v11 = vadd.f32 %v3080_v40, %v11426_v30  ;;  %v4368_v57 = vpop.f32.mrf.mxu1  ;;  %v3247_v12 = vmul.f32 %v11316_v13, %v3135_v10 }
 0x30e   : > { %v11541_v55 = vadd.f32 %v4368_v57, %v4319_v7  ;;  %4704 = vmatmul.bf16.gmra.mxu3 %v11402_v15  ;;  %v12771_v7 = vld [vmem:[#allocation20_spill] sm:$0xff] }
 0x30f   : > { %v3101_v43 = vadd.f32 %v3081_v11, %v11346_v51  ;;  %v3266_v47 = vmul.f32 %v11135_v17, %v3247_v12 }
 0x310   : > { %5024 = vmatmul.bf16.gmra.mxu1 %v4845_v31  ;;  %v11552_v14 = vpop.f32.mrf.mxu0 }
 0x311   : > { %v3120_v30 = vadd.f32 %v11113_v52, %v3101_v43  ;;  %v3925_v13 = vpop.f32.mrf.mxu3  ;;  %4003 = vmatmul.bf16.gmra.mxu2 %v12771_v7  ;;  %3294 = vadd.xlane.f32.xlu1 %v3266_v47  ;;  %v12698_v43 = vrot.slane %v11560_v45, 1  ;;  %v4490_v47 = vshll.u32 %v11368_v21, 16  ;;  %v11568_v7 = vpop.permute.xlu1 %6636 }
 0x312   : > { %v11558_v51 = vadd.f32 %v3925_v13, %v11036_v22  ;;  %12773 = vst [vmem:[#allocation36_spill] sm:$0xff] %v11568_v7  ;;  %v12789_v7 = vld [vmem:[#allocation12_spill] sm:$0xff] }
 0x313   : > { %v3136_v10 = vmax.f32 %v3120_v30, 0.0 }
 0x314   : > { %v3083_v40 = vpop.f32.mrf.mxu2 }
 0x315   : > { %v3084_v31 = vadd.f32 %v3083_v40, %v11456_v2  ;;  %v4370_v11 = vpop.f32.mrf.mxu1  ;;  %v3248_v57 = vmul.f32 %v11336_v37, %v3136_v10  ;;  %v11574_v2 = vpop.permute.xlu0 %6651  ;;  %v4492_v10 = vrot.slane %v4490_v47, 1 }
 0x316   : > { %v11564_v12 = vadd.f32 %v4370_v11, %v4321_v56  ;;  %12774 = vst [vmem:[#allocation18_spill] sm:$0xff] %v11574_v2  ;;  %v11586_v11 = vpop.permute.xlu2 %6661  ;;  %v4497_v2 = vrot.slane %v4495_v20, 1 }
 0x317   : > { %v3102_v22 = vadd.f32 %v3084_v31, %v11378_v25  ;;  %v3267_v13 = vmul.f32 %v11135_v17, %v3248_v57  ;;  %v11583_v25 = vsel %vm1555_vm0, %v4846_v8, %v12698_v43  ;;  %12775 = vst [vmem:[#allocation37_spill] sm:$0xff] %v11586_v11 }
 0x318   : > { %v4329_v31 = vpop.f32.mrf.mxu0 }
 0x319   : > { %v3121_v37 = vadd.f32 %v11113_v52, %v3102_v22  ;;  %v3927_v56 = vpop.f32.mrf.mxu3  ;;  %3296 = vadd.xlane.f32.xlu2 %v3267_v13  ;;  %v4488_v22 = vshrl.u32 %v11368_v21, 16  ;;  %v8750_v21 = vld [vmem:[%s12653_s4 + $0x98] sm:$0xff] }
 0x31a   : > { %v11578_v30 = vadd.f32 %v3927_v56, %v11064_v6  ;;  %5591 = vmatpush.bf16.msrb.mxu3 %v8750_v21 }
 0x31b   : > { %v3137_v40 = vmax.f32 %v3121_v37, 0.0  ;;  %4985 = vmatmul.bf16.gmra.mxu0 %v11583_v25  ;;  %v4493_v47 = vor.u32 %v4492_v10, %v4488_v22  ;;  %v11606_v10 = vld [vmem:[#allocation3] ss:$0 sm:$0xff] }
 0x31c   : > { %v3085_v57 = vpop.f32.mrf.mxu2 }
 0x31d   : > { %v3086_v6 = vadd.f32 %v3085_v57, %v11483_v49  ;;  %v4373_v13 = vpop.f32.mrf.mxu1  ;;  %v3249_v56 = vmul.f32 %v11272_v38, %v3137_v40  ;;  %v4498_v20 = vsel %vm1427_vm1, %v4493_v47, %v4497_v2  ;;  %v11603_v49 = vpop.permute.xlu1 %6656  ;;  %v11611_v40 = vld [vmem:[#allocation2 + $0x7c] sm:$0xff] }
 0x31e   : > { %v11594_v8 = vadd.f32 %v4373_v13, %v4324_v60  ;;  %4709 = vmatmul.bf16.gmra.mxu3 %v11462_v3  ;;  %12776 = vst [vmem:[#allocation16_spill] sm:$0xff] %v11603_v49  ;;  %v11613_v57 = vpop.permute.xlu0 %6666 }
 0x31f   : > { %v3103_v37 = vadd.f32 %v3086_v6, %v11417_v58  ;;  %v3268_v43 = vmul.f32 %v11135_v17, %v3249_v56  ;;  %12777 = vst [vmem:[#allocation20_spill] sm:$0xff] %v11613_v57 }
 0x320   : > { %5029 = vmatmul.bf16.gmra.mxu1 %v4847_v27 }
 0x321   : > { %v3122_v38 = vadd.f32 %v11113_v52, %v3103_v37  ;;  %v3930_v60 = vpop.f32.mrf.mxu3  ;;  %4748 = vmatmul.bf16.vlgmr.msrb.gmra.mxu2 %v4498_v20  ;;  %3298 = vadd.xlane.f32.xlu0 %v3268_v43  ;;  %v4331_v43 = vpop.f32.mrf.mxu0  ;;  %v4850_v37 = vrot.slane %v11611_v40, 1 }
 0x322   : > { %v11609_v58 = vadd.f32 %v3930_v60, %v11083_v23  ;;  %v12778_v60 = vld [vmem:[#allocation27_spill] sm:$0xff] }
 0x323   : > { %v3138_v27 = vmax.f32 %v3122_v38, 0.0  ;;  %v4503_v38 = vshll.u32 %v11462_v3, 16 }
 0x324   : > { %v3969_v22 = vpop.f32.mrf.mxu2  ;;  %v3271_v52 = vpop.xlane.xlu2 %3270 }
 0x325   : > { %v3970_v6 = vadd.f32 %v3969_v22, %v11511_v50  ;;  %v3305_v23 = vadd.f32 %v11606_v10, %v3271_v52  ;;  %v4375_v13 = vpop.f32.mrf.mxu1  ;;  %v3250_v56 = vmul.f32 %v11357_v41, %v3138_v27  ;;  %v12779_v41 = vrot.slane %v11560_v45, 1  ;;  %v11640_v27 = vpop.permute.xlu1 %6671 }
 0x326   : > { %v11624_v47 = vadd.f32 %v4375_v13, %v11552_v14  ;;  %12780 = vst [vmem:[#allocation27_spill] sm:$0xff] %v11640_v27 }
 0x327   : > { %v11628_v21 = vadd.f32 %v11496_v63, %v3970_v6  ;;  %3322 = vst.msk [vmem:[%s11618_s11] sm:$0xff] %vm3321_vm3, %v3305_v23  ;;  %v3269_v20 = vmul.f32 %v11135_v17, %v3250_v56  ;;  %v4851_v14 = vsel %vm1555_vm0, %v12779_v41, %v4850_v37  ;;  %v4499_v6 = vshrl.u32 %v11402_v15, 16  ;;  %v8745_v15 = vld [vmem:[%s12653_s4 + $0x78] sm:$0xff] }
 0x328   : > { %v4505_v17 = vrot.slane %v4503_v38, 1  ;;  %5770 = vmatpush.bf16.msra.mxu0 %v8745_v15  ;;  %v12781_v38 = vld [vmem:[#allocation28_spill] sm:$0xff] }
 0x329   : > { %v3932_v50 = vpop.f32.mrf.mxu3  ;;  %3300 = vadd.xlane.f32.xlu1 %v3269_v20 }
 0x32a   : > { %v11635_v22 = vadd.f32 %v3932_v50, %v12778_v60  ;;  %v4501_v50 = vor.u32 %v4499_v6, %v4497_v2  ;;  %v4334_v60 = vpop.f32.mrf.mxu0 }
 0x32b   : > { %4990 = vmatmul.bf16.gmra.mxu0 %v4851_v14 }
 0x32c   : > { %v3971_v63 = vpop.f32.mrf.mxu2  ;;  %v3273_v52 = vpop.xlane.xlu0 %3272 }
 0x32d   : > { %v3972_v23 = vadd.f32 %v3971_v63, %v11534_v44  ;;  %v3306_v13 = vadd.f32 %v11606_v10, %v3273_v52  ;;  %v4378_v56 = vpop.f32.mrf.mxu1  ;;  %v8749_v44 = vld [vmem:[%s12653_s4 + $0x90] sm:$0xff] }
 0x32e   : > { %v11645_v20 = vadd.f32 %v4378_v56, %v4329_v31  ;;  %4714 = vmatmul.bf16.gmra.mxu3 %v11513_v24  ;;  %v4506_v31 = vsel %vm1427_vm1, %v4501_v50, %v4505_v17 }
 0x32f   : > { %v11649_v41 = vadd.f32 %v11525_v42, %v3972_v23  ;;  %3323 = vst.msk [vmem:[%s11618_s11 + $0x8] sm:$0xff] %vm3321_vm3, %v3306_v13  ;;  %v8744_v42 = vld [vmem:[%s12653_s4 + $0x70] sm:$0xff]  ;;  %5592 = vmatpush.bf16.msrb.mxu3 %v8749_v44  ;;  %v11667_v23 = vld [vmem:[#allocation2 + $0x84] sm:$0xff] }
 0x330   : > { %5034 = vmatmul.bf16.gmra.mxu1 %v11583_v25  ;;  %5771 = vmatpush.bf16.msra.mxu0 %v8744_v42  ;;  %v8743_v44 = vld [vmem:[%s12653_s4 + $0x68] sm:$0xff] }
 0x331   : > { %v3935_v2 = vpop.f32.mrf.mxu3  ;;  %4753 = vmatmul.bf16.gmra.mxu2 %v4506_v31  ;;  %v4852_v31 = vrot.slane %v11667_v23, 1 }
 0x332   : > { %v11665_v63 = vadd.f32 %v3935_v2, %v12781_v38  ;;  %v4511_v2 = vshll.u32 %v11513_v24, 16 }
 0x333   : > { %v11690_v42 = vsel %vm1555_vm0, %v4850_v37, %v4852_v31 }
 0x334   : > { %v3974_v52 = vpop.f32.mrf.mxu2  ;;  %v3275_v6 = vpop.xlane.xlu1 %3274  ;;  %5772 = vmatpush.bf16.msra.mxu0 %v8743_v44 }
 0x335   : > { %v3975_v25 = vadd.f32 %v3974_v52, %v11558_v51  ;;  %v3307_v13 = vadd.f32 %v11606_v10, %v3275_v6  ;;  %v4380_v56 = vpop.f32.mrf.mxu1  ;;  %v4336_v51 = vpop.f32.mrf.mxu0 }
 0x336   : > { %v11671_v50 = vadd.f32 %v4380_v56, %v4331_v43  ;;  %v8742_v43 = vld [vmem:[%s12653_s4 + $0x60] sm:$0xff] }
 0x337   : > { %v11674_v15 = vadd.f32 %v11541_v55, %v3975_v25  ;;  %3324 = vst.msk [vmem:[%s11618_s11 + $0x10] sm:$0xff] %vm3321_vm3, %v3307_v13  ;;  %v4507_v25 = vshrl.u32 %v11462_v3, 16  ;;  %v4513_v13 = vrot.slane %v4511_v2, 1  ;;  %v8741_v3 = vld [vmem:[%s12653_s4 + $0x58] sm:$0xff] }
 0x338   : > { %5773 = vmatpush.bf16.msra.mxu0 %v8742_v43 }
 0x339   : > { %v3937_v38 = vpop.f32.mrf.mxu3 }
 0x33a   : > { %v11687_v55 = vadd.f32 %v3937_v38, %v11182_v34  ;;  %v4509_v34 = vor.u32 %v4507_v25, %v4505_v17  ;;  %v12782_v17 = vld [vmem:[#allocation31_spill] sm:$0xff] }
 0x33b   : > { %4995 = vmatmul.bf16.gmra.mxu0 %v11690_v42  ;;  %v11717_v38 = vld [vmem:[#allocation2 + $0x8c] sm:$0xff] }
 0x33c   : > { %v3976_v52 = vpop.f32.mrf.mxu2  ;;  %v3277_v6 = vpop.xlane.xlu2 %3276  ;;  %5774 = vmatpush.bf16.msra.mxu0 %v8741_v3  ;;  %v4854_v3 = vrot.slane %v11717_v38, 1 }
 0x33d   : > { %v3977_v56 = vadd.f32 %v3976_v52, %v11578_v30  ;;  %v3308_v44 = vadd.f32 %v11606_v10, %v3277_v6  ;;  %v4383_v27 = vpop.f32.mrf.mxu1  ;;  %v8748_v30 = vld [vmem:[%s12653_s4 + $0x88] sm:$0xff]  ;;  %v4339_v43 = vpop.f32.mrf.mxu0 }
 0x33e   : > { %v11696_v57 = vadd.f32 %v4383_v27, %v4334_v60  ;;  %4719 = vmatmul.bf16.gmra.mxu3 %v11560_v45  ;;  %v4514_v27 = vsel %vm1427_vm1, %v4509_v34, %v4513_v13 }
 0x33f   : > { %v11700_v37 = vadd.f32 %v11564_v12, %v3977_v56  ;;  %3325 = vst.msk [vmem:[%s11618_s11 + $0x18] sm:$0xff] %vm3321_vm3, %v3308_v44  ;;  %v8740_v12 = vld [vmem:[%s12653_s4 + $0x50] sm:$0xff]  ;;  %5593 = vmatpush.bf16.msrb.mxu3 %v8748_v30 }
 0x340   : > { %5039 = vmatmul.bf16.gmra.mxu1 %v4851_v14  ;;  %v8770_v14 = vld [vmem:[%s12653_s4 + $0x138] sm:$0xff]  ;;  %5775 = vmatpush.bf16.msra.mxu0 %v8740_v12 }
 0x341   : > { %v3940_v60 = vpop.f32.mrf.mxu3  ;;  %4758 = vmatmul.bf16.gmra.mxu2 %v4514_v27  ;;  %6035 = vmatpush.bf16.msra.mxu1 %v8770_v14  ;;  %v8739_v27 = vld [vmem:[%s12653_s4 + $0x48] sm:$0xff] }
 0x342   : > { %v11715_v2 = vadd.f32 %v3940_v60, %v12782_v17  ;;  %v4519_v60 = vshll.u32 %v11560_v45, 16  ;;  %v11746_v17 = vsel %vm1555_vm0, %v4852_v31, %v4854_v3  ;;  %v8768_v14 = vld [vmem:[%s12653_s4 + $0x128] sm:$0xff] }
 0x344   : > { %v3979_v52 = vpop.f32.mrf.mxu2  ;;  %v3279_v6 = vpop.xlane.xlu2 %3278  ;;  %5776 = vmatpush.bf16.msra.mxu0 %v8739_v27 }
 0x345   : > { %v3980_v25 = vadd.f32 %v3979_v52, %v11609_v58  ;;  %v3309_v56 = vadd.f32 %v11606_v10, %v3279_v6  ;;  %v4385_v44 = vpop.f32.mrf.mxu1  ;;  %v8769_v58 = vld [vmem:[%s12653_s4 + $0x130] sm:$0xff]  ;;  %v4341_v27 = vpop.f32.mrf.mxu0 }
 0x346   : > { %v11724_v34 = vadd.f32 %v4385_v44, %v4336_v51  ;;  %6036 = vmatpush.bf16.msra.mxu1 %v8769_v58  ;;  %v4435_v52 = vld [vmem:[#allocation2 + $0x94] sm:$0x1]  ;;  %v4521_v44 = vrot.slane %v4519_v60, 1 }
 0x347   : > { %v11728_v30 = vadd.f32 %v11594_v8, %v3980_v25  ;;  %3326 = vst.msk [vmem:[%s11618_s11 + $0x20] sm:$0xff] %vm3321_vm3, %v3309_v56  ;;  %v8738_v8 = vld [vmem:[%s12653_s4 + $0x40] sm:$0xff]  ;;  %v4515_v56 = vshrl.u32 %v11513_v24, 16  ;;  %v4485_v49 = vunpack.c.l.b16 %v4435_v52 }
 0x348   : > { %5777 = vmatpush.bf16.msra.mxu0 %v8738_v8  ;;  %v8767_v24 = vld [vmem:[%s12653_s4 + $0x120] sm:$0xff] }
 0x349   : > { %v3942_v12 = vpop.f32.mrf.mxu3  ;;  %v4517_v11 = vor.u32 %v4515_v56, %v4513_v13  ;;  %v11774_v8 = vpack.c.b16 %v4485_v49, %v4485_v49 }
 0x34a   : > { %v11743_v51 = vadd.f32 %v3942_v12, %v11253_v39  ;;  %6037 = vmatpush.bf16.msra.mxu1 %v8768_v14  ;;  %v8766_v14 = vld [vmem:[%s12653_s4 + $0x118] sm:$0xff] }
 0x34b   : > { %5000 = vmatmul.bf16.gmra.mxu0 %v11746_v17 }
 0x34c   : > { %v3981_v6 = vpop.f32.mrf.mxu2  ;;  %v3281_v25 = vpop.xlane.xlu0 %3280 }
 0x34d   : > { %v3982_v39 = vadd.f32 %v3981_v6, %v11635_v22  ;;  %v3310_v58 = vadd.f32 %v11606_v10, %v3281_v25  ;;  %v4388_v31 = vpop.f32.mrf.mxu1  ;;  %v8747_v22 = vld [vmem:[%s12653_s4 + $0x80] sm:$0xff] }
 0x34e   : > { %v11755_v12 = vadd.f32 %v4388_v31, %v4339_v43  ;;  %4724 = vmatmul.bf16.gmra.mxu3 %v11611_v40  ;;  %v4522_v43 = vsel %vm1427_vm1, %v4517_v11, %v4521_v44  ;;  %6038 = vmatpush.bf16.msra.mxu1 %v8767_v24  ;;  %v8765_v31 = vld [vmem:[%s12653_s4 + $0x110] sm:$0xff] }
 0x34f   : > { %v11759_v36 = vadd.f32 %v11624_v47, %v3982_v39  ;;  %3327 = vst.msk [vmem:[%s11618_s11 + $0x28] sm:$0xff] %vm3321_vm3, %v3310_v58  ;;  %v12783_v47 = vld [vmem:[#allocation30_spill] sm:$0xff]  ;;  %5594 = vmatpush.bf16.msrb.mxu3 %v8747_v22  ;;  %v4856_v39 = vrot.slane %v11774_v8, 1  ;;  %v4344_v58 = vpop.f32.mrf.mxu0  ;;  %v4523_v22 = vshrl.u32 %v11560_v45, 16 }
 0x350   : > { %5044 = vmatmul.bf16.gmra.mxu1 %v11690_v42 }
 0x351   : > { %v3945_v60 = vpop.f32.mrf.mxu3  ;;  %4763 = vmatmul.bf16.gmra.mxu2 %v4522_v43  ;;  %v4527_v43 = vshll.u32 %v11611_v40, 16 }
 0x352   : > { %v11772_v13 = vadd.f32 %v3945_v60, %v12783_v47  ;;  %6039 = vmatpush.bf16.msra.mxu1 %v8766_v14  ;;  %v11804_v60 = vld [vmem:[#allocation2 + $0x80] sm:$0xff]  }
 0x354   : > { %v3984_v52 = vpop.f32.mrf.mxu2  ;;  %v3283_v6 = vpop.xlane.xlu1 %3282 }
 0x355   : > { %v3985_v42 = vadd.f32 %v3984_v52, %v11665_v63  ;;  %v3311_v11 = vadd.f32 %v11606_v10, %v3283_v6  ;;  %v4390_v25 = vpop.f32.mrf.mxu1 }
 0x356   : > { %v11781_v56 = vadd.f32 %v4390_v25, %v4341_v27  ;;  %6040 = vmatpush.bf16.msra.mxu1 %v8765_v31  ;;  %v11796_v27 = vsel %vm1555_vm0, %v4854_v3, %v4856_v39  ;;  %v8762_v39 = vld [vmem:[%s12653_s4 + $0xf8] sm:$0xff] }
 0x357   : > { %v11785_v49 = vadd.f32 %v11645_v20, %v3985_v42  ;;  %3328 = vst.msk [vmem:[%s11618_s11 + $0x30] sm:$0xff] %vm3321_vm3, %v3311_v11  ;;  %v8764_v20 = vld [vmem:[%s12653_s4 + $0x108] sm:$0xff]  ;;  %v4529_v42 = vrot.slane %v4527_v43, 1  ;;  %v5339_v11 = vshll.u32 %v11804_v60, 16  ;;  %5616 = vmatpush.bf16.msra.mxu3 %v8762_v39 }
 0x359   : > { %v3947_v24 = vpop.f32.mrf.mxu3 }
 0x35a   : > { %v11793_v63 = vadd.f32 %v3947_v24, %v11339_v4  ;;  %v4525_v4 = vor.u32 %v4523_v22, %v4521_v44  ;;  %6041 = vmatpush.bf16.msra.mxu1 %v8764_v20  ;;  %v8763_v44 = vld [vmem:[%s12653_s4 + $0x100] sm:$0xff]  ;;  %v5341_v22 = vrot.slane %v5339_v11, 1 }
 0x35b   : > { %5005 = vmatmul.bf16.gmra.mxu0 %v11796_v27 }
 0x35c   : > { %v3986_v47 = vpop.f32.mrf.mxu2  ;;  %v3285_v14 = vpop.xlane.xlu2 %3284 }
 0x35d   : > { %v3987_v52 = vadd.f32 %v3986_v47, %v11687_v55  ;;  %v3312_v3 = vadd.f32 %v11606_v10, %v3285_v14  ;;  %v4393_v6 = vpop.f32.mrf.mxu1  ;;  %v8737_v55 = vld [vmem:[%s12653_s4 + $0x38] sm:$0xff]  ;;  %v5337_v47 = vshrl.u32 %v11804_v60, 16  ;;  %v11832_v14 = vld [vmem:[#allocation2 + $0x88] sm:$0xff]  }
 0x35e   : > { %v11808_v45 = vadd.f32 %v4393_v6, %v4344_v58  ;;  %4729 = vmatmul.bf16.gmra.mxu3 %v11667_v23  ;;  %v4530_v58 = vsel %vm1427_vm1, %v4525_v4, %v4529_v42  ;;  %6042 = vmatpush.bf16.msra.mxu1 %v8763_v44  ;;  %v8736_v44 = vld [vmem:[%s12653_s4 + $0x30] sm:$0xff] }
 0x35f   : > { %v11813_v25 = vadd.f32 %v11671_v50, %v3987_v52  ;;  %3329 = vst.msk [vmem:[%s11618_s11 + $0x38] sm:$0xff] %vm3321_vm3, %v3312_v3  ;;  %v4346_v50 = vpop.f32.mrf.mxu0  ;;  %5741 = vmatpush.bf16.msra.mxu2 %v8737_v55  ;;  %v8761_v55 = vld [vmem:[%s12653_s4 + $0xf0] sm:$0xff] }
 0x360   : > { %5049 = vmatmul.bf16.gmra.mxu1 %v11746_v17  ;;  %v5344_v17 = vshll.u32 %v11832_v14, 16  ;;  %5617 = vmatpush.bf16.msra.mxu3 %v8761_v55 }
 0x361   : > { %v3950_v31 = vpop.f32.mrf.mxu3  ;;  %4768 = vmatmul.bf16.gmra.mxu2 %v4530_v58 }
 0x362   : > { %v11829_v24 = vadd.f32 %v3950_v31, %v11371_v32  ;;  %v5342_v32 = vor.u32 %v5341_v22, %v5337_v47  ;;  %v4531_v31 = vshrl.u32 %v11611_v40, 16  ;;  %v4535_v22 = vshll.u32 %v11667_v23, 16 }
 0x363   : > { %5742 = vmatpush.bf16.msra.mxu2 %v8736_v44 }
 0x364   : > { %v3989_v43 = vpop.f32.mrf.mxu2  ;;  %v3287_v20 = vpop.xlane.xlu0 %3286  ;;  %v11867_v40 = vrot.slane %v4535_v22, 1  ;;  %v12784_v22 = vld [vmem:[#allocation10_spill] sm:$0xff] }
 0x365   : > { %v3990_v4 = vadd.f32 %v3989_v43, %v11715_v2  ;;  %v3313_v52 = vadd.f32 %v11606_v10, %v3287_v20  ;;  %v4395_v3 = vpop.f32.mrf.mxu1  ;;  %v11850_v2 = vrot.slane %v5344_v17, 1  ;;  %v5409_v43 = vld [vmem:[#allocation2 + $0x88] sm:$0xc] }
 0x366   : > { %v11837_v6 = vadd.f32 %v4395_v3, %v4346_v50  ;;  %v5420_v55 = vunpack.c.l.b16 %v5409_v43  ;;  %v12785_v43 = vunpack.c.h.b16 %v12784_v22 }
 0x367   : > { %v11840_v11 = vadd.f32 %v11696_v57, %v3990_v4  ;;  %3330 = vst.msk [vmem:[%s11618_s11 + $0x40] sm:$0xff] %vm3321_vm3, %v3313_v52  ;;  %v8735_v57 = vld [vmem:[%s12653_s4 + $0x28] sm:$0xff]  ;;  %v5347_v50 = vsel %vm1427_vm1, %v5342_v32, %v11850_v2  ;;  %v4349_v20 = vpop.f32.mrf.mxu0  ;;  %v4533_v4 = vor.u32 %v4531_v31, %v4529_v42  ;;  %v8991_v31 = vld [vmem:[#allocation2 + $0x80] sm:$0xe] }
 0x368   : > { %5743 = vmatpush.bf16.msra.mxu2 %v8735_v57  ;;  %v8760_v42 = vld [vmem:[%s12653_s4 + $0xe8] sm:$0xff] }
 0x369   : > { %v3952_v39 = vpop.f32.mrf.mxu3  ;;  %5618 = vmatpush.bf16.msra.mxu3 %v8760_v42 }
 0x36a   : > { %v11856_v58 = vadd.f32 %v3952_v39, %v11412_v33  ;;  %v8734_v39 = vld [vmem:[%s12653_s4 + $0x20] sm:$0xff] }
 0x36b   : > { %5778 = vmatmul.bf16.vlgmr.msra.gmra.mxu0 %v5347_v50  ;;  %v8990_v50 = vld [vmem:[#allocation2 + $0x80] sm:$0xf0] }
 0x36c   : > { %v3991_v47 = vpop.f32.mrf.mxu2  ;;  %v3289_v17 = vpop.xlane.xlu1 %3288  ;;  %5744 = vmatpush.bf16.msra.mxu2 %v8734_v39 }
 0x36d   : > { %v3992_v52 = vadd.f32 %v3991_v47, %v11743_v51  ;;  %v3314_v3 = vadd.f32 %v11606_v10, %v3289_v17  ;;  %v4398_v33 = vpop.f32.mrf.mxu1  ;;  %v8801_v51 = vld [vmem:[%s12653_s4 + $0x1f8] sm:$0xff]  ;;  %v8800_v47 = vld [vmem:[%s12653_s4 + $0x1f0] sm:$0xff] }
 0x36e   : > { %v11864_v44 = vadd.f32 %v4398_v33, %v4349_v20  ;;  %4734 = vmatmul.bf16.gmra.mxu3 %v11717_v38  ;;  %v11888_v20 = vpack.c.b16 %v12785_v43, %v5420_v55  ;;  %6362 = vmatpush.bf16.msrb.mxu0 %v8801_v51  ;;  %v8992_v55 = vor.u32 %v8991_v31, %v8990_v50  ;;  %v5348_v43 = vshrl.u32 %v11832_v14, 16  ;;  %v12786_v50 = vld [vmem:[#allocation11_spill] sm:$0xff] }
 0x36f   : > { %v11870_v32 = vadd.f32 %v11724_v34, %v3992_v52  ;;  %3331 = vst.msk [vmem:[%s11618_s11 + $0x48] sm:$0xff] %vm3321_vm3, %v3314_v3  ;;  %v4538_v34 = vsel %vm1427_vm1, %v4533_v4, %v11867_v40  ;;  %v11899_v4 = vld [vmem:[#allocation2 + $0x90] sm:$0xff]  ;;  %v4351_v51 = vpop.f32.mrf.mxu0 }
 0x370   : > { %5054 = vmatmul.bf16.gmra.mxu1 %v11796_v27  ;;  %v8733_v27 = vld [vmem:[%s12653_s4 + $0x18] sm:$0xff]  ;;  %v5864_v42 = vshrl.u32 %v11888_v20, 16  ;;  %v5867_v39 = vshll.u32 %v11888_v20, 16 }
 0x371   : > { %v3955_v57 = vpop.f32.mrf.mxu3  ;;  %4773 = vmatmul.bf16.gmra.mxu2 %v4538_v34 }
 0x372   : > { %v11894_v17 = vadd.f32 %v3955_v57, %v11440_v1  ;;  %6363 = vmatpush.bf16.msrb.mxu0 %v8800_v47  ;;  %5745 = vmatpush.bf16.msra.mxu2 %v8733_v27  ;;  %v8799_v47 = vld [vmem:[%s12653_s4 + $0x1e8] sm:$0xff]  ;;  %v5350_v27 = vor.u32 %v5348_v43, %v11850_v2 }
 0x373   : > { %v8731_v2 = vld [vmem:[%s12653_s4 + $0x8] sm:$0xff] }
 0x374   : > { %v3994_v3 = vpop.f32.mrf.mxu2  ;;  %v3291_v33 = vpop.xlane.xlu2 %3290  ;;  %v5355_v35 = vsel %vm1427_vm1, %v5350_v27, %v12789_v7 }
 0x375   : > { %v3995_v34 = vadd.f32 %v3994_v3, %v11772_v13  ;;  %v3315_v1 = vadd.f32 %v11606_v10, %v3291_v33  ;;  %v4400_v57 = vpop.f32.mrf.mxu1  ;;  %v12787_v13 = vshll.u32 %v12786_v50, 16  ;;  %v12788_v3 = vshrl.u32 %v11899_v4, 16 }
 0x376   : > { %v11906_v22 = vadd.f32 %v4400_v57, %v4351_v51  ;;  %v8759_v51 = vld [vmem:[%s12653_s4 + $0xe0] sm:$0xff]  ;;  %v5468_v57 = vrot.slane %v8992_v55, 1  ;;  %v5866_v50 = vrot.slane %v5864_v42, 2  ;;  %6364 = vmatpush.bf16.msrb.mxu0 %v8799_v47  ;;  %v12699_v55 = vrot.slane %v11832_v14, 1 }
 0x377   : > { %v11910_v52 = vadd.f32 %v11755_v12, %v3995_v34  ;;  %3332 = vst.msk [vmem:[%s11618_s11 + $0x50] sm:$0xff] %vm3321_vm3, %v3315_v1  ;;  %v5872_v31 = vrot.slane %v12787_v13, 3  ;;  %v5871_v33 = vrot.slane %v12788_v3, 2  ;;  %v8732_v12 = vld [vmem:[%s12653_s4 + $0x10] sm:$0xff]  ;;  %v4543_v34 = vshll.u32 %v11717_v38, 16  ;;  %5619 = vmatpush.bf16.msra.mxu3 %v8759_v51  ;;  %v8798_v3 = vld [vmem:[%s12653_s4 + $0x1e0] sm:$0xff] }
 0x378   : > { %v5869_v13 = vrot.slane %v5867_v39, 3  ;;  %5746 = vmatpush.bf16.msra.mxu2 %v8732_v12  ;;  %v4539_v47 = vshrl.u32 %v11667_v23, 16  ;;  %v5470_v12 = vsel %vm1555_vm0, %v5468_v57, %v12699_v55  ;;  %v8796_v57 = vld [vmem:[%s12653_s4 + $0x1d0] sm:$0xff] }
 0x379   : > { %v3957_v1 = vpop.f32.mrf.mxu3  ;;  %v11941_v42 = vor.u32 %v5872_v31, %v5871_v33  ;;  %v8758_v33 = vld [vmem:[%s12653_s4 + $0xd8] sm:$0xff] }
 0x37a   : > { %v11933_v48 = vadd.f32 %v3957_v1, %v11472_v29  ;;  %v4545_v29 = vrot.slane %v4543_v34, 1  ;;  %v5870_v1 = vor.u32 %v5869_v13, %v5866_v50  ;;  %6365 = vmatpush.bf16.msrb.mxu0 %v8798_v3  ;;  %v8809_v50 = vld [vmem:[%s12653_s4 + $0x238] sm:$0xff] }
 0x37b   : > { %5783 = vmatmul.bf16.gmra.mxu0 %v5355_v35  ;;  %v4541_v35 = vor.u32 %v4539_v47, %v11867_v40  ;;  %v8730_v40 = vld [vmem:[%s12653_s4] sm:$0xff]  ;;  %5620 = vmatpush.bf16.msra.mxu3 %v8758_v33  ;;  %v11979_v47 = vpop.f32.mrf.mxu0 }
 0x37c   : > { %v3996_v39 = vpop.f32.mrf.mxu2  ;;  %v3293_v43 = vpop.xlane.xlu0 %3292  ;;  %5747 = vmatpush.bf16.msra.mxu2 %v8731_v2  ;;  %v5874_v23 = vsel %vm2098_vm2, %v5870_v1, %v11941_v42  ;;  %6544 = vmatpush.bf16.msrb.mxu1 %v8809_v50  ;;  %v8808_v50 = vld [vmem:[%s12653_s4 + $0x230] sm:$0xff] }
 0x37d   : > { %v3997_v51 = vadd.f32 %v3996_v39, %v11793_v63  ;;  %v3316_v27 = vadd.f32 %v11606_v10, %v3293_v43  ;;  %v8797_v63 = vld [vmem:[%s12653_s4 + $0x1d8] sm:$0xff]  ;;  %v11977_v43 = vpop.f32.mrf.mxu1 }
 0x37e   : > { %5595 = vmatmul.bf16.vlgmr.msrb.gmra.mxu3 %v5470_v12  ;;  %6366 = vmatpush.bf16.msrb.mxu0 %v8797_v63  ;;  %v5308_v63 = vld [vmem:[#allocation2 + $0xa0] sm:$0x1] }
 0x37f   : > { %v11951_v31 = vadd.f32 %v11781_v56, %v3997_v51  ;;  %3333 = vst.msk [vmem:[%s11618_s11 + $0x58] sm:$0xff] %vm3321_vm3, %v3316_v27  ;;  %v4546_v56 = vsel %vm1427_vm1, %v4541_v35, %v4545_v29  ;;  %v12791_v27 = vld [vmem:[#allocation19_spill] sm:$0xff] }
 0x380   : > { %6043 = vmatmul.bf16.vlgmr.msra.gmra.mxu1 %v5874_v23  ;;  %5748 = vmatpush.bf16.msra.mxu2 %v8730_v40  ;;  %v12792_v12 = vshrl.u32 %v12791_v27, 16  ;;  %v12793_v35 = vshll.u32 %v12791_v27, 16  ;;  %v4551_v40 = vshll.u32 %v11774_v8, 16  ;;  %v8807_v27 = vld [vmem:[%s12653_s4 + $0x228] sm:$0xff] }
 0x381   : > { %v11967_v34 = vpop.f32.mrf.mxu3  ;;  %4778 = vmatmul.bf16.gmra.mxu2 %v4546_v56  ;;  %6545 = vmatpush.bf16.msrb.mxu1 %v8808_v50 }
 0x382   : > { %6367 = vmatpush.bf16.msrb.mxu0 %v8796_v57  ;;  %v5892_v1 = vrot.slane %v12792_v12, 2  ;;  %v5893_v23 = vrot.slane %v12793_v35, 3  ;;  %v8795_v57 = vld [vmem:[%s12653_s4 + $0x1c8] sm:$0xff]  ;;  %v4553_v55 = vrot.slane %v4551_v40, 1 }
 0x384   : > { %v3999_v13 = vpop.f32.mrf.mxu2  ;;  %v3295_v3 = vpop.xlane.xlu1 %3294 }
 0x385   : > { %v4000_v2 = vadd.f32 %v3999_v13, %v11829_v24  ;;  %v3317_v39 = vadd.f32 %v11606_v10, %v3295_v3  ;;  %v12794_v24 = vshrl.u32 %v11899_v4, 16  ;;  %v8757_v13 = vld [vmem:[%s12653_s4 + $0xd0] sm:$0xff]  ;;  %v4547_v3 = vshrl.u32 %v11717_v38, 16  ;;  %v8794_v38 = vld [vmem:[%s12653_s4 + $0x1c0] sm:$0xff]  ;;  %6546 = vmatpush.bf16.msrb.mxu1 %v8807_v27 }
 0x386   : > { %6368 = vmatpush.bf16.msrb.mxu0 %v8795_v57  ;;  %5621 = vmatpush.bf16.msra.mxu3 %v8757_v13  ;;  %v12041_v13 = vpop.f32.mrf.mxu0 }
 0x387   : > { %v11982_v51 = vadd.f32 %v11808_v45, %v4000_v2  ;;  %3334 = vst.msk [vmem:[%s11618_s11 + $0x60] sm:$0xff] %vm3321_vm3, %v3317_v39  ;;  %v5358_v33 = vor.u32 %v12794_v24, %v12789_v7  ;;  %v11997_v45 = vrot.slane %v11899_v4, 1  ;;  %v12795_v7 = vld [vmem:[#allocation21_spill] sm:$0xff]  ;;  %v5334_v2 = vunpack.c.l.b16 %v5308_v63 }
 0x388   : > { %v12014_v39 = vor.u32 %v5893_v23, %v5892_v1  ;;  %v4549_v24 = vor.u32 %v4547_v3, %v4545_v29  ;;  %v12796_v23 = vrot.slane %v11832_v14, 1 }
 0x389   : > { %12790 = vst [vmem:[#allocation28_spill] sm:$0xff] %v11982_v51  ;;  %v11994_v56 = vpop.f32.mrf.mxu3  ;;  %v12010_v8 = vsel %vm1427_vm1, %v5358_v33, %v12795_v7  ;;  %v12028_v50 = vpack.c.b16 %v5334_v2, %v5334_v2 }
 0x38a   : > { %v5474_v33 = vsel %vm1555_vm0, %v12796_v23, %v11997_v45  ;;  %v5895_v40 = vsel %vm2098_vm2, %v11941_v42, %v12014_v39  ;;  %v4554_v57 = vsel %vm1427_vm1, %v4549_v24, %v4553_v55  ;;  %6369 = vmatpush.bf16.msrb.mxu0 %v8794_v38  ;;  %v8756_v42 = vld [vmem:[%s12653_s4 + $0xc8] sm:$0xff]  ;;  %v8805_v55 = vld [vmem:[%s12653_s4 + $0x218] sm:$0xff] }
 0x38b   : > { %5788 = vmatmul.bf16.gmra.mxu0 %v12010_v8  ;;  %v5368_v3 = vshll.u32 %v12028_v50, 16  ;;  %5622 = vmatpush.bf16.msra.mxu3 %v8756_v42  ;;  %v6109_v24 = vld [vmem:[#allocation2 + $0x94] sm:$0xff]   ;;  %v12799_v23 = vld [vmem:[#allocation14_spill] sm:$0xff] }
 0x38c   : > { %v4001_v12 = vpop.f32.mrf.mxu2  ;;  %v3297_v35 = vpop.xlane.xlu2 %3296  ;;  %v12057_v38 = vld [vmem:[#allocation2 + $0x94] sm:$0xf0] }
 0x38d   : > { %v4002_v63 = vadd.f32 %v4001_v12, %v11856_v58  ;;  %v3318_v1 = vadd.f32 %v11606_v10, %v3297_v35  ;;  %v12038_v58 = vpop.f32.mrf.mxu1 }
 0x38e   : > { %5600 = vmatmul.bf16.gmra.mxu3 %v5474_v33  ;;  %v12800_v33 = vshrl.u32 %v12799_v23, 16 }
 0x38f   : > { %v12031_v29 = vadd.f32 %v11837_v6, %v4002_v63  ;;  %3335 = vst.msk [vmem:[%s11618_s11 + $0x68] sm:$0xff] %vm3321_vm3, %v3318_v1  ;;  %v8806_v6 = vld [vmem:[%s12653_s4 + $0x220] sm:$0xff]  ;;  %v5370_v63 = vrot.slane %v5368_v3, 1 }
 0x390   : > { %6048 = vmatmul.bf16.gmra.mxu1 %v5895_v40  ;;  %v5905_v40 = vrot.slane %v12800_v33, 2  ;;  %v8755_v3 = vld [vmem:[%s12653_s4 + $0xc0] sm:$0xff]  ;;  %v8803_v33 = vld [vmem:[%s12653_s4 + $0x208] sm:$0xff] }
 0x391   : > { %12797 = vst [vmem:[#allocation31_spill] sm:$0xff] %v12031_v29  ;;  %v12043_v7 = vpop.f32.mrf.mxu3  ;;  %4783 = vmatmul.bf16.gmra.mxu2 %v4554_v57  ;;  %6547 = vmatpush.bf16.msrb.mxu1 %v8806_v6  ;;  %v12801_v57 = vshll.u32 %v12799_v23, 16  ;;  %v12804_v29 = vld [vmem:[#allocation23_spill] sm:$0xff] }
 0x392   : > { %5623 = vmatpush.bf16.msra.mxu3 %v8755_v3  ;;  %v12805_v5 = vshrl.u32 %v12804_v29, 16 }
 0x393   : > { %v5906_v6 = vrot.slane %v12801_v57, 3 }
 0x394   : > { %v4004_v2 = vpop.f32.mrf.mxu2  ;;  %v3299_v27 = vpop.xlane.xlu0 %3298 }
 0x395   : > { %v4005_v12 = vadd.f32 %v4004_v2, %v11894_v17  ;;  %v3319_v35 = vadd.f32 %v11606_v10, %v3299_v27  ;;  %6548 = vmatpush.bf16.msrb.mxu1 %v8805_v55  ;;  %v12070_v17 = vld [vmem:[#allocation2 + $0x98] sm:$0xff]  ;;  %v12081_v27 = vpop.f32.mrf.mxu1  ;;  %v5907_v23 = vor.u32 %v5906_v6, %v5905_v40 }
 0x396   : > { %v12073_v2 = vrot.slane %v12070_v17, 1  ;;  %v12098_v40 = vld [vmem:[#allocation2 + $0x9c] sm:$0xff] }
 0x397   : > { %v12060_v1 = vadd.f32 %v11864_v44, %v4005_v12  ;;  %3336 = vst.msk [vmem:[%s11618_s11 + $0x70] sm:$0xff] %vm3321_vm3, %v3319_v35  ;;  %v8804_v44 = vld [vmem:[%s12653_s4 + $0x210] sm:$0xff]  ;;  %v12085_v35 = vpop.f32.mrf.mxu0 }
 0x398   : > { %v12802_v12 = vld [vmem:[#allocation22_spill] sm:$0xff] }
 0x399   : > { %12798 = vst [vmem:[#allocation30_spill] sm:$0xff] %v12060_v1  ;;  %v12068_v42 = vpop.f32.mrf.mxu3  ;;  %v5371_v55 = vsel %vm1427_vm1, %v12802_v12, %v5370_v63  ;;  %6549 = vmatpush.bf16.msrb.mxu1 %v8804_v44  ;;  %v12095_v63 = vsel %vm1555_vm0, %v11997_v45, %v12073_v2  ;;  %v5908_v44 = vsel %vm2098_vm2, %v12014_v39, %v5907_v23  ;;  %v6173_v39 = vshll.u32 %v12098_v40, 16 }
 0x39b   : > { %5793 = vmatmul.bf16.gmra.mxu0 %v5371_v55 }
 0x39c   : > { %v4006_v57 = vpop.f32.mrf.mxu2  ;;  %v3301_v26 = vpop.xlane.xlu1 %3300 }
 0x39d   : > { %v4007_v1 = vadd.f32 %v4006_v57, %v11933_v48  ;;  %v3320_v0 = vadd.f32 %v11606_v10, %v3301_v26  ;;  %6550 = vmatpush.bf16.msrb.mxu1 %v8803_v33  ;;  %v6168_v26 = vshll.u32 %v6109_v24, 16  ;;  %v8802_v10 = vld [vmem:[%s12653_s4 + $0x200] sm:$0xff]  ;;  %v6166_v33 = vshrl.u32 %v6109_v24, 16  ;;  %v8777_v24 = vld [vmem:[%s12653_s4 + $0x170] sm:$0xff] }
 0x39e   : > { %5605 = vmatmul.bf16.gmra.mxu3 %v12095_v63  ;;  %v6175_v57 = vrot.slane %v6173_v39, 1 }
 0x39f   : > { %v12101_v6 = vadd.f32 %v11906_v22, %v4007_v1  ;;  %3337 = vst.msk [vmem:[%s11618_s11 + $0x78] sm:$0xff] %vm3321_vm3, %v3320_v0  ;;  %v8778_v22 = vld [vmem:[%s12653_s4 + $0x178] sm:$0xff]  ;;  %v12120_v1 = vpop.f32.mrf.mxu1  ;;  %v12123_v55 = vpop.f32.mrf.mxu0 }
 0x3a0   : > { %6053 = vmatmul.bf16.gmra.mxu1 %v5908_v44  ;;  %v8793_v0 = vld [vmem:[%s12653_s4 + $0x1b8] sm:$0xff]  ;;  %6064 = vmatpush.bf16.msrb.mxu3 %v8778_v22  ;;  %v5021_v44 = vadd.f32 %v11977_v43, %v11979_v47  ;;  %v12806_v22 = vshll.u32 %v12804_v29, 16  ;;  %v12145_v47 = vld [vmem:[%s12654_s5] ss:$0 sm:$0xff] }
 0x3a1   : > { %12803 = vst [vmem:[#allocation10_spill] sm:$0xff] %v12101_v6  ;;  %v12107_v48 = vpop.f32.mrf.mxu3  ;;  %5749 = vmatmul.bf16.vlgmr.msra.gmra.mxu2 %v11804_v60  ;;  %6551 = vmatpush.bf16.msrb.mxu1 %v8802_v10  ;;  %v6170_v60 = vrot.slane %v6168_v26, 1  ;;  %v5918_v10 = vrot.slane %v12805_v5, 2 }
 0x3a2   : > { %6333 = vmatpush.bf16.msrb.mxu2 %v8793_v0  ;;  %v5919_v51 = vrot.slane %v12806_v22, 3 }
 0x3a3   : > { %v6171_v9 = vor.u32 %v6170_v60, %v6166_v33  ;;  %v12156_v60 = vld [vmem:[#allocation2 + $0xa4] sm:$0xff] }
 0x3a4   : > { %v4749_v3 = vpop.f32.mrf.mxu2  ;;  %v5920_v5 = vor.u32 %v5919_v51, %v5918_v10  ;;  %6065 = vmatpush.bf16.msrb.mxu3 %v8777_v24  ;;  %v9074_v24 = vld [vmem:[#allocation2 + $0x94] sm:$0xe] }
 0x3a5   : > { %v4750_v12 = vadd.f32 %v4749_v3, %v11967_v34  ;;  %v5479_v34 = vrot.slane %v12028_v50, 1  ;;  %v6176_v43 = vsel %vm1427_vm1, %v6171_v9, %v6175_v57 }
 0x3a7   : > { %v4789_v6 = vadd.f32 %v4750_v12, %v11628_v21  ;;  %v8792_v21 = vld [vmem:[%s12653_s4 + $0x1b0] sm:$0xff]  ;;  %v5480_v9 = vsel %vm1555_vm0, %v12073_v2, %v5479_v34  ;;  %v12154_v3 = vpop.f32.mrf.mxu1  ;;  %v5023_v12 = vadd.f32 %v12038_v58, %v12041_v13  ;;  %v12163_v22 = vpop.f32.mrf.mxu0  ;;  %v12171_v34 = vld [vmem:[%s12656_s7] ss:$0 sm:$0xff]  ;;  %v6181_v13 = vshll.u32 %v12156_v60, 16 }
 0x3a8   : > { %6334 = vmatpush.bf16.msrb.mxu2 %v8792_v21  ;;  %v8790_v58 = vld [vmem:[%s12653_s4 + $0x1a0] sm:$0xff]  ;;  %v8789_v21 = vld [vmem:[%s12653_s4 + $0x198] sm:$0xff] }
 0x3a9   : > { %v5060_v26 = vadd.f32 %v5021_v44, %v4789_v6  ;;  %v12132_v0 = vpop.f32.mrf.mxu3  ;;  %v8791_v6 = vld [vmem:[%s12653_s4 + $0x1a8] sm:$0xff]  ;;  %v5921_v44 = vsel %vm2098_vm2, %v5907_v23, %v5920_v5 }
 0x3ab   : > { %6370 = vmatmul.bf16.vlgmr.msrb.gmra.mxu0 %v6176_v43  ;;  %v5076_v29 = vadd.f32 %v12145_v47, %v5060_v26 }
 0x3ac   : > { %v4751_v50 = vpop.f32.mrf.mxu2  ;;  %6335 = vmatpush.bf16.msrb.mxu2 %v8791_v6  ;;  %v5427_v6 = vrot.slane %v11888_v20, 1 }
 0x3ad   : > { %v4752_v39 = vadd.f32 %v4751_v50, %v11994_v56  ;;  %v5092_v51 = vmax.f32 %v5076_v29, 0.0  ;;  %v6177_v29 = vshrl.u32 %v12098_v40, 16  ;;  %v12187_v50 = vrot.slane %v6181_v13, 1 }
 0x3ae   : > { %5610 = vmatmul.bf16.gmra.mxu3 %v5480_v9 }
 0x3af   : > { %v4790_v33 = vadd.f32 %v4752_v39, %v11649_v41  ;;  %v5204_v10 = vmul.f32 %v11388_v62, %v5092_v51  ;;  %v8776_v62 = vld [vmem:[%s12653_s4 + $0x168] sm:$0xff]  ;;  %v5026_v39 = vadd.f32 %v12081_v27, %v12085_v35  ;;  %v9075_v27 = vor.u32 %v9074_v24, %v12057_v38  ;;  %v12209_v35 = vpop.f32.mrf.mxu0 }
 0x3b0   : > { %6058 = vmatmul.bf16.gmra.mxu1 %v5921_v44  ;;  %6066 = vmatpush.bf16.msrb.mxu3 %v8776_v62  ;;  %v5472_v44 = vrot.slane %v12095_v63, 1 }
 0x3b1   : > { %v5061_v56 = vadd.f32 %v5023_v12, %v4790_v33  ;;  %v12165_v26 = vpop.f32.mrf.mxu3  ;;  %5754 = vmatmul.bf16.gmra.mxu2 %v11832_v14  ;;  %v5220_v41 = vmul.f32 %v12171_v34, %v5204_v10  ;;  %v12194_v12 = vpop.f32.mrf.mxu1  ;;  %v6179_v33 = vor.u32 %v6177_v29, %v6175_v57 }
 0x3b2   : > { %6336 = vmatpush.bf16.msrb.mxu2 %v8790_v58  ;;  %v8787_v58 = vld [vmem:[%s12653_s4 + $0x188] sm:$0xff] }
 0x3b3   : > { %5236 = vadd.xlane.f32.xlu2 %v5220_v41  ;;  %v5077_v14 = vadd.f32 %v12145_v47, %v5061_v56  ;;  %v6436_v41 = vrot.slane %v12098_v40, 1 }
 0x3b4   : > { %v4754_v23 = vpop.f32.mrf.mxu2 }
 0x3b5   : > { %v4755_v43 = vadd.f32 %v4754_v23, %v12043_v7  ;;  %v5093_v5 = vmax.f32 %v5077_v14, 0.0  ;;  %v5429_v7 = vsel %vm1555_vm0, %v5427_v6, %v11997_v45  ;;  %v6184_v45 = vsel %vm1427_vm1, %v6179_v33, %v12187_v50 }
 0x3b6   : > { %6337 = vmatpush.bf16.msrb.mxu2 %v8789_v21  ;;  %v5471_v57 = vrot.slane %v5429_v7, 1  ;;  %v6435_v23 = vrot.slane %v9075_v27, 1  ;;  %v12222_v21 = vld [vmem:[#allocation2 + $0xac] sm:$0xff] }
 0x3b7   : > { %v4791_v9 = vadd.f32 %v4755_v43, %v11674_v15  ;;  %v5205_v51 = vmul.f32 %v11332_v54, %v5093_v5  ;;  %v8775_v54 = vld [vmem:[%s12653_s4 + $0x160] sm:$0xff]  ;;  %v8788_v15 = vld [vmem:[%s12653_s4 + $0x190] sm:$0xff]  ;;  %v5028_v43 = vadd.f32 %v12120_v1, %v12123_v55  ;;  %v4986_v7 = vpop.f32.mrf.mxu0 }
 0x3b8   : > { %6067 = vmatpush.bf16.msrb.mxu3 %v8775_v54  ;;  %v5473_v14 = vsel %vm1555_vm0, %v5471_v57, %v5472_v44  ;;  %v12230_v29 = vsel %vm1555_vm0, %v6435_v23, %v6436_v41  ;;  %v8786_v1 = vld [vmem:[%s12653_s4 + $0x180] sm:$0xff]  ;;  %v6185_v54 = vshrl.u32 %v12156_v60, 16  ;;  %v5031_v57 = vadd.f32 %v12154_v3, %v12163_v22 }
 0x3b9   : > { %v5062_v10 = vadd.f32 %v5026_v39, %v4791_v9  ;;  %v12199_v56 = vpop.f32.mrf.mxu3  ;;  %v5221_v20 = vmul.f32 %v12171_v34, %v5205_v51  ;;  %v12244_v55 = vpop.f32.mrf.mxu1  ;;  %v12247_v51 = vld [vmem:[#allocation2 + $0xa0] sm:$0xff] }
 0x3ba   : > { %6338 = vmatpush.bf16.msrb.mxu2 %v8788_v15  ;;  %v5432_v33 = vrot.slane %v12247_v51, 1 }
 0x3bb   : > { %6375 = vmatmul.bf16.gmra.mxu0 %v6184_v45  ;;  %5238 = vadd.xlane.f32.xlu1 %v5221_v20  ;;  %v5078_v38 = vadd.f32 %v12145_v47, %v5062_v10 }
 0x3bc   : > { %v4756_v62 = vpop.f32.mrf.mxu2  ;;  %v12257_v45 = vsel %vm1555_vm0, %v12073_v2, %v5432_v33  ;;  %v8773_v2 = vld [vmem:[%s12653_s4 + $0x150] sm:$0xff] }
 0x3bd   : > { %v4757_v13 = vadd.f32 %v4756_v62, %v12068_v42  ;;  %v5094_v24 = vmax.f32 %v5078_v38, 0.0 }
 0x3be   : > { %5624 = vmatmul.bf16.vlgmr.msra.gmra.mxu3 %v5473_v14  ;;  %6339 = vmatpush.bf16.msrb.mxu2 %v8787_v58  ;;  %v6117_v58 = vld [vmem:[#allocation2 + $0xb4] sm:$0x1] }
 0x3bf   : > { %v4792_v5 = vadd.f32 %v4757_v13, %v11700_v37  ;;  %v5206_v42 = vmul.f32 %v11407_v28, %v5094_v24  ;;  %v8774_v37 = vld [vmem:[%s12653_s4 + $0x158] sm:$0xff]  ;;  %v6189_v28 = vshll.u32 %v12222_v21, 16  ;;  %v5412_v13 = vld [vmem:[#allocation2 + $0xa8] sm:$0x3] }
 0x3c0   : > { %6552 = vmatmul.bf16.vlgmr.msrb.gmra.mxu1 %v12230_v29  ;;  %6068 = vmatpush.bf16.msrb.mxu3 %v8774_v37  ;;  %v5423_v22 = vunpack.c.l.b16 %v5412_v13 }
 0x3c1   : > { %v5063_v6 = vadd.f32 %v5028_v43, %v4792_v5  ;;  %v12234_v39 = vpop.f32.mrf.mxu3  ;;  %5759 = vmatmul.bf16.gmra.mxu2 %v11899_v4  ;;  %v5222_v9 = vmul.f32 %v12171_v34, %v5206_v42  ;;  %v6191_v15 = vrot.slane %v6189_v28, 1  ;;  %v5475_v43 = vrot.slane %v12257_v45, 1  ;;  %v5037_v5 = vpop.f32.mrf.mxu1 }
 0x3c2   : > { %6340 = vmatpush.bf16.msrb.mxu2 %v8786_v1  ;;  %v4988_v1 = vpop.f32.mrf.mxu0 }
 0x3c3   : > { %5240 = vadd.xlane.f32.xlu0 %v5222_v9  ;;  %v5079_v4 = vadd.f32 %v12145_v47, %v5063_v6  ;;  %v5476_v9 = vsel %vm1555_vm0, %v5472_v44, %v5475_v43 }
 0x3c4   : > { %v4759_v10 = vpop.f32.mrf.mxu2  ;;  %6069 = vmatpush.bf16.msrb.mxu3 %v8773_v2 }
 0x3c5   : > { %v4760_v20 = vadd.f32 %v4759_v10, %v12107_v48  ;;  %v5095_v27 = vmax.f32 %v5079_v4, 0.0  ;;  %v6187_v48 = vor.u32 %v6185_v54, %v12187_v50  ;;  %v12280_v4 = vpack.c.b16 %v5423_v22, %v5423_v22 }
 0x3c6   : > { %v5038_v22 = vadd.f32 %v5037_v5, %v4988_v1 }
 0x3c7   : > { %v4793_v38 = vadd.f32 %v4760_v20, %v11728_v30  ;;  %v5207_v62 = vmul.f32 %v11362_v16, %v5095_v27  ;;  %v6192_v3 = vsel %vm1427_vm1, %v6187_v48, %v6191_v15  ;;  %v6159_v30 = vunpack.c.l.b16 %v6117_v58 }
 0x3c8   : > { %v6438_v16 = vrot.slane %v12156_v60, 1  ;;  %v5033_v60 = vadd.f32 %v12194_v12, %v12209_v35  ;;  %v5434_v12 = vrot.slane %v12280_v4, 1  ;;  %v5036_v58 = vadd.f32 %v12244_v55, %v4986_v7 }
 0x3c9   : > { %v5064_v14 = vadd.f32 %v5031_v57, %v4793_v38  ;;  %v12264_v23 = vpop.f32.mrf.mxu3  ;;  %v5223_v24 = vmul.f32 %v12171_v34, %v5207_v62  ;;  %v12278_v28 = vpack.c.b16 %v6159_v30, %v6159_v30  ;;  %v5040_v45 = vpop.f32.mrf.mxu1  ;;  %v6440_v55 = vrot.slane %v12222_v21, 1 }
 0x3ca   : > { %v5435_v62 = vsel %vm1555_vm0, %v5432_v33, %v5434_v12 }
 0x3cb   : > { %6380 = vmatmul.bf16.gmra.mxu0 %v6192_v3  ;;  %5242 = vadd.xlane.f32.xlu2 %v5223_v24  ;;  %v5080_v50 = vadd.f32 %v12145_v47, %v5064_v14  ;;  %v6197_v40 = vshll.u32 %v12278_v28, 16  ;;  %v4991_v14 = vpop.f32.mrf.mxu0  ;;  %v5477_v3 = vrot.slane %v5435_v62, 1  ;;  %v8780_v62 = vld [vmem:[#allocation2 + $0x9c] sm:$0xff] }
 0x3cc   : > { %v4761_v42 = vpop.f32.mrf.mxu2 }
 0x3cd   : > { %v4762_v6 = vadd.f32 %v4761_v42, %v12132_v0  ;;  %v5096_v37 = vmax.f32 %v5080_v50, 0.0  ;;  %v12288_v0 = vsel %vm1555_vm0, %v6436_v41, %v6438_v16  ;;  %v6193_v41 = vshrl.u32 %v12222_v21, 16 }
 0x3ce   : > { %5629 = vmatmul.bf16.gmra.mxu3 %v5476_v9  ;;  %v6199_v38 = vrot.slane %v6197_v40, 1  ;;  %v5478_v7 = vsel %vm1555_vm0, %v5475_v43, %v5477_v3  ;;  %v12323_v42 = vsel %vm1555_vm0, %v6438_v16, %v6440_v55  ;;  %v8817_v43 = vld [vmem:[%s12653_s4 + $0x278] sm:$0xff]  ;;  %v5481_v40 = vrot.slane %v5434_v12, 1 }
 0x3cf   : > { %v4794_v10 = vadd.f32 %v4762_v6, %v11759_v36  ;;  %v5208_v63 = vmul.f32 %v11428_v53, %v5096_v37  ;;  %v8772_v36 = vld [vmem:[%s12653_s4 + $0x148] sm:$0xff]  ;;  %v6195_v57 = vor.u32 %v6193_v41, %v6191_v15  ;;  %v8771_v15 = vld [vmem:[%s12653_s4 + $0x140] sm:$0xff]  ;;  %v8779_v6 = vld [vmem:[#allocation2 + $0x94] sm:$0xff] }
 0x3d0   : > { %6557 = vmatmul.bf16.gmra.mxu1 %v12288_v0  ;;  %6070 = vmatpush.bf16.msrb.mxu3 %v8772_v36 }
 0x3d1   : > { %v5065_v44 = vadd.f32 %v5033_v60, %v4794_v10  ;;  %v12292_v20 = vpop.f32.mrf.mxu3  ;;  %5764 = vmatmul.bf16.gmra.mxu2 %v12070_v17  ;;  %v5224_v27 = vmul.f32 %v12171_v34, %v5208_v63  ;;  %v6200_v51 = vsel %vm1427_vm1, %v6195_v57, %v6199_v38  ;;  %v5042_v21 = vpop.f32.mrf.mxu1  ;;  %v5041_v60 = vadd.f32 %v5040_v45, %v4991_v14 }
 0x3d3   : > { %5244 = vadd.xlane.f32.xlu1 %v5224_v27  ;;  %v5081_v53 = vadd.f32 %v12145_v47, %v5065_v44 }
 0x3d4   : > { %v4764_v35 = vpop.f32.mrf.mxu2  ;;  %6071 = vmatpush.bf16.msrb.mxu3 %v8771_v15 }
 0x3d5   : > { %v4765_v54 = vadd.f32 %v4764_v35, %v12165_v26  ;;  %v5097_v17 = vmax.f32 %v5081_v53, 0.0  ;;  %v8816_v53 = vld [vmem:[%s12653_s4 + $0x270] sm:$0xff] }
 0x3d7   : > { %v4795_v13 = vadd.f32 %v4765_v54, %v11785_v49  ;;  %v5209_v48 = vmul.f32 %v11445_v61, %v5097_v17  ;;  %v5482_v17 = vsel %vm1555_vm0, %v5477_v3, %v5481_v40 }
 0x3d8   : > { %6573 = vmatpush.bf16.msra.mxu3 %v8817_v43  ;;  %v8814_v43 = vld [vmem:[%s12653_s4 + $0x260] sm:$0xff] }
 0x3d9   : > { %v5066_v24 = vadd.f32 %v5036_v58, %v4795_v13  ;;  %v12310_v2 = vpop.f32.mrf.mxu3  ;;  %v5225_v26 = vmul.f32 %v12171_v34, %v5209_v48  ;;  %v5045_v35 = vpop.f32.mrf.mxu1  ;;  %v5884_v58 = vshrl.u32 %v12010_v8, 16  ;;  %v5887_v13 = vshll.u32 %v12010_v8, 16 }
 0x3db   : > { %6385 = vmatmul.bf16.gmra.mxu0 %v6200_v51  ;;  %5246 = vadd.xlane.f32.xlu0 %v5225_v26  ;;  %v5082_v49 = vadd.f32 %v12145_v47, %v5066_v24  ;;  %v12807_v24 = vld [vmem:[#allocation13_spill] sm:$0xff]  ;;  %v5886_v51 = vrot.slane %v5884_v58, 2 }
 0x3dc   : > { %v4766_v61 = vpop.f32.mrf.mxu2  ;;  %6574 = vmatpush.bf16.msra.mxu3 %v8816_v53  ;;  %v5876_v26 = vshrl.u32 %v12807_v24, 16 }
 0x3dd   : > { %v4767_v33 = vadd.f32 %v4766_v61, %v12199_v56  ;;  %v5098_v30 = vmax.f32 %v5082_v49, 0.0 }
 0x3de   : > { %5634 = vmatmul.bf16.gmra.mxu3 %v5478_v7  ;;  %v5878_v7 = vrot.slane %v5876_v26, 2 }
 0x3df   : > { %v4796_v50 = vadd.f32 %v4767_v33, %v11813_v25  ;;  %v5210_v9 = vmul.f32 %v11419_v18, %v5098_v30  ;;  %v4993_v25 = vpop.f32.mrf.mxu0 }
 0x3e0   : > { %6562 = vmatmul.bf16.gmra.mxu1 %v12323_v42  ;;  %v5043_v12 = vadd.f32 %v5042_v21, %v4993_v25 }
 0x3e1   : > { %v5067_v37 = vadd.f32 %v5038_v22, %v4796_v50  ;;  %v12327_v4 = vpop.f32.mrf.mxu3  ;;  %6341 = vmatmul.bf16.vlgmr.msrb.gmra.mxu2 %v8779_v6  ;;  %v5226_v56 = vmul.f32 %v12171_v34, %v5210_v9  ;;  %v5047_v15 = vpop.f32.mrf.mxu1 }
 0x3e3   : > { %5248 = vadd.xlane.f32.xlu2 %v5226_v56  ;;  %v5083_v16 = vadd.f32 %v12145_v47, %v5067_v37 }
 0x3e4   : > { %v4769_v5 = vpop.f32.mrf.mxu2 }
 0x3e5   : > { %v4770_v18 = vadd.f32 %v4769_v5, %v12234_v39  ;;  %v5099_v1 = vmax.f32 %v5083_v16, 0.0  ;;  %v6442_v39 = vrot.slane %v12278_v28, 1 }
 0x3e7   : > { %v4797_v10 = vadd.f32 %v4770_v18, %v11840_v11  ;;  %v5211_v63 = vmul.f32 %v11467_v19, %v5099_v1  ;;  %v4996_v11 = vpop.f32.mrf.mxu0  ;;  %v12349_v38 = vsel %vm1555_vm0, %v6440_v55, %v6442_v39  ;;  %v5889_v55 = vrot.slane %v5887_v13, 3 }
 0x3e8   : > { %v5046_v30 = vadd.f32 %v5045_v35, %v4996_v11 }
 0x3e9   : > { %v5068_v44 = vadd.f32 %v5041_v60, %v4797_v10  ;;  %v12337_v27 = vpop.f32.mrf.mxu3  ;;  %v5227_v36 = vmul.f32 %v12171_v34, %v5211_v63  ;;  %v5890_v9 = vor.u32 %v5889_v55, %v5886_v51  ;;  %v5050_v18 = vpop.f32.mrf.mxu1  ;;  %v8781_v10 = vld [vmem:[#allocation2 + $0xa4] sm:$0xff]  ;;  %v8782_v55 = vld [vmem:[#allocation2 + $0xac] sm:$0xff] }
 0x3ea   : > { %v12808_v63 = vld [vmem:[#allocation38_spill] sm:$0xff] }
 0x3eb   : > { %5250 = vadd.xlane.f32.xlu1 %v5227_v36  ;;  %v5084_v41 = vadd.f32 %v12145_v47, %v5068_v44 }
 0x3ec   : > { %v4771_v54 = vpop.f32.mrf.mxu2 }
 0x3ed   : > { %v4772_v19 = vadd.f32 %v4771_v54, %v12264_v23  ;;  %v5100_v45 = vmax.f32 %v5084_v41, 0.0  ;;  %v8812_v54 = vld [vmem:[%s12653_s4 + $0x250] sm:$0xff] }
 0x3ee   : > { %5639 = vmatmul.bf16.gmra.mxu3 %v5482_v17  ;;  %v12809_v17 = vld [vmem:[#allocation28_spill] sm:$0xff] }
 0x3ef   : > { %v4798_v57 = vadd.f32 %v4772_v19, %v11870_v32  ;;  %v5212_v28 = vmul.f32 %v11480_v59, %v5100_v45  ;;  %v8815_v32 = vld [vmem:[%s12653_s4 + $0x268] sm:$0xff]  ;;  %v5879_v59 = vshll.u32 %v12807_v24, 16  ;;  %v4998_v33 = vpop.f32.mrf.mxu0  ;;  %v12811_v24 = vld [vmem:[#allocation24_spill] sm:$0xff] }
 0x3f0   : > { %6567 = vmatmul.bf16.gmra.mxu1 %v12349_v38  ;;  %6575 = vmatpush.bf16.msra.mxu3 %v8815_v32  ;;  %v5048_v1 = vadd.f32 %v5047_v15, %v4998_v33  ;;  %v5904_v26 = vsel %vm2098_vm2, %v5890_v9, %v12811_v24 }
 0x3f1   : > { %v5069_v23 = vadd.f32 %v5043_v12, %v4798_v57  ;;  %v12355_v48 = vpop.f32.mrf.mxu3  ;;  %6346 = vmatmul.bf16.gmra.mxu2 %v8780_v62  ;;  %v5228_v14 = vmul.f32 %v12171_v34, %v5212_v28  ;;  %v5881_v6 = vrot.slane %v5879_v59, 3  ;;  %v12810_v12 = vld [vmem:[#allocation32_spill] sm:$0xff]  ;;  %v5052_v62 = vpop.f32.mrf.mxu1 }
 0x3f3   : > { %5252 = vadd.xlane.f32.xlu0 %v5228_v14  ;;  %v5085_v3 = vadd.f32 %v12145_v47, %v5069_v23 }
 0x3f4   : > { %v4774_v8 = vpop.f32.mrf.mxu2  ;;  %6576 = vmatpush.bf16.msra.mxu3 %v8814_v43 }
 0x3f5   : > { %v4775_v49 = vadd.f32 %v4774_v8, %v12292_v20  ;;  %v5101_v61 = vmax.f32 %v5085_v3, 0.0  ;;  %v5882_v20 = vor.u32 %v5881_v6, %v5878_v7  ;;  %v8811_v3 = vld [vmem:[%s12653_s4 + $0x248] sm:$0xff]  ;;  %v12812_v8 = vld [vmem:[#allocation31_spill] sm:$0xff] }
 0x3f7   : > { %v4799_v22 = vadd.f32 %v4775_v49, %v11910_v52  ;;  %v5213_v50 = vmul.f32 %v11453_v46, %v5101_v61  ;;  %v5891_v46 = vsel %vm2098_vm2, %v5882_v20, %v5890_v9  ;;  %v5001_v36 = vpop.f32.mrf.mxu0  ;;  %v12813_v49 = vld [vmem:[#allocation29_spill] sm:$0xff]  ;;  %v12814_v20 = vld [vmem:[#allocation30_spill] sm:$0xff] }
 0x3f8   : > { %v5051_v19 = vadd.f32 %v5050_v18, %v5001_v36  ;;  %v12816_v36 = vld [vmem:[#allocation25_spill] sm:$0xff] }
 0x3f9   : > { %v5070_v21 = vadd.f32 %v5046_v30, %v4799_v22  ;;  %v12367_v37 = vpop.f32.mrf.mxu3  ;;  %v5229_v56 = vmul.f32 %v12171_v34, %v5213_v50  ;;  %v5055_v30 = vpop.f32.mrf.mxu1 }
 0x3fb   : > { %5254 = vadd.xlane.f32.xlu2 %v5229_v56  ;;  %v5086_v25 = vadd.f32 %v12145_v47, %v5070_v21  ;;  %v8810_v56 = vld [vmem:[%s12653_s4 + $0x240] sm:$0xff] }
 0x3fc   : > { %v4776_v16 = vpop.f32.mrf.mxu2 }
 0x3fd   : > { %v4777_v52 = vadd.f32 %v4776_v16, %v12310_v2  ;;  %v5102_v5 = vmax.f32 %v5086_v25, 0.0  ;;  %v8813_v2 = vld [vmem:[%s12653_s4 + $0x258] sm:$0xff]  ;;  %v12815_v16 = vld [vmem:[#allocation17_spill] sm:$0xff] }
 0x3fe   : > { %6072 = vmatmul.bf16.vlgmr.msrb.gmra.mxu3 %v5891_v46 }
 0x3ff   : > { %v4800_v60 = vadd.f32 %v4777_v52, %v11951_v31  ;;  %v5214_v44 = vmul.f32 %v12808_v63, %v5102_v5  ;;  %6577 = vmatpush.bf16.msra.mxu3 %v8813_v2  ;;  %v5003_v23 = vpop.f32.mrf.mxu0 }
 0x400   : > { %v5053_v15 = vadd.f32 %v5052_v62, %v5003_v23  ;;  %v12820_v23 = vld [vmem:[#allocation26_spill] sm:$0xff] }
 0x401   : > { %v5071_v40 = vadd.f32 %v5048_v1, %v4800_v60  ;;  %v12378_v53 = vpop.f32.mrf.mxu3  ;;  %6351 = vmatmul.bf16.gmra.mxu2 %v8781_v10  ;;  %v5230_v35 = vmul.f32 %v12171_v34, %v5214_v44  ;;  %v5057_v60 = vpop.f32.mrf.mxu1 }
 0x403   : > { %5256 = vadd.xlane.f32.xlu1 %v5230_v35  ;;  %v5087_v39 = vadd.f32 %v12145_v47, %v5071_v40  ;;  %6578 = vmatpush.bf16.msra.mxu3 %v8812_v54  ;;  %v12817_v35 = vld [vmem:[#allocation10_spill] sm:$0xff] }
 0x404   : > { %v4779_v41 = vpop.f32.mrf.mxu2 }
 0x405   : > { %v4780_v31 = vadd.f32 %v4779_v41, %v12327_v4  ;;  %v5103_v11 = vmax.f32 %v5087_v39, 0.0  ;;  %v12818_v39 = vld [vmem:[#allocation15_spill] sm:$0xff] }
 0x407   : > { %v4801_v45 = vadd.f32 %v4780_v31, %v12809_v17  ;;  %v5215_v57 = vmul.f32 %v12810_v12, %v5103_v11  ;;  %6579 = vmatpush.bf16.msra.mxu3 %v8811_v3  ;;  %v5006_v50 = vpop.f32.mrf.mxu0 }
 0x408   : > { %v5056_v43 = vadd.f32 %v5055_v30, %v5006_v50 }
 0x409   : > { %v5072_v28 = vadd.f32 %v5051_v19, %v4801_v45  ;;  %v12391_v58 = vpop.f32.mrf.mxu3  ;;  %v5231_v13 = vmul.f32 %v12171_v34, %v5215_v57  ;;  %v12421_v45 = vld [vmem:[#allocation3] ss:$0 sm:$0xff]  ;;  %v12819_v57 = vld [vmem:[#allocation33_spill] sm:$0xff] }
 0x40b   : > { %5258 = vadd.xlane.f32.xlu0 %v5231_v13  ;;  %v5088_v4 = vadd.f32 %v12145_v47, %v5072_v28  ;;  %6580 = vmatpush.bf16.msra.mxu3 %v8810_v56 }
 0x40c   : > { %v4781_v14 = vpop.f32.mrf.mxu2 }
 0x40d   : > { %v4782_v32 = vadd.f32 %v4781_v14, %v12337_v27  ;;  %v5104_v59 = vmax.f32 %v5088_v4, 0.0 }
 0x40e   : > { %6077 = vmatmul.bf16.gmra.mxu3 %v5904_v26 }
 0x40f   : > { %v4802_v51 = vadd.f32 %v4782_v32, %v12812_v8  ;;  %v5216_v61 = vmul.f32 %v12813_v49, %v5104_v59  ;;  %v5008_v44 = vpop.f32.mrf.mxu0 }
 0x410   : > { %v5058_v40 = vadd.f32 %v5057_v60, %v5008_v44 }
 0x411   : > { %v5073_v33 = vadd.f32 %v5053_v15, %v4802_v51  ;;  %v12403_v7 = vpop.f32.mrf.mxu3  ;;  %6356 = vmatmul.bf16.gmra.mxu2 %v8782_v55  ;;  %v5232_v27 = vmul.f32 %v12171_v34, %v5216_v61 }
 0x413   : > { %5260 = vadd.xlane.f32.xlu2 %v5232_v27  ;;  %v5089_v22 = vadd.f32 %v12145_v47, %v5073_v33 }
 0x414   : > { %v4784_v6 = vpop.f32.mrf.mxu2 }
 0x415   : > { %v4785_v9 = vadd.f32 %v4784_v6, %v12355_v48  ;;  %v5105_v21 = vmax.f32 %v5089_v22, 0.0 }
 0x417   : > { %v4803_v25 = vadd.f32 %v4785_v9, %v12814_v20  ;;  %v5217_v52 = vmul.f32 %v12815_v16, %v5105_v21  ;;  %v12464_v56 = vpop.f32.mrf.mxu0  ;;  %v12470_v20 = vpop.f32.mrf.mxu1 }
 0x419   : > { %v5074_v46 = vadd.f32 %v5056_v43, %v4803_v25  ;;  %v5603_v5 = vpop.f32.mrf.mxu3  ;;  %v5233_v18 = vmul.f32 %v12171_v34, %v5217_v52 }
 0x41b   : > { %5262 = vadd.xlane.f32.xlu1 %v5233_v18  ;;  %v5090_v1 = vadd.f32 %v12145_v47, %v5074_v46 }
 0x41c   : > { %v4786_v48 = vpop.f32.mrf.mxu2 }
 0x41d   : > { %v4787_v10 = vadd.f32 %v4786_v48, %v12367_v37  ;;  %v5106_v63 = vmax.f32 %v5090_v1, 0.0 }
 0x41e   : > { %6082 = vmatmul.bf16.gmra.mxu3 %v12816_v36 }
 0x41f   : > { %v4804_v2 = vadd.f32 %v4787_v10, %v12817_v35  ;;  %v5218_v41 = vmul.f32 %v12818_v39, %v5106_v63  ;;  %v12481_v18 = vpop.f32.mrf.mxu1 }
 0x421   : > { %v5075_v31 = vadd.f32 %v5058_v40, %v4804_v2  ;;  %v5606_v11 = vpop.f32.mrf.mxu3  ;;  %v5234_v54 = vmul.f32 %v12171_v34, %v5218_v41 }
 0x423   : > { %5264 = vadd.xlane.f32.xlu0 %v5234_v54  ;;  %v5091_v19 = vadd.f32 %v12145_v47, %v5075_v31 }
 0x424   : > { %v12461_v9 = vpop.f32.mrf.mxu2 }
 0x425   : > { %v5107_v17 = vmax.f32 %v5091_v19, 0.0 }
 0x426   : > { %v5237_v37 = vpop.xlane.xlu2 %5236 }
 0x427   : > { %v5268_v12 = vadd.f32 %v12421_v45, %v5237_v37  ;;  %v5219_v62 = vmul.f32 %v12819_v57, %v5107_v17  ;;  %v12493_v40 = vpop.f32.mrf.mxu1 }
 0x429   : > { %5284 = vst.msk [vmem:[%s11618_s11 + $0x80] sm:$0xff] %vm3321_vm3, %v5268_v12  ;;  %v5608_v28 = vpop.f32.mrf.mxu3  ;;  %v5235_v13 = vmul.f32 %v12171_v34, %v5219_v62 }
 0x42b   : > { %5266 = vadd.xlane.f32.xlu2 %v5235_v13 }
 0x42c   : > { %v12473_v52 = vpop.f32.mrf.mxu2 }
 0x42e   : > { %6087 = vmatmul.bf16.gmra.mxu3 %v12820_v23  ;;  %v5239_v4 = vpop.xlane.xlu1 %5238 }
 0x42f   : > { %v5269_v14 = vadd.f32 %v12421_v45, %v5239_v4  ;;  %v12505_v54 = vpop.f32.mrf.mxu1 }
 0x431   : > { %5285 = vst.msk [vmem:[%s11618_s11 + $0x88] sm:$0xff] %vm3321_vm3, %v5269_v14  ;;  %v5611_v32 = vpop.f32.mrf.mxu3 }
 0x434   : > { %v12489_v63 = vpop.f32.mrf.mxu2 }
 0x436   : > { %v5241_v24 = vpop.xlane.xlu0 %5240 }
 0x437   : > { %v5270_v26 = vadd.f32 %v12421_v45, %v5241_v24 }
 0x439   : > { %5286 = vst.msk [vmem:[%s11618_s11 + $0x90] sm:$0xff] %vm3321_vm3, %v5270_v26  ;;  %v5613_v59 = vpop.f32.mrf.mxu3 }
 0x43c   : > { %v12500_v39 = vpop.f32.mrf.mxu2 }
 0x43e   : > { %6581 = vmatmul.bf16.vlgmr.msra.gmra.mxu3 %v12230_v29  ;;  %v5243_v3 = vpop.xlane.xlu2 %5242 }
 0x43f   : > { %v5271_v15 = vadd.f32 %v12421_v45, %v5243_v3 }
 0x441   : > { %5287 = vst.msk [vmem:[%s11618_s11 + $0x98] sm:$0xff] %vm3321_vm3, %v5271_v15  ;;  %v5625_v8 = vpop.f32.mrf.mxu3 }
 0x442   : > { %v12440_v51 = vadd.f32 %v5625_v8, %v12378_v53 }
 0x444   : > { %v12509_v37 = vpop.f32.mrf.mxu2 }
 0x446   : > { %v5245_v55 = vpop.xlane.xlu1 %5244 }
 0x447   : > { %v5272_v49 = vadd.f32 %v12421_v45, %v5245_v55 }
 0x449   : > { %5288 = vst.msk [vmem:[%s11618_s11 + $0xa0] sm:$0xff] %vm3321_vm3, %v5272_v49  ;;  %v5627_v61 = vpop.f32.mrf.mxu3 }
 0x44a   : > { %v12446_v33 = vadd.f32 %v5627_v61, %v12391_v58 }
 0x44c   : > { %v12519_v4 = vpop.f32.mrf.mxu2 }
 0x44e   : > { %6586 = vmatmul.bf16.gmra.mxu3 %v12288_v0  ;;  %v5247_v29 = vpop.xlane.xlu0 %5246 }
 0x44f   : > { %v5273_v27 = vadd.f32 %v12421_v45, %v5247_v29 }
 0x451   : > { %5289 = vst.msk [vmem:[%s11618_s11 + $0xa8] sm:$0xff] %vm3321_vm3, %v5273_v27  ;;  %v5630_v30 = vpop.f32.mrf.mxu3 }
 0x452   : > { %v12453_v53 = vadd.f32 %v5630_v30, %v12403_v7 }
 0x454   : > { %v12530_v15 = vpop.f32.mrf.mxu2 }
 0x456   : > { %v5249_v22 = vpop.xlane.xlu2 %5248 }
 0x457   : > { %v5274_v50 = vadd.f32 %v12421_v45, %v5249_v22 }
 0x459   : > { %5290 = vst.msk [vmem:[%s11618_s11 + $0xb0] sm:$0xff] %vm3321_vm3, %v5274_v50  ;;  %v5632_v58 = vpop.f32.mrf.mxu3 }
 0x45a   : > { %v12458_v6 = vadd.f32 %v5632_v58, %v5603_v5  ;;  %v12479_v5 = vpop.f32.mrf.mxu0 }
 0x45c   : > { %v12541_v27 = vpop.f32.mrf.mxu2 }
 0x45e   : > { %6591 = vmatmul.bf16.gmra.mxu3 %v12323_v42  ;;  %v5251_v0 = vpop.xlane.xlu1 %5250 }
 0x45f   : > { %v5275_v21 = vadd.f32 %v12421_v45, %v5251_v0 }
 0x461   : > { %5291 = vst.msk [vmem:[%s11618_s11 + $0xb8] sm:$0xff] %vm3321_vm3, %v5275_v21  ;;  %v5635_v7 = vpop.f32.mrf.mxu3 }
 0x462   : > { %v12468_v43 = vadd.f32 %v5635_v7, %v5606_v11  ;;  %v12491_v44 = vpop.f32.mrf.mxu0 }
 0x464   : > { %v6342_v58 = vpop.f32.mrf.mxu2 }
 0x466   : > { %v5253_v25 = vpop.xlane.xlu0 %5252 }
 0x467   : > { %v5276_v16 = vadd.f32 %v12421_v45, %v5253_v25  ;;  %v5751_v25 = vadd.f32 %v12461_v9, %v12440_v51 }
 0x469   : > { %5292 = vst.msk [vmem:[%s11618_s11 + $0xc0] sm:$0xff] %vm3321_vm3, %v5276_v16  ;;  %v5637_v42 = vpop.f32.mrf.mxu3 }
 0x46a   : > { %v12477_v46 = vadd.f32 %v5637_v42, %v5608_v28  ;;  %v12502_v31 = vpop.f32.mrf.mxu0  ;;  %v12516_v28 = vpop.f32.mrf.mxu1 }
 0x46c   : > { %v6344_v16 = vpop.f32.mrf.mxu2 }
 0x46e   : > { %6596 = vmatmul.bf16.gmra.mxu3 %v12349_v38  ;;  %v5255_v1 = vpop.xlane.xlu2 %5254 }
 0x46f   : > { %v5277_v60 = vadd.f32 %v12421_v45, %v5255_v1 }
 0x471   : > { %5293 = vst.msk [vmem:[%s11618_s11 + $0xc8] sm:$0xff] %vm3321_vm3, %v5277_v60  ;;  %v5640_v48 = vpop.f32.mrf.mxu3 }
 0x472   : > { %v12487_v10 = vadd.f32 %v5640_v48, %v5611_v32  ;;  %v12512_v57 = vpop.f32.mrf.mxu0  ;;  %v12525_v24 = vpop.f32.mrf.mxu1  ;;  %v5780_v48 = vadd.f32 %v12464_v56, %v5751_v25 }
 0x474   : > { %v6347_v51 = vpop.f32.mrf.mxu2 }
 0x476   : > { %v5257_v36 = vpop.xlane.xlu1 %5256 }
 0x477   : > { %v5278_v35 = vadd.f32 %v12421_v45, %v5257_v36 }
 0x479   : > { %5294 = vst.msk [vmem:[%s11618_s11 + $0xd0] sm:$0xff] %vm3321_vm3, %v5278_v35  ;;  %v5642_v38 = vpop.f32.mrf.mxu3 }
 0x47a   : > { %v12498_v2 = vadd.f32 %v5642_v38, %v5613_v59  ;;  %v12523_v32 = vpop.f32.mrf.mxu0  ;;  %v12534_v49 = vpop.f32.mrf.mxu1  ;;  %v5753_v38 = vadd.f32 %v12473_v52, %v12446_v33 }
 0x47c   : > { %v5782_v9 = vadd.f32 %v12479_v5, %v5753_v38 }
 0x47e   : > { %v5259_v41 = vpop.xlane.xlu0 %5258 }
 0x47f   : > { %v5279_v11 = vadd.f32 %v12421_v45, %v5259_v41 }
 0x481   : > { %5295 = vst.msk [vmem:[%s11618_s11 + $0xd8] sm:$0xff] %vm3321_vm3, %v5279_v11  ;;  %v6073_v19 = vpop.f32.mrf.mxu3 }
 0x482   : > { %v12532_v8 = vpop.f32.mrf.mxu0  ;;  %v12545_v22 = vpop.f32.mrf.mxu1  ;;  %v6074_v1 = vadd.f32 %v6073_v19, %v12470_v20 }
 0x484   : > { %v6093_v35 = vadd.f32 %v6074_v1, %v5780_v48  ;;  %v6349_v1 = vpop.f32.mrf.mxu2 }
 0x486   : > { %v5261_v17 = vpop.xlane.xlu2 %5260 }
 0x487   : > { %v5280_v12 = vadd.f32 %v12421_v45, %v5261_v17 }
 0x489   : > { %5296 = vst.msk [vmem:[%s11618_s11 + $0xe0] sm:$0xff] %vm3321_vm3, %v5280_v12  ;;  %v6075_v62 = vpop.f32.mrf.mxu3 }
 0x48a   : > { %v12543_v30 = vpop.f32.mrf.mxu0  ;;  %v6553_v7 = vpop.f32.mrf.mxu1  ;;  %v6076_v17 = vadd.f32 %v6075_v62, %v12481_v18 }
 0x48c   : > { %v6094_v20 = vadd.f32 %v6076_v17, %v5782_v9 }
 0x48e   : > { %v5263_v13 = vpop.xlane.xlu1 %5262 }
 0x48f   : > { %v5281_v23 = vadd.f32 %v12421_v45, %v5263_v13 }
 0x491   : > { %5297 = vst.msk [vmem:[%s11618_s11 + $0xe8] sm:$0xff] %vm3321_vm3, %v5281_v23  ;;  %v6078_v14 = vpop.f32.mrf.mxu3 }
 0x492   : > { %v6371_v0 = vpop.f32.mrf.mxu0  ;;  %v6555_v36 = vpop.f32.mrf.mxu1 }
 0x493   : > { %v6372_v41 = vadd.f32 %v6371_v0, %v6342_v58  ;;  %v12821_v58 = vld [vmem:[#allocation36_spill] sm:$0xff] }
 0x495   : > { %v6391_v12 = vadd.f32 %v6372_v41, %v6093_v35  ;;  %v12822_v41 = vld [vmem:[#allocation35_spill] sm:$0xff] }
 0x496   : > { %v5265_v26 = vpop.xlane.xlu0 %5264 }
 0x497   : > { %v5282_v59 = vadd.f32 %v12421_v45, %v5265_v26 }
 0x499   : > { %5298 = vst.msk [vmem:[%s11618_s11 + $0xf0] sm:$0xff] %vm3321_vm3, %v5282_v59  ;;  %v6080_v3 = vpop.f32.mrf.mxu3  ;;  %v5756_v59 = vadd.f32 %v12489_v63, %v12453_v53  ;;  %v5758_v63 = vadd.f32 %v12500_v39, %v12458_v6  ;;  %v6352_v6 = vpop.f32.mrf.mxu2  ;;  %v5761_v39 = vadd.f32 %v12509_v37, %v12468_v43  ;;  %v5763_v37 = vadd.f32 %v12519_v4, %v12477_v46  ;;  %v9068_v46 = vld [vmem:[%s12654_s5] ss:$0 sm:$0xff] }
 0x49a   : > { %v6373_v60 = vpop.f32.mrf.mxu0  ;;  %v6558_v56 = vpop.f32.mrf.mxu1 }
 0x49b   : > { %v5785_v5 = vadd.f32 %v12491_v44, %v5756_v59  ;;  %v5787_v17 = vadd.f32 %v12502_v31, %v5758_v63 }
 0x49e   : > { %v5267_v55 = vpop.xlane.xlu2 %5266 }
 0x49f   : > { %v5283_v61 = vadd.f32 %v12421_v45, %v5267_v55  ;;  %v6374_v55 = vadd.f32 %v6373_v60, %v6344_v16 }
 0x4a1   : > { %5299 = vst.msk [vmem:[%s11618_s11 + $0xf8] sm:$0xff] %vm3321_vm3, %v5283_v61  ;;  %v12539_v29 = vpop.f32.mrf.mxu3  ;;  %v6079_v61 = vadd.f32 %v6078_v14, %v12493_v40  ;;  %v6392_v18 = vadd.f32 %v6374_v55, %v6094_v20 }
 0x4a2   : > { %v6376_v26 = vpop.f32.mrf.mxu0  ;;  %v6560_v14 = vpop.f32.mrf.mxu1  ;;  %v6084_v20 = vadd.f32 %v12539_v29, %v12516_v28 }
 0x4a3   : > { %v6095_v48 = vadd.f32 %v6079_v61, %v5785_v5  ;;  %v6377_v16 = vadd.f32 %v6376_v26, %v6347_v51  ;;  %v6354_v28 = vpop.f32.mrf.mxu2 }
 0x4a5   : > { %v6393_v38 = vadd.f32 %v6377_v16, %v6095_v48  ;;  %v5792_v48 = vadd.f32 %v12523_v32, %v5763_v37 }
 0x4a9   : > { %v12547_v50 = vpop.f32.mrf.mxu3 }
 0x4aa   : > { %v6378_v53 = vpop.f32.mrf.mxu0  ;;  %v6563_v55 = vpop.f32.mrf.mxu1 }
 0x4ab   : > { %v6379_v51 = vadd.f32 %v6378_v53, %v6349_v1 }
 0x4b1   : > { %v12549_v21 = vpop.f32.mrf.mxu3 }
 0x4b2   : > { %v6565_v53 = vpop.f32.mrf.mxu1  ;;  %v6089_v32 = vadd.f32 %v12549_v21, %v12534_v49 }
 0x4b9   : > { %v12553_v42 = vpop.f32.mrf.mxu3 }
 0x4c1   : > { %v6582_v11 = vpop.f32.mrf.mxu3 }
 0x4c2   : > { %v6583_v13 = vadd.f32 %v6582_v11, %v6553_v7 }
 0x4c4   : > { %v6602_v23 = vadd.f32 %v6583_v13, %v6391_v12 }
 0x4c6   : > { %v6610_v19 = vadd.f32 %v12145_v47, %v6602_v23 }
 0x4c8   : > { %v6618_v33 = vmax.f32 %v6610_v19, 0.0 }
 0x4c9   : > { %v6584_v52 = vpop.f32.mrf.mxu3 }
 0x4ca   : > { %v6585_v62 = vadd.f32 %v6584_v52, %v6555_v36  ;;  %v6674_v0 = vmul.f32 %v12821_v58, %v6618_v33  ;;  %v6081_v36 = vadd.f32 %v6080_v3, %v12505_v54  ;;  %v6381_v54 = vpop.f32.mrf.mxu0  ;;  %v5790_v33 = vadd.f32 %v12512_v57, %v5761_v39  ;;  %v12824_v57 = vld [vmem:[#allocation18_spill] sm:$0xff] }
 0x4cc   : > { %v6603_v7 = vadd.f32 %v6585_v62, %v6392_v18  ;;  %v6682_v25 = vmul.f32 %v12171_v34, %v6674_v0  ;;  %v6096_v9 = vadd.f32 %v6081_v36, %v5787_v17  ;;  %v6097_v18 = vadd.f32 %v6084_v20, %v5790_v33  ;;  %v12825_v36 = vld [vmem:[#allocation16_spill] sm:$0xff] }
 0x4cd   : > { %v6382_v62 = vadd.f32 %v6381_v54, %v6352_v6  ;;  %v6086_v0 = vadd.f32 %v12547_v50, %v12525_v24  ;;  %v5766_v24 = vadd.f32 %v12530_v15, %v12487_v10  ;;  %v6568_v10 = vpop.f32.mrf.mxu1  ;;  %v5768_v15 = vadd.f32 %v12541_v27, %v12498_v2 }
 0x4ce   : > { %v6611_v35 = vadd.f32 %v12145_v47, %v6603_v7  ;;  %6690 = vadd.xlane.f32.xlu2 %v6682_v25  ;;  %v6394_v19 = vadd.f32 %v6379_v51, %v6096_v9  ;;  %v6091_v6 = vadd.f32 %v12553_v42, %v12545_v22 }
 0x4cf   : > { %v6395_v5 = vadd.f32 %v6382_v62, %v6097_v18  ;;  %v6098_v63 = vadd.f32 %v6086_v0, %v5792_v48  ;;  %v12828_v62 = vld [vmem:[#allocation27_spill] sm:$0xff] }
 0x4d0   : > { %v6619_v40 = vmax.f32 %v6611_v35, 0.0 }
 0x4d1   : > { %v6587_v60 = vpop.f32.mrf.mxu3 }
 0x4d2   : > { %v6588_v44 = vadd.f32 %v6587_v60, %v6558_v56  ;;  %v6675_v11 = vmul.f32 %v12822_v41, %v6619_v40  ;;  %v12823_v56 = vld [vmem:[#allocation34_spill] sm:$0xff]  ;;  %v6383_v1 = vpop.f32.mrf.mxu0  ;;  %v5795_v41 = vadd.f32 %v12532_v8, %v5766_v24  ;;  %v12826_v8 = vld [vmem:[#allocation37_spill] sm:$0xff] }
 0x4d3   : > { %v6384_v50 = vadd.f32 %v6383_v1, %v6354_v28 }
 0x4d4   : > { %v6604_v12 = vadd.f32 %v6588_v44, %v6393_v38  ;;  %v6683_v13 = vmul.f32 %v12171_v34, %v6675_v11  ;;  %v6357_v44 = vpop.f32.mrf.mxu2 }
 0x4d5   : > { %v6570_v22 = vpop.f32.mrf.mxu1 }
 0x4d6   : > { %v6612_v23 = vadd.f32 %v12145_v47, %v6604_v12  ;;  %6692 = vadd.xlane.f32.xlu0 %v6683_v13  ;;  %v6099_v13 = vadd.f32 %v6089_v32, %v5795_v41 }
 0x4d8   : > { %v6620_v26 = vmax.f32 %v6612_v23, 0.0 }
 0x4d9   : > { %v6589_v3 = vpop.f32.mrf.mxu3 }
 0x4da   : > { %v6590_v31 = vadd.f32 %v6589_v3, %v6560_v14  ;;  %v6676_v59 = vmul.f32 %v12823_v56, %v6620_v26  ;;  %v6396_v14 = vadd.f32 %v6384_v50, %v6098_v63  ;;  %v6386_v12 = vpop.f32.mrf.mxu0  ;;  %v9069_v3 = vld [vmem:[%s12656_s7] ss:$0 sm:$0xff] }
 0x4db   : > { %v6387_v23 = vadd.f32 %v6386_v12, %v6357_v44 }
 0x4dc   : > { %v6605_v52 = vadd.f32 %v6590_v31, %v6394_v19  ;;  %v6684_v61 = vmul.f32 %v12171_v34, %v6676_v59  ;;  %v6359_v19 = vpop.f32.mrf.mxu2 }
 0x4dd   : > { %v6397_v39 = vadd.f32 %v6387_v23, %v6099_v13 }
 0x4de   : > { %v6613_v43 = vadd.f32 %v12145_v47, %v6605_v52  ;;  %6694 = vadd.xlane.f32.xlu1 %v6684_v61 }
 0x4e0   : > { %v6621_v58 = vmax.f32 %v6613_v43, 0.0 }
 0x4e1   : > { %v6592_v29 = vpop.f32.mrf.mxu3 }
 0x4e2   : > { %v6593_v7 = vadd.f32 %v6592_v29, %v6563_v55  ;;  %v6677_v25 = vmul.f32 %v12824_v57, %v6621_v58  ;;  %v6388_v31 = vpop.f32.mrf.mxu0 }
 0x4e3   : > { %v6389_v56 = vadd.f32 %v6388_v31, %v6359_v19 }
 0x4e4   : > { %v6606_v35 = vadd.f32 %v6593_v7, %v6395_v5  ;;  %v6685_v47 = vmul.f32 %v12171_v34, %v6677_v25 }
 0x4e6   : > { %v6614_v4 = vadd.f32 %v9068_v46, %v6606_v35  ;;  %6696 = vadd.xlane.f32.xlu2 %v6685_v47 }
 0x4e8   : > { %v6622_v16 = vmax.f32 %v6614_v4, 0.0 }
 0x4e9   : > { %v6594_v40 = vpop.f32.mrf.mxu3 }
 0x4ea   : > { %v6595_v60 = vadd.f32 %v6594_v40, %v6565_v53  ;;  %v6678_v38 = vmul.f32 %v12825_v36, %v6622_v16 }
 0x4ec   : > { %v6607_v11 = vadd.f32 %v6595_v60, %v6396_v14  ;;  %v6686_v17 = vmul.f32 %v12171_v34, %v6678_v38  ;;  %v5797_v34 = vadd.f32 %v12543_v30, %v5768_v15  ;;  %v12827_v30 = vld [vmem:[#allocation20_spill] sm:$0xff] }
 0x4ee   : > { %v6615_v9 = vadd.f32 %v9068_v46, %v6607_v11  ;;  %6698 = vadd.xlane.f32.xlu0 %v6686_v17  ;;  %v6100_v2 = vadd.f32 %v6091_v6, %v5797_v34 }
 0x4f0   : > { %v6623_v49 = vmax.f32 %v6615_v9, 0.0  ;;  %v6398_v55 = vadd.f32 %v6389_v56, %v6100_v2 }
 0x4f1   : > { %v6597_v21 = vpop.f32.mrf.mxu3 }
 0x4f2   : > { %v6598_v51 = vadd.f32 %v6597_v21, %v6568_v10  ;;  %v6679_v26 = vmul.f32 %v12826_v8, %v6623_v49 }
 0x4f4   : > { %v6608_v54 = vadd.f32 %v6598_v51, %v6397_v39  ;;  %v6687_v20 = vmul.f32 %v9069_v3, %v6679_v26 }
 0x4f6   : > { %v6616_v27 = vadd.f32 %v9068_v46, %v6608_v54  ;;  %6700 = vadd.xlane.f32.xlu1 %v6687_v20 }
 0x4f8   : > { %v6624_v59 = vmax.f32 %v6616_v27, 0.0 }
 0x4f9   : > { %v6599_v42 = vpop.f32.mrf.mxu3 }
 0x4fa   : > { %v6600_v33 = vadd.f32 %v6599_v42, %v6570_v22  ;;  %v6680_v52 = vmul.f32 %v12827_v30, %v6624_v59 }
 0x4fc   : > { %v6609_v61 = vadd.f32 %v6600_v33, %v6398_v55  ;;  %v6688_v18 = vmul.f32 %v9069_v3, %v6680_v52 }
 0x4fe   : > { %v6617_v43 = vadd.f32 %v9068_v46, %v6609_v61  ;;  %6702 = vadd.xlane.f32.xlu2 %v6688_v18 }
 0x500   : > { %v6625_v37 = vmax.f32 %v6617_v43, 0.0 }
 0x502   : > { %v6681_v58 = vmul.f32 %v12828_v62, %v6625_v37 }
 0x504   : > { %v6689_v28 = vmul.f32 %v9069_v3, %v6681_v58 }
 0x506   : > { %6704 = vadd.xlane.f32.xlu0 %v6689_v28 }
 0x541   : > { %v6691_v29 = vpop.xlane.xlu2 %6690 }
 0x542   : > { %v6706_v0 = vadd.f32 %v12421_v45, %v6691_v29 }
 0x544   : > { %6714 = vst.msk [vmem:[%s11618_s11 + $0x100] sm:$0xff] %vm3321_vm3, %v6706_v0 }
 0x549   : > { %v6693_v5 = vpop.xlane.xlu0 %6692 }
 0x54a   : > { %v6707_v7 = vadd.f32 %v12421_v45, %v6693_v5 }
 0x54c   : > { %6715 = vst.msk [vmem:[%s11618_s11 + $0x108] sm:$0xff] %vm3321_vm3, %v6707_v7 }
 0x551   : > { %v6695_v57 = vpop.xlane.xlu1 %6694 }
 0x552   : > { %v6708_v25 = vadd.f32 %v12421_v45, %v6695_v57 }
 0x554   : > { %6716 = vst.msk [vmem:[%s11618_s11 + $0x110] sm:$0xff] %vm3321_vm3, %v6708_v25 }
 0x559   : > { %v6697_v1 = vpop.xlane.xlu2 %6696 }
 0x55a   : > { %v6709_v48 = vadd.f32 %v12421_v45, %v6697_v1 }
 0x55c   : > { %6717 = vst.msk [vmem:[%s11618_s11 + $0x118] sm:$0xff] %vm3321_vm3, %v6709_v48 }
 0x561   : > { %v6699_v35 = vpop.xlane.xlu0 %6698 }
 0x562   : > { %v6710_v47 = vadd.f32 %v12421_v45, %v6699_v35 }
 0x564   : > { %6718 = vst.msk [vmem:[%s11618_s11 + $0x120] sm:$0xff] %vm3321_vm3, %v6710_v47 }
 0x569   : > { %v6701_v53 = vpop.xlane.xlu1 %6700 }
 0x56a   : > { %v6711_v63 = vadd.f32 %v12421_v45, %v6701_v53 }
 0x56c   : > { %6719 = vst.msk [vmem:[%s11618_s11 + $0x128] sm:$0xff] %vm3321_vm3, %v6711_v63 }
 0x571   : > { %v6703_v46 = vpop.xlane.xlu2 %6702 }
 0x572   : > { %v6712_v4 = vadd.f32 %v12421_v45, %v6703_v46 }
 0x574   : > { %6720 = vst.msk [vmem:[%s11618_s11 + $0x130] sm:$0xff] %vm3321_vm3, %v6712_v4 }
 0x579   : > { %v6705_v24 = vpop.xlane.xlu0 %6704 }
 0x57a   : > { %v6713_v50 = vadd.f32 %v12421_v45, %v6705_v24 }
 0x57c   : > { %6721 = vst.msk [vmem:[%s11618_s11 + $0x138] sm:$0xff] %vm3321_vm3, %v6713_v50 }
 0x57d PF: > { %p22_p4 = scmp.ge.s32.totalorder %s9279_s22, 4   ;;  %s12829_s11 = smov %s9169_s12 }
 0x57e   : > { %s12830_s12 = smov %s9173_s13  ;;  %s12831_s13 = smov %s9292_s27 }
 0x57f   : > { %s12832_s14 = smov %s9279_s22  ;;  %24 = sbr.rel (!%p22_p4) target bundleno = 7 (0x7), region = 104 }
 0x584   :  { %6743 = vsyncpa [#allocation5], 1 }
 0x585   :  { %6745 = vsyncpa [#allocation5 + $0x1], 1 }
 0x586   :  { %6746 = vsyncpa [#allocation7], 1 }

</bundles_post_ra>
